<compile_context>
chip_gen: v7x
topology: tpu7x:2x2x1
jax: 0.10.0
libtpu: 0.0.40
codegen_flags: <defaults>
</compile_context>

<pallas_src>
import functools

import jax
import jax.numpy as jnp
from jax import lax
from jax.experimental import pallas as pl
from jax.experimental.pallas import tpu as pltpu


def _round_up(x, m):
    return (x + m - 1) // m * m


def _pixel_tiling(n):
    """Return (tile, padded_n) with tile | padded_n and padded_n >= n."""
    for tm in (2048, 1024, 512, 256, 128):
        if n % tm == 0 and n // tm >= 2:
            return tm, n
    if n % 128 == 0:                       # small n: a single full-width tile
        return n, n
    tm = 512 if n > 512 else 128           # pad pixels; kernel masks the tail
    return tm, _round_up(n, tm)


def _vmem_limit_bytes():
    """Generation-aware scoped-VMEM limit (v5e/v6e: 128 MiB, v7x: 64 MiB)."""
    try:
        cap = getattr(pltpu.get_tpu_info(), "vmem_capacity_bytes", None)
        if cap:
            return int(min(cap * 3 // 4, 96 * 1024 * 1024))
    except Exception:
        pass
    return 48 * 1024 * 1024


# -----------------------------------------------------------------------------
# Fused kernel: per-member 1x1 conv + ReLU + global mean + k-means (Lloyd).
# grid = (E members ["parallel"], T pixel tiles ["arbitrary"]).
# -----------------------------------------------------------------------------
def _ensemble_kernel(x_ref, w_ref, b_ref, idx_ref, glob_ref, cent_ref, emb_ref,
                     *, n_valid, n_pad, k_valid, iters):
    # x_ref:    [B, C, TM] f32   pixel tile for all batches (NCHW layout)
    # w_ref:    [C, Dm]    f32   this member's weights (+ zero "count" column)
    # b_ref:    [1, Dm]    f32   this member's bias    (+ 1.0 "count" bias)
    # idx_ref:  [1, Kp]    i32   this member's centroid-init pixel indices
    # glob_ref: [B, Dm]    f32   resident accumulator -> global mean
    # cent_ref: [Kp, Dm]   f32   final cluster centers
    # emb_ref:  [T, TM, Dm] f32  VMEM-resident batch-0 embedding slab
    t = pl.program_id(1)
    T = pl.num_programs(1)
    B, C, TM = x_ref.shape
    Dm = w_ref.shape[1]
    Kp = cent_ref.shape[0]

    w = w_ref[...]
    bias = b_ref[...]

    if n_valid != n_pad:
        row = t * TM + lax.broadcasted_iota(jnp.int32, (TM, 1), 0)
        rowmask = (row < n_valid).astype(jnp.float32)           # [TM, 1]
    else:
        rowmask = None

    # ---- extractor: ReLU(x . W + b) per batch (static loop, B is tiny) ----
    partials = []
    for b_i in range(B):
        eb = lax.dot_general(x_ref[b_i], w, (((0,), (0,)), ((), ())),
                             preferred_element_type=jnp.float32)  # [TM, Dm]
        eb = jnp.maximum(eb + bias, 0.0)
        if rowmask is not None:
            eb = eb * rowmask                                     # zero pad rows
        if b_i == 0:
            emb_ref[t] = eb                                       # batch-0 slab
        partials.append(jnp.sum(eb, axis=0, keepdims=True))       # [1, Dm]
    partial = jnp.concatenate(partials, axis=0)                   # [B, Dm]

    @pl.when(t == 0)
    def _():
        glob_ref[...] = jnp.zeros_like(glob_ref)

    glob_ref[...] += partial

    @pl.when(t == T - 1)
    def _():
        # finalize the global mean (divide by the number of *valid* pixels)
        glob_ref[...] = glob_ref[...] * jnp.float32(1.0 / n_valid)

        # ---- k-means (Lloyd) on the VMEM-resident batch-0 embedding ----
        # TODO(synk): kmeans_pytorch iterates until the center shift < tol and
        # uses its own random init; here: fixed Lloyd iterations + index init.
        xa = emb_ref[...].reshape(n_pad, Dm)                      # [Npad, Dm]
        x_sq = jnp.sum(xa * xa, axis=1, keepdims=True)            # [Npad, 1]
        col = lax.broadcasted_iota(jnp.int32, (n_pad, Kp), 1)     # [Npad, Kp]
        kcol = lax.broadcasted_iota(jnp.int32, (1, Kp), 1)        # [1, Kp]
        pen = jnp.where(kcol >= k_valid, jnp.inf, 0.0).astype(jnp.float32)

        # centroid init: gather K distinct pixels through a one-hot MXU matmul
        row_n = lax.broadcasted_iota(jnp.int32, (n_pad, Kp), 0)
        init_oh = (row_n == idx_ref[...]).astype(jnp.float32)     # [Npad, Kp]
        c0 = lax.dot_general(init_oh, xa, (((0,), (0,)), ((), ())),
                             preferred_element_type=jnp.float32)  # [Kp, Dm]

        def lloyd(_, c):
            c_sq = jnp.sum(c * c, axis=1)[None, :] + pen          # [1, Kp]
            xc = lax.dot_general(xa, c, (((1,), (1,)), ((), ())),
                                 preferred_element_type=jnp.float32)
            d = x_sq - 2.0 * xc + c_sq                            # [Npad, Kp]
            # deterministic first-index argmin over clusters
            mind = jnp.min(d, axis=1, keepdims=True)
            assign = jnp.min(jnp.where(d <= mind, col, Kp),
                             axis=1, keepdims=True)
            onehot = (col == assign).astype(jnp.float32)          # [Npad, Kp]
            sums = lax.dot_general(onehot, xa, (((0,), (0,)), ((), ())),
                                   preferred_element_type=jnp.float32)
            counts = sums[:, Dm - 1:Dm]            # ones column -> counts (MXU)
            new_c = sums / jnp.maximum(counts, 1.0)               # exact divide
            return jnp.where(counts > 0.0, new_c, c)              # keep empty

        cent_ref[...] = lax.fori_loop(0, iters, lloyd, c0)


# -----------------------------------------------------------------------------
# Ensemble forward (mirrors EnsembleFeatureExtractor_ot.forward)
# -----------------------------------------------------------------------------
def ensemble_forward(x_nchw, extractor_params, *, cluster_number=5,
                     kmeans_iters=20):
    B, C, H, W = x_nchw.shape
    N = H * W
    E = len(extractor_params)
    D = extractor_params[0][0].shape[1]
    Dm = D + 1                             # +1 ones column -> k-means counts
    Kp = max(_round_up(cluster_number, 8), 8)

    TM, N_pad = _pixel_tiling(N)
    T = N_pad // TM

    # NCHW -> [B, C, N]: a free reshape (no transpose / cast HBM pass).
    x_bcn = x_nchw.reshape(B, C, N)
    if N_pad != N:
        x_bcn = jnp.pad(x_bcn, ((0, 0), (0, 0), (0, N_pad - N)))

    # Per-member weights with an appended zero column whose bias is 1.0: the
    # matmul then emits a "ones" column used as the k-means count accumulator.
    w_all = jnp.stack(
        [jnp.concatenate([Wc, jnp.zeros((C, 1), Wc.dtype)], axis=1)
         for (Wc, _) in extractor_params]).astype(jnp.float32)     # [E, C, Dm]
    b_all = jnp.stack(
        [jnp.concatenate([bc.reshape(1, D), jnp.ones((1, 1), bc.dtype)], axis=1)
         for (_, bc) in extractor_params]).astype(jnp.float32)     # [E, 1, Dm]

    # Centroid init: K distinct batch-0 pixel indices per member.
    idx_rows = []
    for e in range(E):
        sel = jax.random.choice(jax.random.PRNGKey(e), N,
                                shape=(cluster_number,), replace=False)
        idx_rows.append(jnp.pad(sel.astype(jnp.int32),
                                (0, Kp - cluster_number), constant_values=-1))
    init_idx = jnp.stack(idx_rows)[:, None, :]                     # [E, 1, Kp]

    kernel = functools.partial(_ensemble_kernel, n_valid=N, n_pad=N_pad,
                               k_valid=cluster_number, iters=kmeans_iters)

    flops = (2 * E * B * N_pad * C * Dm
             + E * kmeans_iters * 4 * N_pad * Kp * Dm)
    bytes_acc = (E * B * C * N_pad * 4 + E * C * Dm * 4
                 + E * (B + Kp) * Dm * 4)

    # TODO(synk): for very large H*W, switch the embedding scratch to bf16 and
    # tile the Lloyd distance/accumulate step over pixels to bound VMEM.
    glob, centers = pl.pallas_call(
        kernel,
        out_shape=(jax.ShapeDtypeStruct((E, B, Dm), jnp.float32),
                   jax.ShapeDtypeStruct((E, Kp, Dm), jnp.float32)),
        grid=(E, T),
        in_specs=[pl.BlockSpec((B, C, TM), lambda e, t: (0, 0, t)),
                  pl.BlockSpec((None, C, Dm), lambda e, t: (e, 0, 0)),
                  pl.BlockSpec((None, 1, Dm), lambda e, t: (e, 0, 0)),
                  pl.BlockSpec((None, 1, Kp), lambda e, t: (e, 0, 0))],
        out_specs=(pl.BlockSpec((None, B, Dm), lambda e, t: (e, 0, 0)),
                   pl.BlockSpec((None, Kp, Dm), lambda e, t: (e, 0, 0))),
        scratch_shapes=[pltpu.VMEM((T, TM, Dm), jnp.float32)],
        compiler_params=pltpu.CompilerParams(
            dimension_semantics=("parallel", "arbitrary"),
            vmem_limit_bytes=_vmem_limit_bytes()),
        cost_estimate=pl.CostEstimate(flops=int(flops), transcendentals=0,
                                      bytes_accessed=int(bytes_acc)),
    )(x_bcn, w_all, b_all, init_idx)

    features = {}
    features_local = {}
    for e in range(E):
        features[e] = jnp.squeeze(glob[e, :, :D])                  # .squeeze()
        features_local[e] = centers[e, :cluster_number, :D][None]  # [1, K, D]
    return features, features_local


if __name__ == "__main__":
    B, C, H, W = 2, 4, 16, 16
    D = 32                       # embedding dim of each synthetic extractor
    NUM_EXTRACTORS = 2
    CLUSTER_NUMBER = 5

    key = jax.random.PRNGKey(0)
    kx, *kparams = jax.random.split(key, 1 + 2 * NUM_EXTRACTORS)

    x = jax.random.normal(kx, (B, C, H, W), dtype=jnp.float32)     # NCHW input

    extractor_params = []
    for e in range(NUM_EXTRACTORS):
        Wc = jax.random.normal(kparams[2 * e], (C, D), dtype=jnp.float32) * 0.5
        bc = jax.random.normal(kparams[2 * e + 1], (1, D), dtype=jnp.float32) * 0.1
        extractor_params.append((Wc, bc))

    features, features_local = ensemble_forward(
        x, extractor_params, cluster_number=CLUSTER_NUMBER, kmeans_iters=20)

    for v in features.values():
        jax.block_until_ready(v)
    for v in features_local.values():
        jax.block_until_ready(v)

    # shapes match the PyTorch module's outputs
    assert all(v.shape == (B, D) for v in features.values())
    assert all(v.shape == (1, CLUSTER_NUMBER, D) for v in features_local.values())

    # numeric sanity: global features == mean-pooled ReLU(x W + b)
    x_flat = jnp.transpose(x, (0, 2, 3, 1)).reshape(B, H * W, C)
    for e in range(NUM_EXTRACTORS):
        Wc, bc = extractor_params[e]
        ref = jnp.mean(jnp.maximum(x_flat @ Wc + bc, 0.0), axis=1)
        assert jnp.allclose(features[e], ref, atol=1e-3, rtol=1e-3)

    print("KERNEL_OK")
</pallas_src>

<mosaic_0001>
module attributes {stable_mosaic.version = 11 : i64} {
  func.func @_ensemble_kernel(%arg0: i32, %arg1: i32, %arg2: memref<2x4x128xf32, #tpu.memory_space<vmem>>, %arg3: memref<1x4x33xf32, #tpu.memory_space<vmem>>, %arg4: memref<1x1x33xf32, #tpu.memory_space<vmem>>, %arg5: memref<1x1x8xi32, #tpu.memory_space<vmem>>, %arg6: memref<1x2x33xf32, #tpu.memory_space<vmem>>, %arg7: memref<1x8x33xf32, #tpu.memory_space<vmem>>, %arg8: memref<2x128x33xf32, #tpu.memory_space<vmem>>) attributes {dimension_semantics = [#tpu.dimension_semantics<parallel>, #tpu.dimension_semantics<arbitrary>], iteration_bounds = array<i64: 2, 2>, scalar_prefetch = 0 : i64, scratch_operands = 1 : i64, tpu.core_type = #tpu.core_type<tc>, window_params = [{transform_indices = @transform_0, window_bounds = array<i64: 2, 4, 128>}, {transform_indices = @transform_1, window_bounds = array<i64: 1, 4, 33>}, {transform_indices = @transform_2, window_bounds = array<i64: 1, 1, 33>}, {transform_indices = @transform_3, window_bounds = array<i64: 1, 1, 8>}, {transform_indices = @transform_4, window_bounds = array<i64: 1, 2, 33>}, {transform_indices = @transform_5, window_bounds = array<i64: 1, 8, 33>}]} {
    %c0 = arith.constant 0 : index
    %c0_0 = arith.constant 0 : index
    %c0_1 = arith.constant 0 : index
    %0 = vector.load %arg3[%c0, %c0_0, %c0_1] : memref<1x4x33xf32, #tpu.memory_space<vmem>>, vector<1x4x33xf32>
    %1 = vector.shape_cast %0 : vector<1x4x33xf32> to vector<4x33xf32>
    %c0_2 = arith.constant 0 : index
    %c0_3 = arith.constant 0 : index
    %c0_4 = arith.constant 0 : index
    %2 = vector.load %arg4[%c0_2, %c0_3, %c0_4] : memref<1x1x33xf32, #tpu.memory_space<vmem>>, vector<1x1x33xf32>
    %3 = vector.shape_cast %2 : vector<1x1x33xf32> to vector<1x33xf32>
    %c0_5 = arith.constant 0 : index
    %c0_6 = arith.constant 0 : index
    %c0_7 = arith.constant 0 : index
    %4 = vector.load %arg2[%c0_5, %c0_6, %c0_7] : memref<2x4x128xf32, #tpu.memory_space<vmem>>, vector<1x4x128xf32>
    %5 = vector.shape_cast %4 : vector<1x4x128xf32> to vector<4x128xf32>
    %cst = arith.constant dense<0.000000e+00> : vector<128x33xf32>
    %6 = tpu.matmul %5, %1, %cst {dimension_numbers = #tpu.dot_dimension_numbers<[0], [0], [1], [1], [0, 1, 1, 1], [], []>} : vector<4x128xf32>, vector<4x33xf32>, vector<128x33xf32> -> vector<128x33xf32>
    %7 = vector.broadcast %3 : vector<1x33xf32> to vector<128x33xf32>
    %8 = arith.addf %6, %7 : vector<128x33xf32>
    %cst_8 = arith.constant 0.000000e+00 : f32
    %9 = vector.broadcast %cst_8 : f32 to vector<128x33xf32>
    %10 = arith.maximumf %8, %9 : vector<128x33xf32>
    %11 = arith.index_cast %arg1 : i32 to index
    %c0_9 = arith.constant 0 : index
    %c0_10 = arith.constant 0 : index
    %12 = vector.load %arg8[%11, %c0_9, %c0_10] : memref<2x128x33xf32, #tpu.memory_space<vmem>>, vector<1x128x33xf32>
    %13 = vector.shape_cast %12 : vector<1x128x33xf32> to vector<128x33xf32>
    %14 = vector.shape_cast %10 : vector<128x33xf32> to vector<1x128x33xf32>
    tpu.vector_store %arg8[%11, %c0_9, %c0_10], %14 {strides = array<i32>} : memref<2x128x33xf32, #tpu.memory_space<vmem>>, vector<1x128x33xf32>,
    %cst_11 = arith.constant dense<0.000000e+00> : vector<33xf32>
    %15 = vector.multi_reduction <add>, %10, %cst_11 [0] : vector<128x33xf32> to vector<33xf32>
    %16 = vector.shape_cast %15 : vector<33xf32> to vector<1x33xf32>
    %c1 = arith.constant 1 : index
    %c0_12 = arith.constant 0 : index
    %c0_13 = arith.constant 0 : index
    %17 = vector.load %arg2[%c1, %c0_12, %c0_13] : memref<2x4x128xf32, #tpu.memory_space<vmem>>, vector<1x4x128xf32>
    %18 = vector.shape_cast %17 : vector<1x4x128xf32> to vector<4x128xf32>
    %cst_14 = arith.constant dense<0.000000e+00> : vector<128x33xf32>
    %19 = tpu.matmul %18, %1, %cst_14 {dimension_numbers = #tpu.dot_dimension_numbers<[0], [0], [1], [1], [0, 1, 1, 1], [], []>} : vector<4x128xf32>, vector<4x33xf32>, vector<128x33xf32> -> vector<128x33xf32>
    %20 = vector.broadcast %3 : vector<1x33xf32> to vector<128x33xf32>
    %21 = arith.addf %19, %20 : vector<128x33xf32>
    %cst_15 = arith.constant 0.000000e+00 : f32
    %22 = vector.broadcast %cst_15 : f32 to vector<128x33xf32>
    %23 = arith.maximumf %21, %22 : vector<128x33xf32>
    %cst_16 = arith.constant dense<0.000000e+00> : vector<33xf32>
    %24 = vector.multi_reduction <add>, %23, %cst_16 [0] : vector<128x33xf32> to vector<33xf32>
    %25 = vector.shape_cast %24 : vector<33xf32> to vector<1x33xf32>
    %26 = tpu.concatenate %16, %25 in 0 : vector<1x33xf32>, vector<1x33xf32> -> vector<2x33xf32>
    %c0_i32 = arith.constant 0 : i32
    %27 = arith.cmpi eq, %arg1, %c0_i32 : i32
    %28 = arith.extui %27 : i1 to i32
    %c0_i32_17 = arith.constant 0 : i32
    %29 = arith.cmpi ne, %28, %c0_i32_17 : i32
    scf.if %29 {
      %cst_25 = arith.constant 0.000000e+00 : f32
      %39 = vector.broadcast %cst_25 : f32 to vector<2x33xf32>
      %c0_26 = arith.constant 0 : index
      %c0_27 = arith.constant 0 : index
      %c0_28 = arith.constant 0 : index
      %40 = vector.load %arg6[%c0_26, %c0_27, %c0_28] : memref<1x2x33xf32, #tpu.memory_space<vmem>>, vector<1x2x33xf32>
      %41 = vector.shape_cast %40 : vector<1x2x33xf32> to vector<2x33xf32>
      %42 = vector.shape_cast %39 : vector<2x33xf32> to vector<1x2x33xf32>
      tpu.vector_store %arg6[%c0_26, %c0_27, %c0_28], %42 {strides = array<i32>} : memref<1x2x33xf32, #tpu.memory_space<vmem>>, vector<1x2x33xf32>,
    } else {
    }
    %c0_18 = arith.constant 0 : index
    %c0_19 = arith.constant 0 : index
    %c0_20 = arith.constant 0 : index
    %30 = vector.load %arg6[%c0_18, %c0_19, %c0_20] : memref<1x2x33xf32, #tpu.memory_space<vmem>>, vector<1x2x33xf32>
    %31 = vector.shape_cast %30 : vector<1x2x33xf32> to vector<2x33xf32>
    %32 = arith.addf %31, %26 : vector<2x33xf32>
    %c0_21 = arith.constant 0 : index
    %c0_22 = arith.constant 0 : index
    %c0_23 = arith.constant 0 : index
    %33 = vector.load %arg6[%c0_21, %c0_22, %c0_23] : memref<1x2x33xf32, #tpu.memory_space<vmem>>, vector<1x2x33xf32>
    %34 = vector.shape_cast %33 : vector<1x2x33xf32> to vector<2x33xf32>
    %35 = vector.shape_cast %32 : vector<2x33xf32> to vector<1x2x33xf32>
    tpu.vector_store %arg6[%c0_21, %c0_22, %c0_23], %35 {strides = array<i32>} : memref<1x2x33xf32, #tpu.memory_space<vmem>>, vector<1x2x33xf32>,
    %c1_i32 = arith.constant 1 : i32
    %36 = arith.cmpi eq, %arg1, %c1_i32 : i32
    %37 = arith.extui %36 : i1 to i32
    %c0_i32_24 = arith.constant 0 : i32
    %38 = arith.cmpi ne, %37, %c0_i32_24 : i32
    scf.if %38 {
      %c0_25 = arith.constant 0 : index
      %c0_26 = arith.constant 0 : index
      %c0_27 = arith.constant 0 : index
      %39 = vector.load %arg6[%c0_25, %c0_26, %c0_27] : memref<1x2x33xf32, #tpu.memory_space<vmem>>, vector<1x2x33xf32>
      %40 = vector.shape_cast %39 : vector<1x2x33xf32> to vector<2x33xf32>
      %cst_28 = arith.constant 3.906250e-03 : f32
      %41 = vector.broadcast %cst_28 : f32 to vector<2x33xf32>
      %42 = arith.mulf %40, %41 : vector<2x33xf32>
      %c0_29 = arith.constant 0 : index
      %c0_30 = arith.constant 0 : index
      %c0_31 = arith.constant 0 : index
      %43 = vector.load %arg6[%c0_29, %c0_30, %c0_31] : memref<1x2x33xf32, #tpu.memory_space<vmem>>, vector<1x2x33xf32>
      %44 = vector.shape_cast %43 : vector<1x2x33xf32> to vector<2x33xf32>
      %45 = vector.shape_cast %42 : vector<2x33xf32> to vector<1x2x33xf32>
      tpu.vector_store %arg6[%c0_29, %c0_30, %c0_31], %45 {strides = array<i32>} : memref<1x2x33xf32, #tpu.memory_space<vmem>>, vector<1x2x33xf32>,
      %c0_32 = arith.constant 0 : index
      %c0_33 = arith.constant 0 : index
      %c0_34 = arith.constant 0 : index
      %46 = vector.load %arg8[%c0_32, %c0_33, %c0_34] : memref<2x128x33xf32, #tpu.memory_space<vmem>>, vector<2x128x33xf32>
      %47 = vector.shape_cast %46 : vector<2x128x33xf32> to vector<256x33xf32>
      %48 = arith.mulf %47, %47 : vector<256x33xf32>
      %cst_35 = arith.constant dense<0.000000e+00> : vector<256xf32>
      %49 = vector.multi_reduction <add>, %48, %cst_35 [1] : vector<256x33xf32> to vector<256xf32>
      %50 = vector.shape_cast %49 : vector<256xf32> to vector<256x1xf32>
      %51 = tpu.iota {dimensions = array<i32: 1>} : vector<256x8xi32>
      %52 = tpu.iota {dimensions = array<i32: 1>} : vector<1x8xi32>
      %c5_i32 = arith.constant 5 : i32
      %53 = vector.broadcast %c5_i32 : i32 to vector<1x8xi32>
      %54 = arith.cmpi sge, %52, %53 : vector<1x8xi32>
      %cst_36 = arith.constant 0x7F800000 : f32
      %cst_37 = arith.constant 0.000000e+00 : f32
      %55 = vector.broadcast %cst_36 : f32 to vector<1x8xf32>
      %56 = vector.broadcast %cst_37 : f32 to vector<1x8xf32>
      %57 = arith.select %54, %55, %56 : vector<1x8xi1>, vector<1x8xf32>
      %58 = tpu.iota {dimensions = array<i32: 0>} : vector<256x8xi32>
      %c0_38 = arith.constant 0 : index
      %c0_39 = arith.constant 0 : index
      %c0_40 = arith.constant 0 : index
      %59 = vector.load %arg5[%c0_38, %c0_39, %c0_40] : memref<1x1x8xi32, #tpu.memory_space<vmem>>, vector<1x1x8xi32>
      %60 = vector.shape_cast %59 : vector<1x1x8xi32> to vector<1x8xi32>
      %61 = vector.broadcast %60 : vector<1x8xi32> to vector<256x8xi32>
      %62 = arith.cmpi eq, %58, %61 : vector<256x8xi32>
      %63 = arith.extui %62 : vector<256x8xi1> to vector<256x8xi32>
      %64 = arith.sitofp %63 : vector<256x8xi32> to vector<256x8xf32>
      %cst_41 = arith.constant dense<0.000000e+00> : vector<8x33xf32>
      %65 = tpu.matmul %64, %47, %cst_41 {dimension_numbers = #tpu.dot_dimension_numbers<[0], [0], [1], [1], [0, 1, 1, 1], [], []>} : vector<256x8xf32>, vector<256x33xf32>, vector<8x33xf32> -> vector<8x33xf32>
      %c0_i32_42 = arith.constant 0 : i32
      %c20_i32 = arith.constant 20 : i32
      %66 = arith.addi %c0_i32_42, %c20_i32 : i32
      %c1_i32_43 = arith.constant 1 : i32
      %67 = scf.for %arg9 = %c0_i32_42 to %66 step %c1_i32_43 iter_args(%arg10 = %65) -> (vector<8x33xf32>)  : i32 {
        %71 = arith.mulf %arg10, %arg10 : vector<8x33xf32>
        %cst_47 = arith.constant dense<0.000000e+00> : vector<8xf32>
        %72 = vector.multi_reduction <add>, %71, %cst_47 [1] : vector<8x33xf32> to vector<8xf32>
        %73 = vector.shape_cast %72 : vector<8xf32> to vector<1x8xf32>
        %74 = arith.addf %73, %57 : vector<1x8xf32>
        %cst_48 = arith.constant dense<0.000000e+00> : vector<256x8xf32>
        %75 = tpu.matmul %47, %arg10, %cst_48 {dimension_numbers = #tpu.dot_dimension_numbers<[1], [1], [0], [0], [0, 0, 1, 0], [], []>} : vector<256x33xf32>, vector<8x33xf32>, vector<256x8xf32> -> vector<256x8xf32>
        %cst_49 = arith.constant 2.000000e+00 : f32
        %76 = vector.broadcast %cst_49 : f32 to vector<256x8xf32>
        %77 = arith.mulf %76, %75 : vector<256x8xf32>
        %78 = vector.broadcast %50 : vector<256x1xf32> to vector<256x8xf32>
        %79 = arith.subf %78, %77 : vector<256x8xf32>
        %80 = vector.broadcast %74 : vector<1x8xf32> to vector<256x8xf32>
        %81 = arith.addf %79, %80 : vector<256x8xf32>
        %cst_50 = arith.constant dense<0x7F800000> : vector<256xf32>
        %82 = vector.multi_reduction <minimumf>, %81, %cst_50 [1] : vector<256x8xf32> to vector<256xf32>
        %83 = vector.shape_cast %82 : vector<256xf32> to vector<256x1xf32>
        %84 = vector.broadcast %83 : vector<256x1xf32> to vector<256x8xf32>
        %85 = arith.cmpf ole, %81, %84 : vector<256x8xf32>
        %c8_i32 = arith.constant 8 : i32
        %86 = vector.broadcast %c8_i32 : i32 to vector<256x8xi32>
        %87 = arith.select %85, %51, %86 : vector<256x8xi1>, vector<256x8xi32>
        %cst_51 = arith.constant dense<2147483647> : vector<256xi32>
        %88 = vector.multi_reduction <minsi>, %87, %cst_51 [1] : vector<256x8xi32> to vector<256xi32>
        %89 = vector.shape_cast %88 : vector<256xi32> to vector<256x1xi32>
        %90 = vector.broadcast %89 : vector<256x1xi32> to vector<256x8xi32>
        %91 = arith.cmpi eq, %51, %90 : vector<256x8xi32>
        %92 = arith.extui %91 : vector<256x8xi1> to vector<256x8xi32>
        %93 = arith.sitofp %92 : vector<256x8xi32> to vector<256x8xf32>
        %cst_52 = arith.constant dense<0.000000e+00> : vector<8x33xf32>
        %94 = tpu.matmul %93, %47, %cst_52 {dimension_numbers = #tpu.dot_dimension_numbers<[0], [0], [1], [1], [0, 1, 1, 1], [], []>} : vector<256x8xf32>, vector<256x33xf32>, vector<8x33xf32> -> vector<8x33xf32>
        %95 = vector.extract_strided_slice %94 {offsets = [0, 32], sizes = [8, 1], strides = [1, 1]} : vector<8x33xf32> to vector<8x1xf32>
        %cst_53 = arith.constant 1.000000e+00 : f32
        %96 = vector.broadcast %cst_53 : f32 to vector<8x1xf32>
        %97 = arith.maximumf %95, %96 : vector<8x1xf32>
        %98 = vector.broadcast %97 : vector<8x1xf32> to vector<8x33xf32>
        %99 = arith.divf %94, %98 : vector<8x33xf32>
        %cst_54 = arith.constant 0.000000e+00 : f32
        %100 = vector.broadcast %cst_54 : f32 to vector<8x1xf32>
        %101 = arith.cmpf ogt, %95, %100 : vector<8x1xf32>
        %102 = vector.shape_cast %101 : vector<8x1xi1> to vector<8x1xi1>
        %103 = vector.broadcast %102 : vector<8x1xi1> to vector<8x33xi1>
        %104 = arith.select %103, %99, %arg10 : vector<8x33xi1>, vector<8x33xf32>
        scf.yield %104 : vector<8x33xf32>
      }
      %c0_44 = arith.constant 0 : index
      %c0_45 = arith.constant 0 : index
      %c0_46 = arith.constant 0 : index
      %68 = vector.load %arg7[%c0_44, %c0_45, %c0_46] : memref<1x8x33xf32, #tpu.memory_space<vmem>>, vector<1x8x33xf32>
      %69 = vector.shape_cast %68 : vector<1x8x33xf32> to vector<8x33xf32>
      %70 = vector.shape_cast %67 : vector<8x33xf32> to vector<1x8x33xf32>
      tpu.vector_store %arg7[%c0_44, %c0_45, %c0_46], %70 {strides = array<i32>} : memref<1x8x33xf32, #tpu.memory_space<vmem>>, vector<1x8x33xf32>,
    } else {
    }
    return
  }
  func.func @transform_0(%arg0: i32, %arg1: i32) -> (i32, i32, i32) {
    %c0_i32 = arith.constant 0 : i32
    %c0_i32_0 = arith.constant 0 : i32
    %c0_i32_1 = arith.constant 0 : i32
    return %c0_i32, %c0_i32_0, %arg1 : i32, i32, i32
  }
  func.func @transform_1(%arg0: i32, %arg1: i32) -> (i32, i32, i32) {
    %c0_i32 = arith.constant 0 : i32
    %c0_i32_0 = arith.constant 0 : i32
    %c0_i32_1 = arith.constant 0 : i32
    return %arg0, %c0_i32, %c0_i32_0 : i32, i32, i32
  }
  func.func @transform_2(%arg0: i32, %arg1: i32) -> (i32, i32, i32) {
    %c0_i32 = arith.constant 0 : i32
    %c0_i32_0 = arith.constant 0 : i32
    %c0_i32_1 = arith.constant 0 : i32
    return %arg0, %c0_i32, %c0_i32_0 : i32, i32, i32
  }
  func.func @transform_3(%arg0: i32, %arg1: i32) -> (i32, i32, i32) {
    %c0_i32 = arith.constant 0 : i32
    %c0_i32_0 = arith.constant 0 : i32
    %c0_i32_1 = arith.constant 0 : i32
    return %arg0, %c0_i32, %c0_i32_0 : i32, i32, i32
  }
  func.func @transform_4(%arg0: i32, %arg1: i32) -> (i32, i32, i32) {
    %c0_i32 = arith.constant 0 : i32
    %c0_i32_0 = arith.constant 0 : i32
    %c0_i32_1 = arith.constant 0 : i32
    return %arg0, %c0_i32, %c0_i32_0 : i32, i32, i32
  }
  func.func @transform_5(%arg0: i32, %arg1: i32) -> (i32, i32, i32) {
    %c0_i32 = arith.constant 0 : i32
    %c0_i32_0 = arith.constant 0 : i32
    %c0_i32_1 = arith.constant 0 : i32
    return %arg0, %c0_i32, %c0_i32_0 : i32, i32, i32
  }
}

</mosaic_0001>

<bundles_post_ra>
// kernel: tpu_custom_call.1
= control target key start
LH: loop header
LB: loop body
LE: loop exit
PB: predicated region body
PF: predicated region fallthrough
CT: control target
= control target key end

     0   :  { %s5671_s0 = inlined_call_operand.hbm [shape: f32[2,4,256], index: 0, kind: input, shape index: {}]   ;;  %s5672_s1 = inlined_call_operand.hbm [shape: f32[2,4,33], index: 1, kind: input, shape index: {}]   ;;  %s5673_s2 = inlined_call_operand.vmem [shape: f32[2,1,33], index: 2, kind: input, shape index: {}]   ;;  %s5674_s3 = inlined_call_operand.vmem [shape: s32[2,1,8], index: 3, kind: input, shape index: {}]   ;;  %s5675_s4 = inlined_call_operand.hbm [shape: f32[2,2,33], index: 4, kind: output, shape index: {0}]   ;;  %s5676_s5 = inlined_call_operand.hbm [shape: f32[2,8,33], index: 5, kind: output, shape index: {1}]  }
   0x1   :  { %5751 = sst [smem:[#allocation113_spill]] %s5671_s0 }
   0x2   :  { %11 = vsyncpa [#allocation4], 0 }
   0x3   :  { %13 = vsyncpa [#allocation4 + $0x1], 0 }
   0x4   :  { %14 = vsyncpa [#allocation7], 0 }
   0x5   :  { %16 = vsyncpa [#allocation7 + $0x1], 0 }
   0x6   :  { %17 = vsyncpa [#allocation5], 0 }
   0x7   :  { %19 = vsyncpa [#allocation5 + $0x1], 0 }
   0x8   :  { %20 = vsyncpa [#allocation10], 0 }
   0x9   :  { %22 = vsyncpa [#allocation10 + $0x1], 0  ;;  %s3865_s18 = smov 0   ;;  %s3867_s19 = smov 0  }
   0xa   :  { %s3869_s20 = smov 0   ;;  %s3871_s21 = smov 0  }
   0xb   :  { %s3873_s22 = smov 0   ;;  %s3875_s23 = smov 0  }
   0xc   :  { %s3877_s24 = smov 0   ;;  %s3879_s25 = smov 0  }
   0xd   :  { %s3881_s26 = smov 0   ;;  %s3883_s27 = smov 0  }
   0xe   :  { %s3885_s28 = smov 0  }
   0xf LB: > { %5752 = sst [smem:[#allocation15_spill]] %s3805_s26  ;;  %s37_s29 = sadd.s32 1, %s3805_s26  ;;  %s3813_s28 = sphi %s3885_s28, %s28_s28   ;;  %s3809_s27 = sphi %s3883_s27, %s5965_s27   ;;  %s3805_s26 = sphi %s3881_s26, %s5964_s26   ;;  %s3801_s25 = sphi %s3879_s25, %s5963_s25   ;;  %s3797_s24 = sphi %s3877_s24, %s5962_s24   ;;  %s3793_s23 = sphi %s3875_s23, %s5971_s23   ;;  %s3789_s22 = sphi %s3873_s22, %s5970_s22   ;;  %s3785_s21 = sphi %s3871_s21, %s5969_s21   ;;  %s3781_s20 = sphi %s3869_s20, %s5968_s20   ;;  %s3777_s19 = sphi %s3867_s19, %s5967_s19   ;;  %s3773_s18 = sphi %s3865_s18, %s5966_s18  }
  0x10   : > { %5753 = sst [smem:[#allocation16_spill]] %s3809_s27  ;;  %p54_p0 = scmp.ne.s32.totalorder %s3793_s23, %s3789_s22 }
  0x11   : > { %p55_p1 = scmp.eq.s32.totalorder %s3813_s28, 0  ;;  %p5677_p2 = scmp.lt.s32.totalorder %s3813_s28, 4 }
  0x12   : > { %s214_s30 = sand.u32 1, %s3793_s23   ;;  %s2918_s7 = sshll.u32 %s3805_s26, 6 }
  0x13   : > { %p56_p3 = por %p55_p1, %p54_p0  ;;  %s2917_s6 = sshll.u32 %s214_s30, 3 }
  0x14   : > { %s5754_s0 = sld [smem:[#allocation113_spill]]  ;;  %s218_s11 = scalar_lea.vmem [#allocation3], %s2917_s6 }
  0x15   : > { %s224_s12 = sshll.u32 %s218_s11, 4  ;;  %p3938_p4 = pnand %p5677_p2, %p56_p3  ;;  %s3934_s12 = int_to_ptr.vmem [resolvable:$true] %s224_s12 }
  0x16   : > { %s3942_s14 = scalar_lea.sflag [#allocation4], %s214_s30 }
  0x17   : > { %p3589_p6 = pneg %p3938_p4 }
  0x1a   : > { %s3932_s10 = scalar_lea.hbm %s5754_s0, %s2918_s7  ;;  %s3592_s6 = scalar_lea.hbm %s5754_s0, 256 }
  0x1b   : > { %s3587_s15 = scalar_lea.hbm %s3932_s10, 128  ;;  %p3593_p9 = scmp.lt.u32.totalorder %s3932_s10, %s5754_s0 }
  0x1c   : > { %p3588_p5 = scmp.ne.s32.totalorder %s3932_s10, %s3587_s15  ;;  %p3594_p10 = scmp.lt.u32.totalorder %s3592_s6, %s3587_s15 }
  0x1d   : > { %p3596_p12 = scmp.lt.u32.totalorder %s3587_s15, %s3932_s10 }
  0x1e   : > { %p3590_p7 = pnand %p3589_p6, %p3588_p5  ;;  %p3595_p11 = por %p3594_p10, %p3593_p9 }
  0x20   : > { %p3591_p8 = pneg %p3590_p7  ;;  %p3597_p13 = por %p3596_p12, %p3595_p11 }
  0x22   : > { %p3598_p0 = pnand %p3597_p13, %p3591_p8 }
  0x24   : > { %3601 = shalt.err (!%p3598_p0)
}
  0x25   : > { %s3602_s30 = scalar_lea.vmem %s3934_s12, 128  ;;  %s3823_s9 = smov [#allocation3]  }
  0x26   : > { %p3603_p3 = scmp.ne.s32.totalorder %s3934_s12, %s3602_s30  ;;  %s3607_s11 = sshll.u32 %s3823_s9, 4  ;;  %s3608_s11 = int_to_ptr.vmem [resolvable:$false] %s3607_s11 }
  0x27   : > { %s3609_s16 = scalar_lea.vmem %s3608_s11, 256  ;;  %p3610_p2 = scmp.lt.s32.totalorder %s3934_s12, %s3608_s11 }
  0x28   : > { %p3605_p5 = pnand %p3603_p3, %p3589_p6  ;;  %p3611_p9 = scmp.lt.s32.totalorder %s3609_s16, %s3602_s30 }
  0x2a   : > { %p3606_p7 = pneg %p3605_p5  ;;  %p3612_p10 = por %p3611_p9, %p3610_p2 }
  0x2c   : > { %p3613_p11 = pnand %p3612_p10, %p3606_p7 }
  0x2e   : > { %3616 = shalt.err (!%p3613_p11)
}
  0x2f   : > { %s3824_s15 = smov 128   ;;  %s3825_s17 = smov 64  }
  0x30   : > { %s3826_s6 = smov 4   ;;  %p2921_p2 = scmp.ge.s32.totalorder %s3813_s28, 1 }
  0x31   : > { %3383 = dma.hbm_to_vmem [thread:$0]  (!%p3938_p4), %s3932_s10, 128, %s3934_s12, %s3942_s14, %s3824_s15, %s3825_s17, %s3826_s6  }
  0x32   : > { %p262_p6 = scmp.lt.s32.totalorder %s3813_s28, 5  ;;  %s47_s8 = sadd.s32 1, %s3793_s23 }
  0x33   : > { %s2913_s30 = sadd.s32 4294967295, %s3813_s28   ;;  %p38_p12 = scmp.ge.s32.totalorder %s37_s29, 2 }
  0x34   : > { %p3972_p8 = pnand %p2921_p2, %p262_p6  ;;  %s40_s9 = sadd.s32 1, %s3809_s27 }
  0x35   : > { %p60_p13 = scmp.ne.s32.totalorder %s3789_s22, %s3785_s21  ;;  %s5973_s29 = smov (%p38_p12, %s37_s29), 0 }
  0x36   : > { %5757 = sst [smem:[#allocation17_spill]] %s5973_s29  ;;  %s5975_s9 = smov (!%p38_p12, %s40_s9), %s3809_s27 }
  0x37   : > { %s44_s10 = ssub.s32 %s3805_s26, %s5973_s29  ;;  %p3990_p4 = scmp.eq.s32.totalorder %s2913_s30, 0 }
  0x38   : > { %p42_p0 = scmp.ge.s32.totalorder %s5975_s9, 2  ;;  %p45_p3 = scmp.eq.s32.totalorder %s44_s10, 0 }
  0x39   : > { %s2914_s13 = sadd.s32 4294967294, %s3813_s28   ;;  %p3997_p5 = por %p3990_p4, %p60_p13 }
  0x3a   : > { %s5977_s9 = smov (%p42_p0, %s5975_s9), 0  ;;  %s73_s16 = sadd.s32 1, %s3781_s20 }
  0x3b   : > { %s5759_s21 = scalar_select %p3997_p5, 1, 0 }
  0x3c   : > { %5760 = sst [smem:[#allocation18_spill]] %s5977_s9  ;;  %s70_s11 = ssub.s32 %s3809_s27, %s5977_s9 }
  0x3d   : > { %s4004_s14 = scalar_select %p45_p3, %s3793_s23, %s47_s8  }
  0x3e   : > { %p71_p7 = scmp.eq.s32.totalorder %s70_s11, 0  ;;  %p86_p9 = scmp.ne.s32.totalorder %s3777_s19, %s3773_s18 }
  0x3f   : > { %p80_p10 = scmp.ne.s32.totalorder %s3781_s20, %s3777_s19  ;;  %p162_p11 = scmp.eq.s32.totalorder %s2913_s30, 3 }
  0x40   : > { %s4014_s15 = scalar_select %p71_p7, %s3781_s20, %s73_s16  }
  0x41   : > { %p4018_p2 = por %p86_p9, %p3990_p4  ;;  %p4022_p6 = por %p162_p11, %p80_p10 }
  0x42   : > { %p168_p12 = scmp.eq.s32.totalorder %s2914_s13, 3  ;;  %s234_s8 = sand.u32 1, %s3781_s20  }
  0x43   : > { %s5761_s17 = scalar_select %p4018_p2, 1, 0 }
  0x44   : > { %s5762_s6 = scalar_select %p4022_p6, 1, 0 }
  0x45   : > { %p82_p13 = por %p80_p10, %p55_p1  ;;  %s2919_s10 = sshll.u32 %s234_s8, 2 }
  0x46   : > { %p4029_p0 = por %p168_p12, %p86_p9  ;;  %s2920_s30 = sshll.u32 %s3809_s27, 6 }
  0x47   : > { %s238_s16 = scalar_lea.vmem [#allocation6], %s2919_s10  ;;  %s4037_s29 = scalar_lea.hbm %s5672_s1, %s2920_s30 }
  0x48   : > { %s5763_s11 = scalar_select %p4029_p0, 1, 0 }
  0x49   : > { %s245_s12 = sshll.u32 %s238_s16, 4  ;;  %p5764_p1 = scmp.lt.s32.totalorder %s3813_s28, 4  ;;  %s4039_s12 = int_to_ptr.vmem [resolvable:$true] %s245_s12 }
  0x4a   : > { %s235_s10 = scalar_lea.sflag [#allocation7], %s234_s8  ;;  %s3617_s16 = scalar_lea.hbm %s4037_s29, 64 }
  0x4b   : > { %p4043_p4 = pnand %p5764_p1, %p82_p13  ;;  %p3618_p3 = scmp.ne.s32.totalorder %s4037_s29, %s3617_s16 }
  0x4c   : > { %s3622_s30 = scalar_lea.hbm %s5672_s1, 128  ;;  %p3623_p11 = scmp.lt.u32.totalorder %s4037_s29, %s5672_s1 }
  0x4d   : > { %p3619_p7 = pneg %p4043_p4  ;;  %p3624_p12 = scmp.lt.u32.totalorder %s3622_s30, %s3617_s16 }
  0x4e   : > { %p3626_p1 = scmp.lt.u32.totalorder %s3617_s16, %s4037_s29 }
  0x4f   : > { %p3620_p9 = pnand %p3619_p7, %p3618_p3  ;;  %p3625_p13 = por %p3624_p12, %p3623_p11 }
  0x51   : > { %p3621_p10 = pneg %p3620_p9  ;;  %p3627_p0 = por %p3626_p1, %p3625_p13 }
  0x53   : > { %p3628_p6 = pnand %p3627_p0, %p3621_p10 }
  0x55   : > { %3631 = shalt.err (!%p3628_p6)
}
  0x56   : > { %s3632_s8 = scalar_lea.vmem %s4039_s12, 64  ;;  %s3827_s0 = smov [#allocation6]  }
  0x57   : > { %p3633_p3 = scmp.ne.s32.totalorder %s4039_s12, %s3632_s8  ;;  %s3637_s9 = sshll.u32 %s3827_s0, 4  ;;  %s3638_s9 = int_to_ptr.vmem [resolvable:$false] %s3637_s9 }
  0x58   : > { %s3639_s26 = scalar_lea.vmem %s3638_s9, 128  ;;  %p3640_p5 = scmp.lt.s32.totalorder %s4039_s12, %s3638_s9 }
  0x59   : > { %p3635_p9 = pnand %p3633_p3, %p3619_p7  ;;  %p3641_p11 = scmp.lt.s32.totalorder %s3639_s26, %s3632_s8 }
  0x5b   : > { %p3636_p2 = pneg %p3635_p9  ;;  %p3642_p12 = por %p3641_p11, %p3640_p5 }
  0x5d   : > { %p3643_p13 = pnand %p3642_p12, %p3636_p2 }
  0x5f   : > { %3646 = shalt.err (!%p3643_p13)
}
  0x60   : > { %3386 = dma.hbm_to_vmem [thread:$0]  (!%p4043_p4), %s4037_s29, 64, %s4039_s12, %s235_s10  }
  0x61   : > { %266 = sbr.rel (%p3972_p8) target bundleno = 2243 (0x8c3), region = 36  ;;  %s268_s27 = sand.u32 (!%p3972_p8), 1, %s3789_s22  }
  0x62   : > { %s2922_s16 = sshll.u32 (!%p3972_p8), %s268_s27, 3  ;;  %s269_s30 = scalar_lea.sflag (!%p3972_p8), [#allocation4], %s268_s27 }
  0x63   : > { %s272_s0 = scalar_lea.vmem (!%p3972_p8), [#allocation3], %s2922_s16  ;;  %p5766_p6 = scmp.ne.s32.totalorder (!%p3972_p8), %s5759_s21, 0 }
  0x68   : > { %3756 = dma.done.wait (%p5766_p6), %s269_s30, 128  }
  0x69   : > { %3758 = vsyncadd (%p5766_p6), %s269_s30, 4294967168  ;;  %s4080_s13 = sand.u32 1, %s3777_s19   ;;  %p5767_p8 = scmp.ne.s32.totalorder %s5761_s17, 0 }
  0x6a   : > { %s2923_s29 = sshll.u32 %s4080_s13, 2  ;;  %s278_s7 = scalar_lea.sflag [#allocation7], %s4080_s13 }
  0x6b   : > { %s281_s12 = scalar_lea.vmem [#allocation6], %s2923_s29 }
  0x6c   : > { %3760 = dma.done.wait (%p5767_p8), %s278_s7, 64  }
  0x6d   : > { %3762 = vsyncadd (%p5767_p8), %s278_s7, 4294967232  ;;  %v332_v0 = vld [vmem:[%s272_s0] sm:$0xf]  ;;  %s2924_s21 = sshll.u32 %s4080_s13, 1  ;;  %s2925_s10 = sshll.u32 %s4080_s13, 3  ;;  %vm420_vm0 = vcmask 1043456  }
  0x6e   : > { %339 = vxpose.xlu0.b32.start.end [1/1] (short) %v332_v0, 128  ;;  %v330_v1 = vld [vmem:[%s281_s12] sm:$0xf]  ;;  %v2945_v2 = vld [vmem:[%s272_s0 + $0x4] sm:$0xf]  ;;  %p324_p5 = scmp.lt.s32.totalorder %s3801_s25, 1  ;;  %vm371_vm1 = vcmask 31744  }
  0x6f   : > { %3206 = vmatprep.subr.msk.mxu0 %vm420_vm0, %v330_v1  ;;  %3232 = vmatprep.subr.msk.mxu1 %vm420_vm0, %v330_v1  ;;  %s2944_s0 = sshll.u32 %s3797_s24, 7  ;;  %vm587_vm2 = vcmask 269312   ;;  %vm921_vm3 = vcmask 1040384   ;;  %s4241_s7 = scalar_lea.vmem [#allocation8], %s2924_s21 }
  0x70   : > { %3207 = vmatpush3.msk.msra.mxu0 %vm420_vm0, %v330_v1  ;;  %3233 = vmatpush3.msk.msra.mxu1 %vm420_vm0, %v330_v1  ;;  %s4092_s17 = scalar_select %p324_p5, %s3801_s25, 1 }
  0x71   : > { %s4139_s29 = scalar_lea.vmem [#allocation2], %s2944_s0  ;;  %s4245_s12 = scalar_lea.vmem [#allocation9], %s2925_s10 }
  0x72   : > { %s329_s26 = scalar_lea.vmem %s5674_s3, %s4092_s17  ;;  %s326_s30 = scalar_lea.vmem %s5673_s2, %s4092_s17 }
  0x73   : > { %v4134_v35 = vld [vmem:[%s326_s30] ss:$0 sm:$0xff]  ;;  %p2963_p2 = scmp.ne.s32.totalorder %s3797_s24, 0 }
  0x74   : > { %vm927_vm4 = vcmask (!%p2963_p2), 263168  }
  0xab   : > { %643 = vxpose.xlu0.b32.start.end [1/1] (short) %v2945_v2, 128 }
  0xee   : > { %v355_v3 = vpop.trf.xlu0 }
  0xef   : > { %3208 = vmatprep.mubr.msk.f32.mxu0 %vm371_vm1, %v355_v3 }
  0xf2   : > { %v356_v4 = vpop.trf.xlu0 }
  0xf3   : > { %3209 = vmatmul.mubr.msk.f32.vlgmr.msra.gmra.mrb[0].mxu0 %vm371_vm1, %v356_v4 }
  0xf6   : > { %v357_v5 = vpop.trf.xlu0 }
  0xf7   : > { %3211 = vmatprep.mubr.msk.f32.mxu0 %vm371_vm1, %v357_v5 }
  0xfa   : > { %v358_v6 = vpop.trf.xlu0 }
  0xfb   : > { %3212 = vmatmul.mubr.msk.f32.gmra.mrb[2].mxu0 %vm371_vm1, %v358_v6 }
  0xfe   : > { %v359_v7 = vpop.trf.xlu0 }
  0xff   : > { %3214 = vmatprep.mubr.msk.f32.mxu0 %vm371_vm1, %v359_v7 }
 0x102   : > { %v360_v8 = vpop.trf.xlu0 }
 0x103   : > { %3215 = vmatmul.mubr.msk.f32.gmra.mrb[4].mxu0 %vm371_vm1, %v360_v8 }
 0x106   : > { %v361_v9 = vpop.trf.xlu0 }
 0x107   : > { %3217 = vmatprep.mubr.msk.f32.mxu0 %vm371_vm1, %v361_v9 }
 0x10a   : > { %v362_v10 = vpop.trf.xlu0 }
 0x10b   : > { %3218 = vmatmul.mubr.msk.f32.gmra.mrb[6].mxu0 %vm371_vm1, %v362_v10 }
 0x10e   : > { %v363_v11 = vpop.trf.xlu0 }
 0x10f   : > { %3220 = vmatprep.mubr.msk.f32.mxu0 %vm371_vm1, %v363_v11 }
 0x112   : > { %v364_v12 = vpop.trf.xlu0 }
 0x113   : > { %3221 = vmatmul.mubr.msk.f32.gmra.mrb[8].mxu0 %vm371_vm1, %v364_v12 }
 0x116   : > { %v365_v13 = vpop.trf.xlu0 }
 0x117   : > { %3223 = vmatprep.mubr.msk.f32.mxu0 %vm371_vm1, %v365_v13 }
 0x11a   : > { %v366_v14 = vpop.trf.xlu0 }
 0x11b   : > { %3224 = vmatmul.mubr.msk.f32.gmra.mrb[10].mxu0 %vm371_vm1, %v366_v14 }
 0x11e   : > { %v367_v15 = vpop.trf.xlu0 }
 0x11f   : > { %3226 = vmatprep.mubr.msk.f32.mxu0 %vm371_vm1, %v367_v15 }
 0x122   : > { %v368_v16 = vpop.trf.xlu0 }
 0x123   : > { %3227 = vmatmul.mubr.msk.f32.gmra.mrb[12].mxu0 %vm371_vm1, %v368_v16 }
 0x126   : > { %v369_v17 = vpop.trf.xlu0 }
 0x127   : > { %3229 = vmatprep.mubr.msk.f32.mxu0 %vm371_vm1, %v369_v17 }
 0x12a   : > { %v370_v18 = vpop.trf.xlu0 }
 0x12b   : > { %3230 = vmatmul.mubr.msk.f32.gmra.mrb[14].mxu0 %vm371_vm1, %v370_v18 }
 0x12e   : > { %v659_v19 = vpop.trf.xlu0 }
 0x12f   : > { %3234 = vmatprep.mubr.msk.f32.mxu1 %vm371_vm1, %v659_v19 }
 0x132   : > { %v660_v20 = vpop.trf.xlu0 }
 0x133   : > { %3235 = vmatmul.mubr.msk.f32.vlgmr.msra.gmra.mrb[0].mxu1 %vm371_vm1, %v660_v20 }
 0x136   : > { %v661_v21 = vpop.trf.xlu0 }
 0x137   : > { %3237 = vmatprep.mubr.msk.f32.mxu1 %vm371_vm1, %v661_v21 }
 0x13a   : > { %v662_v22 = vpop.trf.xlu0 }
 0x13b   : > { %3238 = vmatmul.mubr.msk.f32.gmra.mrb[2].mxu1 %vm371_vm1, %v662_v22 }
 0x13e   : > { %v663_v23 = vpop.trf.xlu0 }
 0x13f   : > { %3240 = vmatprep.mubr.msk.f32.mxu1 %vm371_vm1, %v663_v23 }
 0x142   : > { %v664_v24 = vpop.trf.xlu0 }
 0x143   : > { %3241 = vmatmul.mubr.msk.f32.gmra.mrb[4].mxu1 %vm371_vm1, %v664_v24 }
 0x146   : > { %v665_v25 = vpop.trf.xlu0 }
 0x147   : > { %3243 = vmatprep.mubr.msk.f32.mxu1 %vm371_vm1, %v665_v25 }
 0x14a   : > { %v666_v26 = vpop.trf.xlu0 }
 0x14b   : > { %3244 = vmatmul.mubr.msk.f32.gmra.mrb[6].mxu1 %vm371_vm1, %v666_v26 }
 0x14e   : > { %v667_v27 = vpop.trf.xlu0 }
 0x14f   : > { %3246 = vmatprep.mubr.msk.f32.mxu1 %vm371_vm1, %v667_v27 }
 0x152   : > { %v668_v28 = vpop.trf.xlu0 }
 0x153   : > { %3247 = vmatmul.mubr.msk.f32.gmra.mrb[8].mxu1 %vm371_vm1, %v668_v28 }
 0x156   : > { %v669_v29 = vpop.trf.xlu0 }
 0x157   : > { %3249 = vmatprep.mubr.msk.f32.mxu1 %vm371_vm1, %v669_v29 }
 0x15a   : > { %v670_v30 = vpop.trf.xlu0 }
 0x15b   : > { %3250 = vmatmul.mubr.msk.f32.gmra.mrb[10].mxu1 %vm371_vm1, %v670_v30 }
 0x15e   : > { %v671_v31 = vpop.trf.xlu0 }
 0x15f   : > { %3252 = vmatprep.mubr.msk.f32.mxu1 %vm371_vm1, %v671_v31 }
 0x162   : > { %v672_v32 = vpop.trf.xlu0 }
 0x163   : > { %3253 = vmatmul.mubr.msk.f32.gmra.mrb[12].mxu1 %vm371_vm1, %v672_v32 }
 0x166   : > { %v673_v33 = vpop.trf.xlu0 }
 0x167   : > { %3255 = vmatprep.mubr.msk.f32.mxu1 %vm371_vm1, %v673_v33 }
 0x16a   : > { %v674_v34 = vpop.trf.xlu0 }
 0x16b   : > { %3256 = vmatmul.mubr.msk.f32.gmra.mrb[14].mxu1 %vm371_vm1, %v674_v34 }
 0x1c6   : > { %v3210_v36 = vpop.f32.mrb[0].mxu0 }
 0x1c7   : > { %v496_v37 = vadd.f32 %v3210_v36, %v4134_v35  ;;  %v490_v38 = vpop.f32.mrb[1].mxu0 }
 0x1c8   : > { %v491_v39 = vadd.f32 %v4134_v35, %v490_v38 }
 0x1c9   : > { %v570_v40 = vmax.f32 %v496_v37, 0.0 }
 0x1ca   : > { %v569_v41 = vmax.f32 %v491_v39, 0.0 }
 0x1cb   : > { %589 = vst.msk [vmem:[%s4139_s29 + $0x8] sm:$0xff] %vm587_vm2, %v570_v40  ;;  %v605_v42 = vsel %vm587_vm2, %v570_v40, 0.0 }
 0x1cc   : > { %588 = vst.msk [vmem:[%s4139_s29] sm:$0xff] %vm587_vm2, %v569_v41  ;;  %v604_v43 = vsel %vm587_vm2, %v569_v41, 0.0 }
 0x1cd   : > { %v606_v44 = vadd.f32 %v605_v42, %v604_v43 }
 0x1ce   : > { %v3213_v45 = vpop.f32.mrb[2].mxu0 }
 0x1cf   : > { %v506_v46 = vadd.f32 %v3213_v45, %v4134_v35  ;;  %v500_v47 = vpop.f32.mrb[3].mxu0 }
 0x1d0   : > { %v501_v48 = vadd.f32 %v4134_v35, %v500_v47 }
 0x1d1   : > { %v572_v49 = vmax.f32 %v506_v46, 0.0 }
 0x1d2   : > { %v571_v50 = vmax.f32 %v501_v48, 0.0 }
 0x1d3   : > { %591 = vst.msk [vmem:[%s4139_s29 + $0x18] sm:$0xff] %vm587_vm2, %v572_v49  ;;  %v609_v53 = vsel %vm587_vm2, %v572_v49, 0.0 }
 0x1d4   : > { %590 = vst.msk [vmem:[%s4139_s29 + $0x10] sm:$0xff] %vm587_vm2, %v571_v50  ;;  %v607_v51 = vsel %vm587_vm2, %v571_v50, 0.0 }
 0x1d5   : > { %v608_v52 = vadd.f32 %v607_v51, %v606_v44 }
 0x1d6   : > { %v3216_v54 = vpop.f32.mrb[4].mxu0 }
 0x1d7   : > { %v516_v55 = vadd.f32 %v3216_v54, %v4134_v35  ;;  %v510_v56 = vpop.f32.mrb[5].mxu0  ;;  %v610_v57 = vadd.f32 %v609_v53, %v608_v52 }
 0x1d8   : > { %v511_v58 = vadd.f32 %v4134_v35, %v510_v56 }
 0x1d9   : > { %v574_v59 = vmax.f32 %v516_v55, 0.0 }
 0x1da   : > { %v573_v60 = vmax.f32 %v511_v58, 0.0 }
 0x1db   : > { %593 = vst.msk [vmem:[%s4139_s29 + $0x28] sm:$0xff] %vm587_vm2, %v574_v59  ;;  %v613_v63 = vsel %vm587_vm2, %v574_v59, 0.0 }
 0x1dc   : > { %592 = vst.msk [vmem:[%s4139_s29 + $0x20] sm:$0xff] %vm587_vm2, %v573_v60  ;;  %v611_v61 = vsel %vm587_vm2, %v573_v60, 0.0 }
 0x1dd   : > { %v612_v62 = vadd.f32 %v611_v61, %v610_v57 }
 0x1de   : > { %v3219_v0 = vpop.f32.mrb[6].mxu0 }
 0x1df   : > { %v526_v1 = vadd.f32 %v3219_v0, %v4134_v35  ;;  %v520_v2 = vpop.f32.mrb[7].mxu0  ;;  %v614_v3 = vadd.f32 %v613_v63, %v612_v62 }
 0x1e0   : > { %v521_v4 = vadd.f32 %v4134_v35, %v520_v2 }
 0x1e1   : > { %v576_v5 = vmax.f32 %v526_v1, 0.0 }
 0x1e2   : > { %v575_v6 = vmax.f32 %v521_v4, 0.0 }
 0x1e3   : > { %595 = vst.msk [vmem:[%s4139_s29 + $0x38] sm:$0xff] %vm587_vm2, %v576_v5  ;;  %v617_v9 = vsel %vm587_vm2, %v576_v5, 0.0 }
 0x1e4   : > { %594 = vst.msk [vmem:[%s4139_s29 + $0x30] sm:$0xff] %vm587_vm2, %v575_v6  ;;  %v615_v7 = vsel %vm587_vm2, %v575_v6, 0.0 }
 0x1e5   : > { %v616_v8 = vadd.f32 %v615_v7, %v614_v3 }
 0x1e6   : > { %v3222_v10 = vpop.f32.mrb[8].mxu0 }
 0x1e7   : > { %v536_v11 = vadd.f32 %v3222_v10, %v4134_v35  ;;  %v530_v12 = vpop.f32.mrb[9].mxu0  ;;  %v618_v13 = vadd.f32 %v617_v9, %v616_v8 }
 0x1e8   : > { %v531_v14 = vadd.f32 %v4134_v35, %v530_v12 }
 0x1e9   : > { %v578_v15 = vmax.f32 %v536_v11, 0.0 }
 0x1ea   : > { %v577_v16 = vmax.f32 %v531_v14, 0.0 }
 0x1eb   : > { %597 = vst.msk [vmem:[%s4139_s29 + $0x48] sm:$0xff] %vm587_vm2, %v578_v15  ;;  %v621_v19 = vsel %vm587_vm2, %v578_v15, 0.0 }
 0x1ec   : > { %596 = vst.msk [vmem:[%s4139_s29 + $0x40] sm:$0xff] %vm587_vm2, %v577_v16  ;;  %v619_v17 = vsel %vm587_vm2, %v577_v16, 0.0 }
 0x1ed   : > { %v620_v18 = vadd.f32 %v619_v17, %v618_v13 }
 0x1ee   : > { %v3225_v20 = vpop.f32.mrb[10].mxu0 }
 0x1ef   : > { %v546_v21 = vadd.f32 %v3225_v20, %v4134_v35  ;;  %v540_v22 = vpop.f32.mrb[11].mxu0  ;;  %v622_v23 = vadd.f32 %v621_v19, %v620_v18 }
 0x1f0   : > { %v541_v24 = vadd.f32 %v4134_v35, %v540_v22 }
 0x1f1   : > { %v580_v25 = vmax.f32 %v546_v21, 0.0 }
 0x1f2   : > { %v579_v26 = vmax.f32 %v541_v24, 0.0 }
 0x1f3   : > { %599 = vst.msk [vmem:[%s4139_s29 + $0x58] sm:$0xff] %vm587_vm2, %v580_v25  ;;  %v625_v29 = vsel %vm587_vm2, %v580_v25, 0.0 }
 0x1f4   : > { %598 = vst.msk [vmem:[%s4139_s29 + $0x50] sm:$0xff] %vm587_vm2, %v579_v26  ;;  %v623_v27 = vsel %vm587_vm2, %v579_v26, 0.0 }
 0x1f5   : > { %v624_v28 = vadd.f32 %v623_v27, %v622_v23 }
 0x1f6   : > { %v3228_v30 = vpop.f32.mrb[12].mxu0 }
 0x1f7   : > { %v556_v31 = vadd.f32 %v3228_v30, %v4134_v35  ;;  %v550_v32 = vpop.f32.mrb[13].mxu0  ;;  %v626_v33 = vadd.f32 %v625_v29, %v624_v28 }
 0x1f8   : > { %v551_v34 = vadd.f32 %v4134_v35, %v550_v32 }
 0x1f9   : > { %v582_v36 = vmax.f32 %v556_v31, 0.0 }
 0x1fa   : > { %v581_v37 = vmax.f32 %v551_v34, 0.0 }
 0x1fb   : > { %601 = vst.msk [vmem:[%s4139_s29 + $0x68] sm:$0xff] %vm587_vm2, %v582_v36  ;;  %v629_v40 = vsel %vm587_vm2, %v582_v36, 0.0 }
 0x1fc   : > { %600 = vst.msk [vmem:[%s4139_s29 + $0x60] sm:$0xff] %vm587_vm2, %v581_v37  ;;  %v627_v38 = vsel %vm587_vm2, %v581_v37, 0.0 }
 0x1fd   : > { %v628_v39 = vadd.f32 %v627_v38, %v626_v33 }
 0x1fe   : > { %v3231_v41 = vpop.f32.mrb[14].mxu0 }
 0x1ff   : > { %v566_v42 = vadd.f32 %v3231_v41, %v4134_v35  ;;  %v560_v43 = vpop.f32.mrb[15].mxu0  ;;  %v630_v44 = vadd.f32 %v629_v40, %v628_v39 }
 0x200   : > { %v561_v45 = vadd.f32 %v4134_v35, %v560_v43 }
 0x201   : > { %v584_v46 = vmax.f32 %v566_v42, 0.0 }
 0x202   : > { %v583_v47 = vmax.f32 %v561_v45, 0.0 }
 0x203   : > { %603 = vst.msk [vmem:[%s4139_s29 + $0x78] sm:$0xff] %vm587_vm2, %v584_v46  ;;  %v633_v50 = vsel %vm587_vm2, %v584_v46, 0.0 }
 0x204   : > { %602 = vst.msk [vmem:[%s4139_s29 + $0x70] sm:$0xff] %vm587_vm2, %v583_v47  ;;  %v631_v48 = vsel %vm587_vm2, %v583_v47, 0.0 }
 0x205   : > { %v632_v49 = vadd.f32 %v631_v48, %v630_v44 }
 0x206   : > { %v3236_v51 = vpop.f32.mrb[0].mxu1 }
 0x207   : > { %v4203_v52 = vadd.f32 %v633_v50, %v632_v49  ;;  %v795_v53 = vadd.f32 %v3236_v51, %v4134_v35  ;;  %v789_v54 = vpop.f32.mrb[1].mxu1 }
 0x208   : > { %v790_v55 = vadd.f32 %v4134_v35, %v789_v54 }
 0x209   : > { %v869_v56 = vmax.f32 %v795_v53, 0.0 }
 0x20a   : > { %v868_v57 = vmax.f32 %v790_v55, 0.0 }
 0x20b   : > { %v885_v58 = vsel %vm587_vm2, %v869_v56, 0.0 }
 0x20c   : > { %v884_v59 = vsel %vm587_vm2, %v868_v57, 0.0 }
 0x20d   : > { %v886_v60 = vadd.f32 %v885_v58, %v884_v59  ;;  %v635_v59 = vrot.slane %v4203_v52, 4 }
 0x20e   : > { %v3239_v61 = vpop.f32.mrb[2].mxu1 }
 0x20f   : > { %v805_v62 = vadd.f32 %v3239_v61, %v4134_v35  ;;  %v799_v63 = vpop.f32.mrb[3].mxu1 }
 0x210   : > { %v800_v0 = vadd.f32 %v4134_v35, %v799_v63 }
 0x211   : > { %v871_v1 = vmax.f32 %v805_v62, 0.0 }
 0x212   : > { %v870_v2 = vmax.f32 %v800_v0, 0.0 }
 0x213   : > { %v889_v5 = vsel %vm587_vm2, %v871_v1, 0.0 }
 0x214   : > { %v887_v3 = vsel %vm587_vm2, %v870_v2, 0.0  ;;  %v636_v2 = vadd.f32 %v635_v59, %v4203_v52 }
 0x215   : > { %v888_v4 = vadd.f32 %v887_v3, %v886_v60 }
 0x216   : > { %v3242_v6 = vpop.f32.mrb[4].mxu1 }
 0x217   : > { %v815_v7 = vadd.f32 %v3242_v6, %v4134_v35  ;;  %v809_v8 = vpop.f32.mrb[5].mxu1  ;;  %v890_v9 = vadd.f32 %v889_v5, %v888_v4  ;;  %v637_v6 = vrot.slane %v636_v2, 2 }
 0x218   : > { %v810_v10 = vadd.f32 %v4134_v35, %v809_v8 }
 0x219   : > { %v873_v11 = vmax.f32 %v815_v7, 0.0 }
 0x21a   : > { %v872_v12 = vmax.f32 %v810_v10, 0.0 }
 0x21b   : > { %v893_v15 = vsel %vm587_vm2, %v873_v11, 0.0 }
 0x21c   : > { %v891_v13 = vsel %vm587_vm2, %v872_v12, 0.0 }
 0x21d   : > { %v892_v14 = vadd.f32 %v891_v13, %v890_v9  ;;  %v638_v9 = vadd.f32 %v637_v6, %v636_v2 }
 0x21e   : > { %v3245_v16 = vpop.f32.mrb[6].mxu1 }
 0x21f   : > { %v825_v17 = vadd.f32 %v3245_v16, %v4134_v35  ;;  %v819_v18 = vpop.f32.mrb[7].mxu1  ;;  %v894_v19 = vadd.f32 %v893_v15, %v892_v14  ;;  %v639_v12 = vrot.slane %v638_v9, 1  ;;  %v3828_v16 = vmov (!%p2963_p2), 0.0  }
 0x220   : > { %v820_v20 = vadd.f32 %v4134_v35, %v819_v18  ;;  %928 = vst.msk [vmem:[%s4241_s7] sm:$0x3] (!%p2963_p2), %vm927_vm4, %v3828_v16 }
 0x221   : > { %v875_v21 = vmax.f32 %v825_v17, 0.0  ;;  %v640_v14 = vadd.f32 %v639_v12, %v638_v9 }
 0x222   : > { %v874_v22 = vmax.f32 %v820_v20, 0.0 }
 0x223   : > { %v897_v25 = vsel %vm587_vm2, %v875_v21, 0.0 }
 0x224   : > { %v895_v23 = vsel %vm587_vm2, %v874_v22, 0.0 }
 0x225   : > { %v896_v24 = vadd.f32 %v895_v23, %v894_v19 }
 0x226   : > { %v3248_v26 = vpop.f32.mrb[8].mxu1 }
 0x227   : > { %v835_v27 = vadd.f32 %v3248_v26, %v4134_v35  ;;  %v829_v28 = vpop.f32.mrb[9].mxu1  ;;  %v898_v29 = vadd.f32 %v897_v25, %v896_v24 }
 0x228   : > { %v830_v30 = vadd.f32 %v4134_v35, %v829_v28 }
 0x229   : > { %v877_v31 = vmax.f32 %v835_v27, 0.0 }
 0x22a   : > { %v876_v32 = vmax.f32 %v830_v30, 0.0 }
 0x22b   : > { %v901_v36 = vsel %vm587_vm2, %v877_v31, 0.0 }
 0x22c   : > { %v899_v33 = vsel %vm587_vm2, %v876_v32, 0.0 }
 0x22d   : > { %v900_v34 = vadd.f32 %v899_v33, %v898_v29 }
 0x22e   : > { %v3251_v37 = vpop.f32.mrb[10].mxu1 }
 0x22f   : > { %v845_v38 = vadd.f32 %v3251_v37, %v4134_v35  ;;  %v839_v39 = vpop.f32.mrb[11].mxu1  ;;  %v902_v40 = vadd.f32 %v901_v36, %v900_v34 }
 0x230   : > { %v840_v41 = vadd.f32 %v4134_v35, %v839_v39 }
 0x231   : > { %v879_v42 = vmax.f32 %v845_v38, 0.0 }
 0x232   : > { %v878_v43 = vmax.f32 %v840_v41, 0.0 }
 0x233   : > { %v905_v46 = vsel %vm587_vm2, %v879_v42, 0.0 }
 0x234   : > { %v903_v44 = vsel %vm587_vm2, %v878_v43, 0.0 }
 0x235   : > { %v904_v45 = vadd.f32 %v903_v44, %v902_v40 }
 0x236   : > { %v3254_v47 = vpop.f32.mrb[12].mxu1 }
 0x237   : > { %v855_v48 = vadd.f32 %v3254_v47, %v4134_v35  ;;  %v849_v49 = vpop.f32.mrb[13].mxu1  ;;  %v906_v50 = vadd.f32 %v905_v46, %v904_v45 }
 0x238   : > { %v850_v51 = vadd.f32 %v4134_v35, %v849_v49 }
 0x239   : > { %v881_v53 = vmax.f32 %v855_v48, 0.0 }
 0x23a   : > { %v880_v54 = vmax.f32 %v850_v51, 0.0 }
 0x23b   : > { %v909_v57 = vsel %vm587_vm2, %v881_v53, 0.0 }
 0x23c   : > { %v907_v55 = vsel %vm587_vm2, %v880_v54, 0.0 }
 0x23d   : > { %v908_v56 = vadd.f32 %v907_v55, %v906_v50 }
 0x23e   : > { %v3257_v58 = vpop.f32.mrb[14].mxu1 }
 0x23f   : > { %v865_v60 = vadd.f32 %v3257_v58, %v4134_v35  ;;  %v859_v61 = vpop.f32.mrb[15].mxu1  ;;  %v910_v62 = vadd.f32 %v909_v57, %v908_v56 }
 0x240   : > { %v860_v63 = vadd.f32 %v4134_v35, %v859_v61 }
 0x241   : > { %v883_v0 = vmax.f32 %v865_v60, 0.0 }
 0x242   : > { %v882_v1 = vmax.f32 %v860_v63, 0.0 }
 0x243   : > { %v913_v5 = vsel %vm587_vm2, %v883_v0, 0.0 }
 0x244   : > { %v911_v3 = vsel %vm587_vm2, %v882_v1, 0.0 }
 0x245   : > { %v912_v4 = vadd.f32 %v911_v3, %v910_v62 }
 0x247   : > { %v914_v7 = vadd.f32 %v913_v5, %v912_v4 }
 0x249   : > { %v915_v8 = vrot.slane %v914_v7, 4 }
 0x24b   : > { %v916_v10 = vadd.f32 %v915_v8, %v914_v7 }
 0x24d   : > { %v917_v11 = vrot.slane %v916_v10, 2 }
 0x24f   : > { %v918_v13 = vadd.f32 %v917_v11, %v916_v10  ;;  %926 = sbr.rel (%p2963_p2) target bundleno = 598 (0x256), region = 48 }
 0x251   : > { %v919_v35 = vrot.slane %v918_v13, 1 }
 0x253   : > { %v920_v15 = vadd.f32 %v919_v35, %v918_v13 }
 0x255   : > { %v922_v52 = vsel %vm921_vm3, %v640_v14, %v920_v15 }
 0x256 PF: > { %v929_v17 = vld [vmem:[%s4241_s7] sm:$0x3]  ;;  %vm931_vm5 = vcmask 263168   ;;  %p2964_p0 = scmp.ne.s32.totalorder %s3797_s24, 1 }
 0x257   : > { %v930_v18 = vadd.f32 %v929_v17, %v922_v52 }
 0x258   : > { %936 = sbr.rel (%p2964_p0) target bundleno = 2194 (0x892), region = 52 }
 0x259   : > { %932 = vst.msk [vmem:[%s4241_s7] sm:$0x3] %vm931_vm5, %v930_v18 }
 0x25f   : > { %v1100_v19 = vlaneseq  ;;  %v4258_v20 = vld [vmem:[%s329_s26] ss:$0 sm:$0xff]  ;;  %v4262_v22 = vld [vmem:[#allocation2 + $0x8] sm:$0xff]  ;;  %v4285_v33 = vld [vmem:[#allocation2 + $0x90] sm:$0xff]  ;;  %v5685_v41 = vmov 0.0   ;;  %s4675_s24 = smov 0  }
 0x260   : > { %v4260_v21 = vld [vmem:[#allocation2] sm:$0xff]  ;;  %5769 = vst [vmem:[#allocation20_spill] sm:$0xff] %v4262_v22  ;;  %v973_v24 = vmul.f32 %v4262_v22, %v4262_v22  ;;  %v937_v25 = vld [vmem:[%s4241_s7] sm:$0x3]  ;;  %v4271_v27 = vld [vmem:[#allocation2 + $0x88] sm:$0xff] }
 0x261   : > { %5768 = vst [vmem:[#allocation19_spill] sm:$0xff] %v4260_v21  ;;  %v972_v23 = vmul.f32 %v4260_v21, %v4260_v21  ;;  %v4269_v26 = vld [vmem:[#allocation2 + $0x80] sm:$0xff]  ;;  %5771 = vst [vmem:[#allocation22_spill] sm:$0xff] %v4271_v27  ;;  %v4275_v28 = vpack.c.bf16 %v4262_v22, %v4260_v21  ;;  %v4277_v29 = vshrl.u32 %v1100_v19, 7  ;;  %v4279_v30 = vand.u32 127, %v1100_v19  ;;  %v4287_v34 = vld [vmem:[#allocation2 + $0x98] sm:$0xff] }
 0x262   : > { %5770 = vst [vmem:[#allocation21_spill] sm:$0xff] %v4269_v26  ;;  %v938_v31 = vmul.f32 0.00390625, %v937_v25  ;;  %v4283_v32 = vpack.c.bf16 %v4271_v27, %v4269_v26  ;;  %5776 = vst [vmem:[#allocation27_spill] sm:$0xff] %v4285_v33  ;;  %v1007_v37 = vsel %vm587_vm2, %v973_v24, 0.0  ;;  %v4293_v38 = vpack.c.bf16 %v4287_v34, %v4285_v33  ;;  %v4343_v9 = vld [vmem:[#allocation2 + $0x10] sm:$0xff]  ;;  %v4356_v52 = vld [vmem:[#allocation2 + $0x18] sm:$0xff] }
 0x263   : > { %5772 = vst [vmem:[#allocation23_spill] sm:$0xff] %v4275_v28  ;;  %5773 = vst [vmem:[#allocation24_spill] sm:$0xff] %v4277_v29  ;;  %v1004_v36 = vsel %vm587_vm2, %v972_v23, 0.0  ;;  %v1121_v39 = vadd.s32 128, %v4277_v29  ;;  %vm1142_vm6 = vcmp.eq.s32.totalorder %v4277_v29, %v4258_v20  ;;  %vm1102_vm7 = vcmp.ge.s32.totalorder %v4279_v30, 5  ;;  %v4358_v16 = vld [vmem:[#allocation2 + $0xa0] sm:$0xff] }
 0x264   : > { %5774 = vst [vmem:[#allocation25_spill] sm:$0xff] %v4279_v30  ;;  %5775 = vst [vmem:[#allocation26_spill] sm:$0xff] %v4283_v32  ;;  %v1106_v40 = vadd.s32 8, %v4277_v29  ;;  %1005 = vadd.xlane.f32.xlu1 %v1004_v36  ;;  %3309 = vmatprep.subr.bf16.mxu0 %v4283_v32  ;;  %v2966_v42 = vsel %vm1142_vm6, 1.0, %v5685_v41  ;;  %v4305_v43 = vsel %vm1102_vm7, inf, %v5685_v41  ;;  %v1122_v44 = vadd.s32 136, %v4277_v29 }
 0x265   : > { %5777 = vst [vmem:[#allocation28_spill] sm:$0xff] %v4287_v34  ;;  %5778 = vst [vmem:[#allocation29_spill] sm:$0xff] %v4293_v38  ;;  %v1107_v45 = vadd.s32 16, %v4277_v29  ;;  %3311 = vmatpush3.bf16.msra.mxu0 %v4275_v28  ;;  %vm1158_vm8 = vcmp.eq.s32.totalorder %v1121_v39, %v4258_v20  ;;  %v1123_v46 = vadd.s32 144, %v4277_v29  ;;  %v1108_v49 = vadd.s32 24, %v4277_v29  ;;  %v4360_v17 = vld [vmem:[#allocation2 + $0xa8] sm:$0xff] }
 0x266   : > { %939 = vst.msk [vmem:[%s4241_s7] sm:$0x3] %vm931_vm5, %v938_v31  ;;  %5779 = vst [vmem:[#allocation30_spill] sm:$0xff] %v4305_v43  ;;  %vm1143_vm9 = vcmp.eq.s32.totalorder %v1106_v40, %v4258_v20  ;;  %3313 = vmatprep.subr.bf16.mxu0 %v4293_v38  ;;  %v2982_v47 = vsel %vm1158_vm8, 1.0, %v5685_v41  ;;  %vm1159_vm10 = vcmp.eq.s32.totalorder %v1122_v44, %v4258_v20  ;;  %v1124_v53 = vadd.s32 152, %v4277_v29  ;;  %v4364_v24 = vld [vmem:[#allocation2 + $0x20] sm:$0xff] }
 0x267   : > { %v2967_v48 = vsel %vm1143_vm9, 1.0, %v5685_v41  ;;  %v3509_v50 = vpack.i.bf16 %v2966_v42, %v2982_v47  ;;  %v2983_v51 = vsel %vm1159_vm10, 1.0, %v5685_v41  ;;  %vm1144_vm11 = vcmp.eq.s32.totalorder %v1107_v45, %v4258_v20  ;;  %5780 = vst [vmem:[#allocation31_spill] sm:$0xff] %v4343_v9  ;;  %5781 = vst [vmem:[#allocation32_spill] sm:$0xff] %v4356_v52  ;;  %v4383_v44 = vld [vmem:[#allocation2 + $0xb0] sm:$0xff]  ;;  %v4385_v45 = vld [vmem:[#allocation2 + $0xb8] sm:$0xff] }
 0x268   : > { %vm1160_vm12 = vcmp.eq.s32.totalorder %v1123_v46, %v4258_v20  ;;  %1008 = vadd.xlane.f32.xlu1 %v1007_v37  ;;  %v3511_v54 = vpack.i.bf16 %v2967_v48, %v2983_v51  ;;  %v2968_v55 = vsel %vm1144_vm11, 1.0, %v5685_v41  ;;  %vm1145_vm13 = vcmp.eq.s32.totalorder %v1108_v49, %v4258_v20  ;;  %5782 = vst [vmem:[#allocation33_spill] sm:$0xff] %v4358_v16  ;;  %v4370_v37 = vld [vmem:[#allocation2 + $0x28] sm:$0xff] }
 0x269   : > { %3510 = vxpose.xlu0.b32.start [1/16] (narrow) %v3509_v50, 8  ;;  %v2984_v56 = vsel %vm1160_vm12, 1.0, %v5685_v41  ;;  %vm1161_vm14 = vcmp.eq.s32.totalorder %v1124_v53, %v4258_v20  ;;  %v1109_v57 = vadd.s32 32, %v4277_v29  ;;  %v1125_v58 = vadd.s32 160, %v4277_v29  ;;  %5783 = vst [vmem:[#allocation34_spill] sm:$0xff] %v4360_v17  ;;  %5784 = vst [vmem:[#allocation35_spill] sm:$0xff] %v4364_v24 }
 0x26a   : > { %v3513_v59 = vpack.i.bf16 %v2968_v55, %v2984_v56  ;;  %v2969_v60 = vsel %vm1145_vm13, 1.0, %v5685_v41  ;;  %v2985_v61 = vsel %vm1161_vm14, 1.0, %v5685_v41  ;;  %v1110_v62 = vadd.s32 40, %v4277_v29  ;;  %5785 = vst [vmem:[#allocation36_spill] sm:$0xff] %v4370_v37  ;;  %5788 = vst [vmem:[#allocation39_spill] sm:$0xff] %v4383_v44  ;;  %v4406_v55 = vld [vmem:[#allocation2 + $0x38] sm:$0xff] }
 0x26b   : > { %vm1146_vm15 = vcmp.eq.s32.totalorder %v1109_v57, %v4258_v20  ;;  %vm1162_vm0 = vcmp.eq.s32.totalorder %v1125_v58, %v4258_v20  ;;  %v1126_v63 = vadd.s32 168, %v4277_v29  ;;  %v3515_v0 = vpack.i.bf16 %v2969_v60, %v2985_v61  ;;  %5789 = vst [vmem:[#allocation40_spill] sm:$0xff] %v4385_v45  ;;  %5793 = vst [vmem:[#allocation44_spill] sm:$0xff] %v4406_v55  ;;  %v4412_v58 = vld [vmem:[#allocation2 + $0xc0] sm:$0xff] }
 0x26c   : > { %v2970_v1 = vsel %vm1146_vm15, 1.0, %v5685_v41  ;;  %v2986_v2 = vsel %vm1162_vm0, 1.0, %v5685_v41  ;;  %vm1147_vm1 = vcmp.eq.s32.totalorder %v1110_v62, %v4258_v20  ;;  %v1111_v3 = vadd.s32 48, %v4277_v29  ;;  %5794 = vst [vmem:[#allocation45_spill] sm:$0xff] %v4412_v58 }
 0x26d   : > { %3512 = vxpose.xlu0.b32.cont [2/16] (narrow) %v3511_v54, 8  ;;  %vm1163_vm3 = vcmp.eq.s32.totalorder %v1126_v63, %v4258_v20  ;;  %v1127_v4 = vadd.s32 176, %v4277_v29  ;;  %v3517_v5 = vpack.i.bf16 %v2970_v1, %v2986_v2  ;;  %v2971_v6 = vsel %vm1147_vm1, 1.0, %v5685_v41  ;;  %v4404_v54 = vld [vmem:[#allocation2 + $0x30] sm:$0xff] }
 0x26e   : > { %v2987_v7 = vsel %vm1163_vm3, 1.0, %v5685_v41  ;;  %v1112_v8 = vadd.s32 56, %v4277_v29  ;;  %vm1148_vm4 = vcmp.eq.s32.totalorder %v1111_v3, %v4258_v20  ;;  %v1128_v10 = vadd.s32 184, %v4277_v29  ;;  %5792 = vst [vmem:[#allocation43_spill] sm:$0xff] %v4404_v54  ;;  %v4431_v3 = vld [vmem:[#allocation2 + $0x40] sm:$0xff] }
 0x26f   : > { %vm1164_vm5 = vcmp.eq.s32.totalorder %v1127_v4, %v4258_v20  ;;  %v3519_v11 = vpack.i.bf16 %v2971_v6, %v2987_v7  ;;  %v974_v12 = vmul.f32 %v4343_v9, %v4343_v9  ;;  %v2972_v13 = vsel %vm1148_vm4, 1.0, %v5685_v41  ;;  %5798 = vst [vmem:[#allocation49_spill] sm:$0xff] %v4431_v3  ;;  %v4433_v4 = vld [vmem:[#allocation2 + $0x48] sm:$0xff]  ;;  %v4439_v7 = vld [vmem:[#allocation2 + $0xd0] sm:$0xff] }
 0x270   : > { %v2988_v35 = vsel %vm1164_vm5, 1.0, %v5685_v41  ;;  %vm1149_vm6 = vcmp.eq.s32.totalorder %v1112_v8, %v4258_v20  ;;  %v1113_v14 = vadd.s32 64, %v4277_v29  ;;  %vm1165_vm7 = vcmp.eq.s32.totalorder %v1128_v10, %v4258_v20  ;;  %5799 = vst [vmem:[#allocation50_spill] sm:$0xff] %v4433_v4  ;;  %5800 = vst [vmem:[#allocation51_spill] sm:$0xff] %v4439_v7  ;;  %v4441_v8 = vld [vmem:[#allocation2 + $0xd8] sm:$0xff] }
 0x271   : > { %3514 = vxpose.xlu0.b32.cont [3/16] (narrow) %v3513_v59, 8  ;;  %v1129_v15 = vadd.s32 192, %v4277_v29  ;;  %v3521_v18 = vpack.i.bf16 %v2972_v13, %v2988_v35  ;;  %v2973_v19 = vsel %vm1149_vm6, 1.0, %v5685_v41  ;;  %v1114_v23 = vadd.s32 72, %v4277_v29  ;;  %v4414_v59 = vld [vmem:[#allocation2 + $0xc8] sm:$0xff]  ;;  %5801 = vst [vmem:[#allocation52_spill] sm:$0xff] %v4441_v8 }
 0x272   : > { %v2989_v25 = vsel %vm1165_vm7, 1.0, %v5685_v41  ;;  %vm1150_vm8 = vcmp.eq.s32.totalorder %v1113_v14, %v4258_v20  ;;  %v1130_v31 = vadd.s32 200, %v4277_v29  ;;  %v1010_v36 = vsel %vm587_vm2, %v974_v12, 0.0  ;;  %5795 = vst [vmem:[#allocation46_spill] sm:$0xff] %v4414_v59 }
 0x273   : > { %vm1166_vm9 = vcmp.eq.s32.totalorder %v1129_v15, %v4258_v20  ;;  %1011 = vadd.xlane.f32.xlu1 %v1010_v36  ;;  %v975_v39 = vmul.f32 %v4356_v52, %v4356_v52  ;;  %v4377_v40 = vpack.c.bf16 %v4356_v52, %v4343_v9  ;;  %v4381_v42 = vpack.c.bf16 %v4360_v17, %v4358_v16  ;;  %v4468_v36 = vld [vmem:[#allocation2 + $0xe8] sm:$0xff] }
 0x274   : > { %v976_v46 = vmul.f32 %v4364_v24, %v4364_v24  ;;  %v3523_v47 = vpack.i.bf16 %v2973_v19, %v2989_v25  ;;  %v4393_v49 = vpack.c.bf16 %v4370_v37, %v4364_v24  ;;  %v2974_v50 = vsel %vm1150_vm8, 1.0, %v5685_v41  ;;  %v4460_v19 = vld [vmem:[#allocation2 + $0x58] sm:$0xff]  ;;  %5807 = vst [vmem:[#allocation58_spill] sm:$0xff] %v4468_v36 }
 0x275   : > { %3516 = vxpose.xlu0.b32.cont [4/16] (narrow) %v3515_v0, 8  ;;  %5786 = vst [vmem:[#allocation37_spill] sm:$0xff] %v4377_v40  ;;  %5787 = vst [vmem:[#allocation38_spill] sm:$0xff] %v4381_v42  ;;  %v1013_v48 = vsel %vm587_vm2, %v975_v39, 0.0  ;;  %3315 = vmatpush3.bf16.msra.mxu0 %v4377_v40  ;;  %v2990_v51 = vsel %vm1166_vm9, 1.0, %v5685_v41  ;;  %v4402_v53 = vpack.c.bf16 %v4385_v45, %v4383_v44  ;;  %v1115_v56 = vadd.s32 80, %v4277_v29 }
 0x276   : > { %5790 = vst [vmem:[#allocation41_spill] sm:$0xff] %v4393_v49  ;;  %3317 = vmatprep.subr.bf16.mxu0 %v4381_v42  ;;  %vm1151_vm10 = vcmp.eq.s32.totalorder %v1114_v23, %v4258_v20  ;;  %vm1167_vm11 = vcmp.eq.s32.totalorder %v1130_v31, %v4258_v20  ;;  %v1131_v57 = vadd.s32 208, %v4277_v29  ;;  %v1016_v60 = vsel %vm587_vm2, %v976_v46, 0.0  ;;  %5805 = vst [vmem:[#allocation56_spill] sm:$0xff] %v4460_v19  ;;  %v4466_v31 = vld [vmem:[#allocation2 + $0xe0] sm:$0xff] }
 0x277   : > { %5791 = vst [vmem:[#allocation42_spill] sm:$0xff] %v4402_v53  ;;  %1014 = vadd.xlane.f32.xlu1 %v1013_v48  ;;  %v977_v61 = vmul.f32 %v4370_v37, %v4370_v37  ;;  %v3525_v62 = vpack.i.bf16 %v2974_v50, %v2990_v51  ;;  %v4422_v63 = vpack.c.bf16 %v4406_v55, %v4404_v54  ;;  %v2975_v0 = vsel %vm1151_vm10, 1.0, %v5685_v41 }
 0x278   : > { %v2991_v1 = vsel %vm1167_vm11, 1.0, %v5685_v41  ;;  %v4429_v2 = vpack.c.bf16 %v4414_v59, %v4412_v58  ;;  %vm1152_vm12 = vcmp.eq.s32.totalorder %v1115_v56, %v4258_v20  ;;  %vm1168_vm13 = vcmp.eq.s32.totalorder %v1131_v57, %v4258_v20  ;;  %5806 = vst [vmem:[#allocation57_spill] sm:$0xff] %v4466_v31  ;;  %v4485_v57 = vld [vmem:[#allocation2 + $0x60] sm:$0xff] }
 0x279   : > { %3518 = vxpose.xlu0.b32.cont [5/16] (narrow) %v3517_v5, 8  ;;  %3319 = vmatpush3.bf16.msra.mxu0 %v4393_v49  ;;  %5796 = vst [vmem:[#allocation47_spill] sm:$0xff] %v4422_v63  ;;  %v1116_v5 = vadd.s32 88, %v4277_v29  ;;  %v1132_v6 = vadd.s32 216, %v4277_v29  ;;  %v1019_v10 = vsel %vm587_vm2, %v977_v61, 0.0  ;;  %v3527_v12 = vpack.i.bf16 %v2975_v0, %v2991_v1  ;;  %5810 = vst [vmem:[#allocation61_spill] sm:$0xff] %v4485_v57 }
 0x27a   : > { %3321 = vmatprep.subr.bf16.mxu0 %v4402_v53  ;;  %5797 = vst [vmem:[#allocation48_spill] sm:$0xff] %v4429_v2  ;;  %v4449_v13 = vpack.c.bf16 %v4433_v4, %v4431_v3  ;;  %v2976_v35 = vsel %vm1152_vm12, 1.0, %v5685_v41  ;;  %v2992_v14 = vsel %vm1168_vm13, 1.0, %v5685_v41  ;;  %v4456_v15 = vpack.c.bf16 %v4441_v8, %v4439_v7  ;;  %v4493_v0 = vld [vmem:[#allocation2 + $0xf0] sm:$0xff]  ;;  %v4495_v1 = vld [vmem:[#allocation2 + $0xf8] sm:$0xff] }
 0x27b   : > { %1017 = vadd.xlane.f32.xlu1 %v1016_v60  ;;  %vm1153_vm14 = vcmp.eq.s32.totalorder %v1116_v5, %v4258_v20  ;;  %vm1169_vm15 = vcmp.eq.s32.totalorder %v1132_v6, %v4258_v20  ;;  %v1117_v23 = vadd.s32 96, %v4277_v29  ;;  %v1133_v25 = vadd.s32 224, %v4277_v29  ;;  %v4487_v60 = vld [vmem:[#allocation2 + $0x68] sm:$0xff]  ;;  %5812 = vst [vmem:[#allocation63_spill] sm:$0xff] %v4493_v0  ;;  %5813 = vst [vmem:[#allocation64_spill] sm:$0xff] %v4495_v1 }
 0x27c   : > { %5802 = vst [vmem:[#allocation53_spill] sm:$0xff] %v4449_v13  ;;  %5803 = vst [vmem:[#allocation54_spill] sm:$0xff] %v4456_v15  ;;  %v979_v46 = vmul.f32 %v4406_v55, %v4406_v55  ;;  %v2977_v50 = vsel %vm1153_vm14, 1.0, %v5685_v41  ;;  %v2993_v51 = vsel %vm1169_vm15, 1.0, %v5685_v41  ;;  %v4483_v56 = vpack.c.bf16 %v4468_v36, %v4466_v31 }
 0x27d   : > { %3520 = vxpose.xlu0.b32.cont [6/16] (narrow) %v3519_v11, 8  ;;  %v978_v11 = vmul.f32 %v4404_v54, %v4404_v54  ;;  %3323 = vmatpush3.bf16.msra.mxu0 %v4422_v63  ;;  %5811 = vst [vmem:[#allocation62_spill] sm:$0xff] %v4487_v60  ;;  %vm1154_vm0 = vcmp.eq.s32.totalorder %v1117_v23, %v4258_v20  ;;  %v1118_v61 = vadd.s32 104, %v4277_v29  ;;  %v4512_v23 = vld [vmem:[#allocation2 + $0x70] sm:$0xff] }
 0x27e   : > { %3325 = vmatprep.subr.bf16.mxu0 %v4429_v2  ;;  %5809 = vst [vmem:[#allocation60_spill] sm:$0xff] %v4483_v56  ;;  %vm1170_vm1 = vcmp.eq.s32.totalorder %v1133_v25, %v4258_v20  ;;  %v1025_v5 = vsel %vm587_vm2, %v979_v46, 0.0  ;;  %v980_v6 = vmul.f32 %v4431_v3, %v4431_v3  ;;  %5816 = vst [vmem:[#allocation67_spill] sm:$0xff] %v4512_v23  ;;  %v4514_v25 = vld [vmem:[#allocation2 + $0x78] sm:$0xff]  ;;  %v1135_v46 = vadd.s32 240, %v4277_v29 }
 0x27f   : > { %1020 = vadd.xlane.f32.xlu1 %v1019_v10  ;;  %v1022_v39 = vsel %vm587_vm2, %v978_v11, 0.0  ;;  %v3531_v10 = vpack.i.bf16 %v2977_v50, %v2993_v51  ;;  %v4503_v11 = vpack.c.bf16 %v4487_v60, %v4485_v57  ;;  %5817 = vst [vmem:[#allocation68_spill] sm:$0xff] %v4514_v25  ;;  %vm1155_vm3 = vcmp.eq.s32.totalorder %v1118_v61, %v4258_v20 }
 0x280   : > { %v981_v50 = vmul.f32 %v4433_v4, %v4433_v4  ;;  %v5819_v61 = vmov 0.0   ;;  %vm1172_vm6 = vcmp.eq.s32.totalorder %v1135_v46, %v4258_v20 }
 0x281   : > { %3522 = vxpose.xlu0.b32.cont [7/16] (narrow) %v3521_v18, 8  ;;  %v4458_v18 = vld [vmem:[#allocation2 + $0x50] sm:$0xff]  ;;  %3327 = vmatpush3.bf16.msra.mxu0 %v4449_v13  ;;  %5814 = vst [vmem:[#allocation65_spill] sm:$0xff] %v4503_v11 }
 0x282   : > { %5804 = vst [vmem:[#allocation55_spill] sm:$0xff] %v4458_v18  ;;  %v4476_v48 = vpack.c.bf16 %v4460_v19, %v4458_v18  ;;  %3329 = vmatprep.subr.bf16.mxu0 %v4456_v15 }
 0x283   : > { %1023 = vadd.xlane.f32.xlu1 %v1022_v39  ;;  %v1119_v39 = vadd.s32 112, %v4277_v29 }
 0x284   : > { %5808 = vst [vmem:[#allocation59_spill] sm:$0xff] %v4476_v48 }
 0x285   : > { %3524 = vxpose.xlu0.b32.cont [8/16] (narrow) %v3523_v47, 8  ;;  %v3529_v47 = vpack.i.bf16 %v2976_v35, %v2992_v14  ;;  %3331 = vmatpush3.bf16.msra.mxu0 %v4476_v48  ;;  %v2994_v35 = vsel %vm1170_vm1, 1.0, %v5685_v41  ;;  %v4510_v14 = vpack.c.bf16 %v4495_v1, %v4493_v0  ;;  %vm1156_vm5 = vcmp.eq.s32.totalorder %v1119_v39, %v4258_v20 }
 0x286   : > { %3333 = vmatprep.subr.bf16.mxu0 %v4483_v56  ;;  %v2980_v43 = vsel %vm1156_vm5, 1.0, %v5819_v61  ;;  %v2996_v39 = vsel %vm1172_vm6, 1.0, %v5819_v61 }
 0x287   : > { %5815 = vst [vmem:[#allocation66_spill] sm:$0xff] %v4510_v14  ;;  %1026 = vadd.xlane.f32.xlu1 %v1025_v5  ;;  %v1120_v5 = vadd.s32 120, %v4277_v29 }
 0x289   : > { %3526 = vxpose.xlu0.b32.cont [9/16] (narrow) %v3525_v62, 8  ;;  %v1134_v62 = vadd.s32 232, %v4277_v29  ;;  %3335 = vmatpush3.bf16.msra.mxu0 %v4503_v11  ;;  %vm1157_vm7 = vcmp.eq.s32.totalorder %v1120_v5, %v4258_v20  ;;  %v984_v5 = vmul.f32 %v4485_v57, %v4485_v57 }
 0x28a   : > { %3337 = vmatprep.subr.bf16.mxu0 %v4510_v14 }
 0x28b   : > { %vm1171_vm4 = vcmp.eq.s32.totalorder %v1134_v62, %v4258_v20  ;;  %v2979_v62 = vsel %vm1155_vm3, 1.0, %v5819_v61 }
 0x28c   : > { %v2995_v30 = vsel %vm1171_vm4, 1.0, %v5819_v61 }
 0x28d   : > { %3528 = vxpose.xlu0.b32.cont [10/16] (narrow) %v3527_v12, 8  ;;  %v2978_v12 = vsel %vm1154_vm0, 1.0, %v5685_v41  ;;  %v4526_v41 = vpack.c.bf16 %v4514_v25, %v4512_v23 }
 0x28e   : > { %v3533_v51 = vpack.i.bf16 %v2978_v12, %v2994_v35  ;;  %v982_v12 = vmul.f32 %v4458_v18, %v4458_v18  ;;  %v3535_v35 = vpack.i.bf16 %v2979_v62, %v2995_v30  ;;  %v2981_v30 = vsel %vm1157_vm7, 1.0, %v5819_v61 }
 0x28f   : > { %5818 = vst [vmem:[#allocation69_spill] sm:$0xff] %v4526_v41  ;;  %3339 = vmatpush3.bf16.msra.mxu0 %v4526_v41 }
 0x290   : > { %v1034_v46 = vsel %vm587_vm2, %v982_v12, 0.0 }
 0x291   : > { %3530 = vxpose.xlu0.b32.cont [11/16] (narrow) %v3529_v47, 8  ;;  %v1028_v47 = vsel %vm587_vm2, %v980_v6, 0.0  ;;  %v1136_v6 = vadd.s32 248, %v4277_v29 }
 0x292   : > { %1029 = vadd.xlane.f32.xlu1 %v1028_v47  ;;  %v983_v47 = vmul.f32 %v4460_v19, %v4460_v19 }
 0x293   : > { %vm1173_vm8 = vcmp.eq.s32.totalorder %v1136_v6, %v4258_v20  ;;  %v1040_v6 = vsel %vm587_vm2, %v984_v5, 0.0  ;;  %v992_v5 = vmul.f32 %v4358_v16, %v4358_v16 }
 0x294   : > { %v1037_v62 = vsel %vm587_vm2, %v983_v47, 0.0 }
 0x295   : > { %3532 = vxpose.xlu0.b32.cont [12/16] (narrow) %v3531_v10, 8  ;;  %v1031_v10 = vsel %vm587_vm2, %v981_v50, 0.0  ;;  %v3537_v50 = vpack.i.bf16 %v2980_v43, %v2996_v39 }
 0x296   : > { %1032 = vadd.xlane.f32.xlu1 %v1031_v10  ;;  %v985_v10 = vmul.f32 %v4487_v60, %v4487_v60 }
 0x298   : > { %v1043_v43 = vsel %vm587_vm2, %v985_v10, 0.0 }
 0x299   : > { %3534 = vxpose.xlu0.b32.cont [13/16] (narrow) %v3533_v51, 8  ;;  %v2997_v51 = vsel %vm1173_vm8, 1.0, %v5819_v61  ;;  %v986_v61 = vmul.f32 %v4512_v23, %v4512_v23 }
 0x29a   : > { %1035 = vadd.xlane.f32.xlu1 %v1034_v46  ;;  %v3539_v20 = vpack.i.bf16 %v2981_v30, %v2997_v51  ;;  %v989_v46 = vmul.f32 %v4271_v27, %v4271_v27  ;;  %v991_v51 = vmul.f32 %v4287_v34, %v4287_v34 }
 0x29b   : > { %v1046_v12 = vsel %vm587_vm2, %v986_v61, 0.0 }
 0x29c   : > { %v1055_v47 = vsel %vm587_vm2, %v989_v46, 0.0  ;;  %v996_v46 = vmul.f32 %v4412_v58, %v4412_v58 }
 0x29d   : > { %3536 = vxpose.xlu0.b32.cont [14/16] (narrow) %v3535_v35, 8  ;;  %v987_v35 = vmul.f32 %v4514_v25, %v4514_v25 }
 0x29e   : > { %1038 = vadd.xlane.f32.xlu1 %v1037_v62  ;;  %v1061_v62 = vsel %vm587_vm2, %v991_v51, 0.0  ;;  %v997_v51 = vmul.f32 %v4414_v59, %v4414_v59 }
 0x29f   : > { %v1049_v39 = vsel %vm587_vm2, %v987_v35, 0.0  ;;  %v988_v35 = vmul.f32 %v4269_v26, %v4269_v26 }
 0x2a1   : > { %3538 = vxpose.xlu0.b32.cont [15/16] (narrow) %v3537_v50, 8  ;;  %v990_v50 = vmul.f32 %v4285_v33, %v4285_v33 }
 0x2a2   : > { %1041 = vadd.xlane.f32.xlu1 %v1040_v6  ;;  %v993_v6 = vmul.f32 %v4360_v17, %v4360_v17 }
 0x2a3   : > { %v1058_v30 = vsel %vm587_vm2, %v990_v50, 0.0  ;;  %v1001_v50 = vmul.f32 %v4468_v36, %v4468_v36 }
 0x2a4   : > { %v1067_v10 = vsel %vm587_vm2, %v993_v6, 0.0  ;;  %v998_v6 = vmul.f32 %v4439_v7, %v4439_v7 }
 0x2a5   : > { %3540 = vxpose.xlu0.b32.end [16/16] (narrow) %v3539_v20, 8  ;;  %v1064_v20 = vsel %vm587_vm2, %v992_v5, 0.0  ;;  %v1003_v5 = vmul.f32 %v4495_v1, %v4495_v1 }
 0x2a6   : > { %1044 = vadd.xlane.f32.xlu1 %v1043_v43  ;;  %v994_v43 = vmul.f32 %v4383_v44, %v4383_v44 }
 0x2a8   : > { %v1070_v61 = vsel %vm587_vm2, %v994_v43, 0.0  ;;  %v1082_v43 = vsel %vm587_vm2, %v998_v6, 0.0 }
 0x2aa   : > { %1047 = vadd.xlane.f32.xlu1 %v1046_v12  ;;  %v995_v12 = vmul.f32 %v4385_v45, %v4385_v45 }
 0x2ae   : > { %1050 = vadd.xlane.f32.xlu1 %v1049_v39  ;;  %v1073_v39 = vsel %vm587_vm2, %v995_v12, 0.0 }
 0x2b2   : > { %1056 = vadd.xlane.f32.xlu1 %v1055_v47  ;;  %v1052_v47 = vsel %vm587_vm2, %v988_v35, 0.0  ;;  %v1000_v35 = vmul.f32 %v4466_v31, %v4466_v31 }
 0x2b6   : > { %1059 = vadd.xlane.f32.xlu1 %v1058_v30  ;;  %v1076_v30 = vsel %vm587_vm2, %v996_v46, 0.0  ;;  %v1002_v46 = vmul.f32 %v4493_v0, %v4493_v0 }
 0x2ba   : > { %1062 = vadd.xlane.f32.xlu1 %v1061_v62  ;;  %v1091_v62 = vsel %vm587_vm2, %v1001_v50, 0.0 }
 0x2be   : > { %1065 = vadd.xlane.f32.xlu1 %v1064_v20  ;;  %v1079_v20 = vsel %vm587_vm2, %v997_v51, 0.0 }
 0x2c2   : > { %1068 = vadd.xlane.f32.xlu1 %v1067_v10  ;;  %v1097_v10 = vsel %vm587_vm2, %v1003_v5, 0.0 }
 0x2c6   : > { %1071 = vadd.xlane.f32.xlu1 %v1070_v61  ;;  %v999_v61 = vmul.f32 %v4441_v8, %v4441_v8 }
 0x2c8   : > { %v1085_v12 = vsel %vm587_vm2, %v999_v61, 0.0 }
 0x2ca   : > { %1074 = vadd.xlane.f32.xlu1 %v1073_v39  ;;  %v1088_v39 = vsel %vm587_vm2, %v1000_v35, 0.0 }
 0x2ce   : > { %1077 = vadd.xlane.f32.xlu1 %v1076_v30 }
 0x2d2   : > { %1053 = vadd.xlane.f32.xlu0 %v1052_v47  ;;  %1080 = vadd.xlane.f32.xlu1 %v1079_v20  ;;  %v1094_v47 = vsel %vm587_vm2, %v1002_v46, 0.0 }
 0x2d6   : > { %1092 = vadd.xlane.f32.xlu0 %v1091_v62  ;;  %1083 = vadd.xlane.f32.xlu1 %v1082_v43 }
 0x2da   : > { %1098 = vadd.xlane.f32.xlu0 %v1097_v10  ;;  %1086 = vadd.xlane.f32.xlu1 %v1085_v12 }
 0x2de   : > { %1089 = vadd.xlane.f32.xlu1 %v1088_v39 }
 0x2e2   : > { %1095 = vadd.xlane.f32.xlu1 %v1094_v47 }
 0x2e9   : > { %v3541_v50 = vpop.trf.xlu0 }
 0x2ea   : > { %v3542_v30 = vunpack.i.l.bf16 %v3541_v50  ;;  %v3545_v51 = vunpack.i.h.bf16 %v3541_v50 }
 0x2ec   : > { %1366 = vmatprep.mubr.f32.mxu0 %v3542_v30 }
 0x2ed   : > { %1367 = vmatmul.mubr.f32.vlgmr.msra.gmra.mrb[0].mxu0 %v3545_v51 }
 0x2f1   : > { %v4609_v62 = vpop.xlane.xlu1 %1005 }
 0x2f2   : > { %5820 = vst [vmem:[#allocation70_spill] sm:$0xff] %v4609_v62 }
 0x2f5   : > { %v4611_v5 = vpop.xlane.xlu1 %1008 }
 0x2f6   : > { %5821 = vst [vmem:[#allocation71_spill] sm:$0xff] %v4611_v5 }
 0x300   : > { %v4613_v20 = vpop.xlane.xlu1 %1011 }
 0x301   : > { %5822 = vst [vmem:[#allocation72_spill] sm:$0xff] %v4613_v20 }
 0x304   : > { %v4615_v6 = vpop.xlane.xlu1 %1014 }
 0x305   : > { %5823 = vst [vmem:[#allocation73_spill] sm:$0xff] %v4615_v6 }
 0x308   : > { %v4617_v10 = vpop.xlane.xlu1 %1017 }
 0x309   : > { %5824 = vst [vmem:[#allocation74_spill] sm:$0xff] %v4617_v10 }
 0x30c   : > { %v4619_v43 = vpop.xlane.xlu1 %1020 }
 0x30d   : > { %5825 = vst [vmem:[#allocation75_spill] sm:$0xff] %v4619_v43 }
 0x310   : > { %v4621_v61 = vpop.xlane.xlu1 %1023 }
 0x311   : > { %5826 = vst [vmem:[#allocation76_spill] sm:$0xff] %v4621_v61 }
 0x314   : > { %v4623_v12 = vpop.xlane.xlu1 %1026 }
 0x315   : > { %5827 = vst [vmem:[#allocation77_spill] sm:$0xff] %v4623_v12 }
 0x31f   : > { %v4625_v35 = vpop.xlane.xlu1 %1029 }
 0x320   : > { %5828 = vst [vmem:[#allocation78_spill] sm:$0xff] %v4625_v35 }
 0x323   : > { %v4627_v39 = vpop.xlane.xlu1 %1032 }
 0x324   : > { %5829 = vst [vmem:[#allocation79_spill] sm:$0xff] %v4627_v39 }
 0x327   : > { %v4629_v46 = vpop.xlane.xlu1 %1035 }
 0x328   : > { %5830 = vst [vmem:[#allocation80_spill] sm:$0xff] %v4629_v46 }
 0x32b   : > { %v4631_v47 = vpop.xlane.xlu1 %1038 }
 0x32c   : > { %5831 = vst [vmem:[#allocation81_spill] sm:$0xff] %v4631_v47 }
 0x32f   : > { %v4633_v50 = vpop.xlane.xlu1 %1041 }
 0x330   : > { %5832 = vst [vmem:[#allocation82_spill] sm:$0xff] %v4633_v50 }
 0x333   : > { %v4635_v30 = vpop.xlane.xlu1 %1044 }
 0x334   : > { %5833 = vst [vmem:[#allocation83_spill] sm:$0xff] %v4635_v30 }
 0x337   : > { %v4637_v51 = vpop.xlane.xlu1 %1047 }
 0x338   : > { %5834 = vst [vmem:[#allocation84_spill] sm:$0xff] %v4637_v51 }
 0x33b   : > { %v4639_v20 = vpop.xlane.xlu1 %1050 }
 0x33c   : > { %5835 = vst [vmem:[#allocation85_spill] sm:$0xff] %v4639_v20 }
 0x33f   : > { %v4641_v43 = vpop.xlane.xlu1 %1056 }
 0x340   : > { %5836 = vst [vmem:[#allocation86_spill] sm:$0xff] %v4641_v43 }
 0x343   : > { %v4643_v61 = vpop.xlane.xlu1 %1059 }
 0x344   : > { %5837 = vst [vmem:[#allocation87_spill] sm:$0xff] %v4643_v61 }
 0x347   : > { %v4645_v12 = vpop.xlane.xlu1 %1062 }
 0x348   : > { %5838 = vst [vmem:[#allocation88_spill] sm:$0xff] %v4645_v12 }
 0x34b   : > { %v4647_v35 = vpop.xlane.xlu1 %1065 }
 0x34c   : > { %5839 = vst [vmem:[#allocation89_spill] sm:$0xff] %v4647_v35 }
 0x34f   : > { %v4649_v39 = vpop.xlane.xlu1 %1068 }
 0x350   : > { %5840 = vst [vmem:[#allocation90_spill] sm:$0xff] %v4649_v39 }
 0x353   : > { %v4651_v46 = vpop.xlane.xlu1 %1071 }
 0x354   : > { %5841 = vst [vmem:[#allocation91_spill] sm:$0xff] %v4651_v46 }
 0x357   : > { %v4653_v47 = vpop.xlane.xlu1 %1074 }
 0x358   : > { %5842 = vst [vmem:[#allocation92_spill] sm:$0xff] %v4653_v47 }
 0x35b   : > { %v4657_v30 = vpop.xlane.xlu1 %1077 }
 0x35c   : > { %5844 = vst [vmem:[#allocation94_spill] sm:$0xff] %v4657_v30 }
 0x35f   : > { %v4655_v50 = vpop.xlane.xlu0 %1053  ;;  %v4661_v20 = vpop.xlane.xlu1 %1080 }
 0x360   : > { %5843 = vst [vmem:[#allocation93_spill] sm:$0xff] %v4655_v50  ;;  %5846 = vst [vmem:[#allocation96_spill] sm:$0xff] %v4661_v20 }
 0x363   : > { %v4659_v51 = vpop.xlane.xlu0 %1092  ;;  %v4665_v61 = vpop.xlane.xlu1 %1083 }
 0x364   : > { %5845 = vst [vmem:[#allocation95_spill] sm:$0xff] %v4659_v51  ;;  %5848 = vst [vmem:[#allocation98_spill] sm:$0xff] %v4665_v61 }
 0x367   : > { %v4663_v10 = vpop.xlane.xlu0 %1098  ;;  %v4667_v12 = vpop.xlane.xlu1 %1086 }
 0x368   : > { %5847 = vst [vmem:[#allocation97_spill] sm:$0xff] %v4663_v10  ;;  %5849 = vst [vmem:[#allocation99_spill] sm:$0xff] %v4667_v12 }
 0x36b   : > { %v4669_v35 = vpop.xlane.xlu1 %1089 }
 0x36c   : > { %5850 = vst [vmem:[#allocation100_spill] sm:$0xff] %v4669_v35 }
 0x36f   : > { %v4671_v39 = vpop.xlane.xlu1 %1095 }
 0x370   : > { %5851 = vst [vmem:[#allocation101_spill] sm:$0xff] %v4671_v39 }
 0x3c0   : > { %v3135_v46 = vpop.f32.mrb[0].mxu0 }
 0x3c1   : > { %v3136_v47 = vpop.f32.mrb[1].mxu0 }
 0x3c2   : > { %v3137_v5 = vadd.f32 %v3136_v47, %v3135_v46  }
 0x3c3 LB: >> { %5852 = vst [vmem:[#allocation102_spill] sm:$0xff] %v3817_v5  ;;  %v5853_v21 = vld [vmem:[#allocation19_spill] sm:$0xff]  ;;  %v5854_v32 = vld [vmem:[#allocation26_spill] sm:$0xff]  ;;  %3258 = vmatprep.subr.msk.mxu0 %vm587_vm2, %v3817_v5  ;;  %v1379_v46 = vmul.f32 %v3817_v5, %v3817_v5  ;;  %v5856_v38 = vld [vmem:[#allocation29_spill] sm:$0xff]  ;;  %vm1830_vm9 = vcmask 64512   ;;  %s1377_s24 = sadd.s32 1, %s3821_s24   ;;  %s3821_s24 = sphi %s4675_s24, %s1377_s24   ;;  %v3817_v5 = vphi %v3137_v5, %v5959_v5  }
 0x3c4   : >> { %3260 = vmatprep.mubr.msk.f32.mxu0 %vm587_vm2, %v5853_v21  ;;  %3341 = vmatprep.subr.bf16.mxu1 %v5854_v32  ;;  %v5855_v28 = vld [vmem:[#allocation23_spill] sm:$0xff]  ;;  %v5857_v40 = vld [vmem:[#allocation37_spill] sm:$0xff]  ;;  %v5858_v22 = vld [vmem:[#allocation20_spill] sm:$0xff]  ;;  %p1374_p4 = scmp.ge.s32.totalorder %s1377_s24, 20  }
 0x3c5   : >> { %3343 = vmatpush3.bf16.msra.mxu1 %v5855_v28  ;;  %3259 = vmatpush3.xpose.msk.msra.mxu0 %vm587_vm2, %v3817_v5  ;;  %v1380_v47 = vsel %vm587_vm2, %v1379_v46, 0.0  ;;  %v5859_v42 = vld [vmem:[#allocation38_spill] sm:$0xff]  ;;  %v5860_v9 = vld [vmem:[#allocation31_spill] sm:$0xff]  ;;  %v5861_v49 = vld [vmem:[#allocation41_spill] sm:$0xff]  ;;  %v5689_v46 = vmov 0  }
 0x3c6   : >> { %3345 = vmatprep.subr.bf16.mxu1 %v5856_v38  ;;  %1381 = vadd.xlane.f32.xlu0 %v1380_v47  ;;  %v5862_v52 = vld [vmem:[#allocation32_spill] sm:$0xff]  ;;  %v5863_v53 = vld [vmem:[#allocation42_spill] sm:$0xff]  ;;  %v5864_v24 = vld [vmem:[#allocation35_spill] sm:$0xff] }
 0x3c7   : >> { %v5865_v63 = vld [vmem:[#allocation47_spill] sm:$0xff]  ;;  %v5866_v37 = vld [vmem:[#allocation36_spill] sm:$0xff]  ;;  %v5869_v13 = vld [vmem:[#allocation53_spill] sm:$0xff]  ;;  %3546 = vset.pattern.permute.xlu1 %v5689_v46 }
 0x3c8   : >> { %3261 = vmatmul.mubr.msk.f32.vlgmr.msra.gmra.mrb[0].mxu0 %vm587_vm2, %v5858_v22  ;;  %v5867_v2 = vld [vmem:[#allocation48_spill] sm:$0xff]  ;;  %v5868_v54 = vld [vmem:[#allocation43_spill] sm:$0xff]  ;;  %v5871_v15 = vld [vmem:[#allocation54_spill] sm:$0xff] }
 0x3c9   : >> { %3347 = vmatpush3.bf16.msra.mxu1 %v5857_v40  ;;  %3263 = vmatprep.mubr.msk.f32.mxu0 %vm587_vm2, %v5860_v9  ;;  %v5870_v55 = vld [vmem:[#allocation44_spill] sm:$0xff]  ;;  %v5872_v3 = vld [vmem:[#allocation49_spill] sm:$0xff]  ;;  %v5873_v48 = vld [vmem:[#allocation59_spill] sm:$0xff] }
 0x3ca   : >> { %3349 = vmatprep.subr.bf16.mxu1 %v5859_v42  ;;  %v5874_v4 = vld [vmem:[#allocation50_spill] sm:$0xff]  ;;  %v5875_v56 = vld [vmem:[#allocation60_spill] sm:$0xff]  ;;  %v5876_v18 = vld [vmem:[#allocation55_spill] sm:$0xff] }
 0x3cb   : >> { %v5877_v11 = vld [vmem:[#allocation65_spill] sm:$0xff]  ;;  %v5878_v19 = vld [vmem:[#allocation56_spill] sm:$0xff]  ;;  %v5879_v14 = vld [vmem:[#allocation66_spill] sm:$0xff] }
 0x3cc   : >> { %3264 = vmatmul.mubr.msk.f32.gmra.mrb[2].mxu0 %vm587_vm2, %v5862_v52  ;;  %v5880_v57 = vld [vmem:[#allocation61_spill] sm:$0xff]  ;;  %v5881_v47 = vld [vmem:[#allocation30_spill] sm:$0xff]  ;;  %v5884_v23 = vld [vmem:[#allocation67_spill] sm:$0xff] }
 0x3cd   : >> { %3351 = vmatpush3.bf16.msra.mxu1 %v5861_v49  ;;  %3266 = vmatprep.mubr.msk.f32.mxu0 %vm587_vm2, %v5864_v24  ;;  %v5882_v41 = vld [vmem:[#allocation69_spill] sm:$0xff]  ;;  %v5883_v60 = vld [vmem:[#allocation62_spill] sm:$0xff]  ;;  %v5885_v25 = vld [vmem:[#allocation68_spill] sm:$0xff] }
 0x3ce   : >> { %3353 = vmatprep.subr.bf16.mxu1 %v5863_v53  ;;  %v5886_v26 = vld [vmem:[#allocation21_spill] sm:$0xff]  ;;  %v5887_v27 = vld [vmem:[#allocation22_spill] sm:$0xff]  ;;  %v5888_v33 = vld [vmem:[#allocation27_spill] sm:$0xff] }
 0x3cf   : >> { %v5889_v34 = vld [vmem:[#allocation28_spill] sm:$0xff]  ;;  %v5890_v16 = vld [vmem:[#allocation33_spill] sm:$0xff]  ;;  %v5891_v17 = vld [vmem:[#allocation34_spill] sm:$0xff] }
 0x3d0   : >> { %3267 = vmatmul.mubr.msk.f32.gmra.mrb[4].mxu0 %vm587_vm2, %v5866_v37  ;;  %v5892_v44 = vld [vmem:[#allocation39_spill] sm:$0xff]  ;;  %v5893_v45 = vld [vmem:[#allocation40_spill] sm:$0xff]  ;;  %v5894_v58 = vld [vmem:[#allocation45_spill] sm:$0xff] }
 0x3d1   : >> { %3355 = vmatpush3.bf16.msra.mxu1 %v5865_v63  ;;  %3269 = vmatprep.mubr.msk.f32.mxu0 %vm587_vm2, %v5868_v54  ;;  %v5895_v59 = vld [vmem:[#allocation46_spill] sm:$0xff]  ;;  %v5896_v7 = vld [vmem:[#allocation51_spill] sm:$0xff]  ;;  %v5897_v8 = vld [vmem:[#allocation52_spill] sm:$0xff] }
 0x3d2   : >> { %3357 = vmatprep.subr.bf16.mxu1 %v5867_v2  ;;  %v5898_v31 = vld [vmem:[#allocation57_spill] sm:$0xff]  ;;  %v5899_v36 = vld [vmem:[#allocation58_spill] sm:$0xff]  ;;  %v5900_v0 = vld [vmem:[#allocation63_spill] sm:$0xff] }
 0x3d3   : >> { %v5901_v1 = vld [vmem:[#allocation64_spill] sm:$0xff]  ;;  %v5904_v50 = vld [vmem:[#allocation93_spill] sm:$0xff]  ;;  %v5905_v62 = vld [vmem:[#allocation70_spill] sm:$0xff] }
 0x3d4   : >> { %3270 = vmatmul.mubr.msk.f32.gmra.mrb[6].mxu0 %vm587_vm2, %v5870_v55  ;;  %v5902_v29 = vld [vmem:[#allocation24_spill] sm:$0xff]  ;;  %v5906_v43 = vld [vmem:[#allocation86_spill] sm:$0xff]  ;;  %v5907_v39 = vld [vmem:[#allocation101_spill] sm:$0xff] }
 0x3d5   : >> { %3359 = vmatpush3.bf16.msra.mxu1 %v5869_v13  ;;  %3272 = vmatprep.mubr.msk.f32.mxu0 %vm587_vm2, %v5872_v3  ;;  %v5908_v6 = vld [vmem:[#allocation73_spill] sm:$0xff]  ;;  %v5926_v30 = vld [vmem:[#allocation94_spill] sm:$0xff]  ;;  %v5928_v20 = vld [vmem:[#allocation96_spill] sm:$0xff] }
 0x3d6   : >> { %3361 = vmatprep.subr.bf16.mxu1 %v5871_v15  ;;  %v5913_v10 = vld [vmem:[#allocation97_spill] sm:$0xff]  ;;  %v5930_v61 = vld [vmem:[#allocation98_spill] sm:$0xff]  ;;  %v5932_v12 = vld [vmem:[#allocation99_spill] sm:$0xff] }
 0x3d7   : >> { %v5934_v35 = vld [vmem:[#allocation100_spill] sm:$0xff]  ;;  %v5935_v51 = vld [vmem:[#allocation95_spill] sm:$0xff] }
 0x3d8   : >> { %3273 = vmatmul.mubr.msk.f32.gmra.mrb[8].mxu0 %vm587_vm2, %v5874_v4 }
 0x3d9   : >> { %3363 = vmatpush3.bf16.msra.mxu1 %v5873_v48  ;;  %3275 = vmatprep.mubr.msk.f32.mxu0 %vm587_vm2, %v5876_v18 }
 0x3da   : >> { %3365 = vmatprep.subr.bf16.mxu1 %v5875_v56 }
 0x3dc   : >> { %3276 = vmatmul.mubr.msk.f32.gmra.mrb[10].mxu0 %vm587_vm2, %v5878_v19  ;;  %1385 = vbcast.lane.b32.xlu0 %v5881_v47, 256 }
 0x3dd   : >> { %3367 = vmatpush3.bf16.msra.mxu1 %v5877_v11  ;;  %3278 = vmatprep.mubr.msk.f32.mxu0 %vm587_vm2, %v5880_v57 }
 0x3de   : >> { %3369 = vmatprep.subr.bf16.mxu1 %v5879_v14 }
 0x3e0   : >> { %3279 = vmatmul.mubr.msk.f32.gmra.mrb[12].mxu0 %vm587_vm2, %v5883_v60 }
 0x3e1   : >> { %3371 = vmatpush3.bf16.msra.mxu1 %v5882_v41  ;;  %3281 = vmatprep.mubr.msk.f32.mxu0 %vm587_vm2, %v5884_v23  ;;  %v5903_v41 = vld [vmem:[#allocation25_spill] sm:$0xff] }
 0x3e2   : >> { %v1783_v42 = vsub.s32 %v5903_v41, %v5902_v29 }
 0x3e4   : >> { %3282 = vmatmul.mubr.msk.f32.gmra.mrb[14].mxu0 %vm587_vm2, %v5885_v25 }
 0x3e5   : >> { %3284 = vmatprep.mubr.msk.f32.mxu0 %vm587_vm2, %v5886_v26 }
 0x3e8   : >> { %3285 = vmatmul.mubr.msk.f32.gmra.mrb[16].mxu0 %vm587_vm2, %v5887_v27 }
 0x3e9   : >> { %3287 = vmatprep.mubr.msk.f32.mxu0 %vm587_vm2, %v5888_v33 }
 0x3ec   : >> { %3288 = vmatmul.mubr.msk.f32.gmra.mrb[18].mxu0 %vm587_vm2, %v5889_v34 }
 0x3ed   : >> { %3290 = vmatprep.mubr.msk.f32.mxu0 %vm587_vm2, %v5890_v16 }
 0x3f0   : >> { %3291 = vmatmul.mubr.msk.f32.gmra.mrb[20].mxu0 %vm587_vm2, %v5891_v17 }
 0x3f1   : >> { %3293 = vmatprep.mubr.msk.f32.mxu0 %vm587_vm2, %v5892_v44 }
 0x3f4   : >> { %3294 = vmatmul.mubr.msk.f32.gmra.mrb[22].mxu0 %vm587_vm2, %v5893_v45 }
 0x3f5   : >> { %3296 = vmatprep.mubr.msk.f32.mxu0 %vm587_vm2, %v5894_v58 }
 0x3f8   : >> { %3297 = vmatmul.mubr.msk.f32.gmra.mrb[24].mxu0 %vm587_vm2, %v5895_v59 }
 0x3f9   : >> { %3299 = vmatprep.mubr.msk.f32.mxu0 %vm587_vm2, %v5896_v7 }
 0x3fc   : >> { %3300 = vmatmul.mubr.msk.f32.gmra.mrb[26].mxu0 %vm587_vm2, %v5897_v8 }
 0x3fd   : >> { %3302 = vmatprep.mubr.msk.f32.mxu0 %vm587_vm2, %v5898_v31 }
 0x400   : >> { %3303 = vmatmul.mubr.msk.f32.gmra.mrb[28].mxu0 %vm587_vm2, %v5899_v36 }
 0x401   : >> { %3305 = vmatprep.mubr.msk.f32.mxu0 %vm587_vm2, %v5900_v0 }
 0x404   : >> { %3306 = vmatmul.mubr.msk.f32.gmra.mrb[30].mxu0 %vm587_vm2, %v5901_v1 }
 0x453   : >> { %v1382_v47 = vpop.xlane.xlu0 %1381 }
 0x457   : >> { %v1386_v46 = vpop.permute.xlu0 %1385 }
 0x458   : >> { %v1388_v2 = vadd.f32 %v1386_v46, %v1382_v47 }
 0x45a   : >> { %1779 = vperm.xlu1 %3546, %v1388_v2  }
 0x49b   : >> { %v3262_v3 = vpop.f32.mrb[0].mxu0 }
 0x49c   : >> { %v1554_v4 = vpop.f32.mrb[1].mxu0 }
 0x49d   : >> { %v1713_v37 = vmul.f32 2.0, %v1554_v4  ;;  %v1714_v4 = vmul.f32 2.0, %v3262_v3 }
 0x49f   : >> { %v3265_v7 = vpop.f32.mrb[2].mxu0  ;;  %v1745_v53 = vsub.f32 %v5905_v62, %v1713_v37 }
 0x4a0   : >> { %v4772_v8 = vpop.f32.mrb[3].mxu0  ;;  %v1716_v44 = vmul.f32 2.0, %v3265_v7 }
 0x4a3   : >> { %v3268_v9 = vpop.f32.mrb[4].mxu0 }
 0x4a4   : >> { %v1574_v11 = vpop.f32.mrb[5].mxu0  ;;  %v1718_v3 = vmul.f32 2.0, %v3268_v9  ;;  %v1715_v9 = vmul.f32 2.0, %v4772_v8  ;;  %v5914_v8 = vld [vmem:[#allocation72_spill] sm:$0xff] }
 0x4a7   : >> { %v4774_v13 = vpop.f32.mrb[6].mxu0 }
 0x4a8   : >> { %v4776_v14 = vpop.f32.mrb[7].mxu0 }
 0x4ab   : >> { %v4778_v15 = vpop.f32.mrb[8].mxu0 }
 0x4ac   : >> { %v4780_v0 = vpop.f32.mrb[9].mxu0 }
 0x4af   : >> { %v4782_v1 = vpop.f32.mrb[10].mxu0 }
 0x4b0   : >> { %v4784_v16 = vpop.f32.mrb[11].mxu0 }
 0x4b3   : >> { %v4786_v2 = vpop.f32.mrb[12].mxu0 }
 0x4b4   : >> { %v4788_v46 = vpop.f32.mrb[13].mxu0 }
 0x4b7   : >> { %v4790_v47 = vpop.f32.mrb[14].mxu0 }
 0x4b8   : >> { %v4792_v17 = vpop.f32.mrb[15].mxu0 }
 0x4bb   : >> { %v3286_v18 = vpop.f32.mrb[16].mxu0 }
 0x4bc   : >> { %v1634_v19 = vpop.f32.mrb[17].mxu0  ;;  %v1730_v38 = vmul.f32 2.0, %v3286_v18  ;;  %v1748_v18 = vsub.f32 %v5908_v6, %v1716_v44 }
 0x4bd   : >> { %v1729_v36 = vmul.f32 2.0, %v1634_v19  ;;  %v1717_v19 = vmul.f32 2.0, %v1574_v11 }
 0x4be   : >> { %v1762_v54 = vsub.f32 %v5906_v43, %v1730_v38 }
 0x4bf   : >> { %v3289_v21 = vpop.f32.mrb[18].mxu0  ;;  %v1761_v48 = vsub.f32 %v5904_v50, %v1729_v36 }
 0x4c0   : >> { %v1644_v22 = vpop.f32.mrb[19].mxu0 }
 0x4c1   : >> { %v1731_v37 = vmul.f32 2.0, %v1644_v22  ;;  %v5911_v22 = vld [vmem:[#allocation87_spill] sm:$0xff] }
 0x4c3   : >> { %v4794_v23 = vpop.f32.mrb[20].mxu0  ;;  %v1763_v11 = vsub.f32 %v5911_v22, %v1731_v37  ;;  %v1732_v37 = vmul.f32 2.0, %v3289_v21  ;;  %v1720_v21 = vmul.f32 2.0, %v4774_v13 }
 0x4c4   : >> { %v4796_v24 = vpop.f32.mrb[21].mxu0 }
 0x4c5   : >> { %v1733_v22 = vmul.f32 2.0, %v4796_v24  ;;  %v1721_v24 = vmul.f32 2.0, %v4780_v0  ;;  %v1722_v0 = vmul.f32 2.0, %v4778_v15  ;;  %v5921_v15 = vld [vmem:[#allocation79_spill] sm:$0xff] }
 0x4c7   : >> { %v4798_v25 = vpop.f32.mrb[22].mxu0 }
 0x4c8   : >> { %v4800_v26 = vpop.f32.mrb[23].mxu0 }
 0x4cb   : >> { %v4802_v27 = vpop.f32.mrb[24].mxu0 }
 0x4cc   : >> { %v4804_v28 = vpop.f32.mrb[25].mxu0 }
 0x4cf   : >> { %v4806_v31 = vpop.f32.mrb[26].mxu0 }
 0x4d0   : >> { %v4808_v32 = vpop.f32.mrb[27].mxu0 }
 0x4d3   : >> { %v4810_v33 = vpop.f32.mrb[28].mxu0 }
 0x4d4   : >> { %v4812_v34 = vpop.f32.mrb[29].mxu0 }
 0x4d7   : >> { %v3307_v40 = vpop.f32.mrb[30].mxu0 }
 0x4d8   : >> { %v1704_v45 = vpop.f32.mrb[31].mxu0  ;;  %v1744_v6 = vmul.f32 2.0, %v3307_v40  ;;  %v1719_v40 = vmul.f32 2.0, %v4776_v14  ;;  %v5915_v14 = vld [vmem:[#allocation76_spill] sm:$0xff] }
 0x4d9   : >> { %v1743_v49 = vmul.f32 2.0, %v1704_v45  ;;  %v1780_v52 = vpop.permute.xlu1 %1779 }
 0x4da   : >> { %v4820_v56 = vrot.slane %v1780_v52, %v1783_v42 }
 0x4db   : >> { %v1775_v55 = vsub.f32 %v5907_v39, %v1743_v49  ;;  %v5909_v49 = vld [vmem:[#allocation71_spill] sm:$0xff] }
 0x4dc   : >> { %v4827_v36 = vadd.f32 %v4820_v56, %v1761_v48  ;;  %v4830_v45 = vadd.f32 %v4820_v56, %v1745_v53  ;;  %v4837_v42 = vadd.f32 %v4820_v56, %v1762_v54  ;;  %v4840_v44 = vadd.f32 %v4820_v56, %v1748_v18  ;;  %v5910_v53 = vld [vmem:[#allocation74_spill] sm:$0xff] }
 0x4dd   : >> { %v4824_v7 = vadd.f32 %v4820_v56, %v1775_v55  ;;  %v1746_v55 = vsub.f32 %v5909_v49, %v1714_v4  ;;  %v1749_v48 = vsub.f32 %v5910_v53, %v1717_v19  ;;  %v5912_v4 = vld [vmem:[#allocation75_spill] sm:$0xff]  ;;  %v5916_v53 = vld [vmem:[#allocation88_spill] sm:$0xff] }
 0x4de   : >> { %v1879_v38 = vsel %vm1830_vm9, %v4827_v36, inf  ;;  %v1831_v52 = vsel %vm1830_vm9, %v4830_v45, inf  ;;  %v1882_v29 = vsel %vm1830_vm9, %v4837_v42, inf  ;;  %v1840_v54 = vsel %vm1830_vm9, %v4840_v44, inf }
 0x4df   : >> { %1880 = vmin.xlane.f32.xlu1 %v1879_v38  ;;  %1832 = vmin.xlane.f32.xlu0 %v1831_v52  ;;  %v4850_v39 = vadd.f32 %v4820_v56, %v1746_v55  ;;  %v4853_v18 = vadd.f32 %v4820_v56, %v1749_v48  ;;  %v1750_v19 = vsub.f32 %v5912_v4, %v1718_v3 }
 0x4e0   : >> { %v1776_v38 = vsub.f32 %v5913_v10, %v1744_v6  ;;  %v4864_v55 = vadd.f32 %v4820_v56, %v1763_v11  ;;  %v1747_v3 = vsub.f32 %v5914_v8, %v1715_v9  ;;  %v1751_v6 = vsub.f32 %v5915_v14, %v1719_v40  ;;  %v5917_v9 = vld [vmem:[#allocation77_spill] sm:$0xff] }
 0x4e1   : >> { %v1834_v52 = vsel %vm1830_vm9, %v4850_v39, inf  ;;  %v1843_v49 = vsel %vm1830_vm9, %v4853_v18, inf  ;;  %v1764_v48 = vsub.f32 %v5916_v53, %v1732_v37  ;;  %v1752_v40 = vsub.f32 %v5917_v9, %v1720_v21  ;;  %v5919_v21 = vld [vmem:[#allocation78_spill] sm:$0xff] }
 0x4e2   : >> { %v1885_v11 = vsel %vm1830_vm9, %v4864_v55, inf  ;;  %v4885_v13 = vadd.f32 %v4820_v56, %v1751_v6  ;;  %v1734_v37 = vmul.f32 2.0, %v4794_v23  ;;  %v1753_v23 = vsub.f32 %v5919_v21, %v1721_v24  ;;  %v5920_v6 = vld [vmem:[#allocation90_spill] sm:$0xff] }
 0x4e3   : >> { %1883 = vmin.xlane.f32.xlu1 %v1882_v29  ;;  %1841 = vmin.xlane.f32.xlu0 %v1840_v54  ;;  %v4867_v29 = vadd.f32 %v4820_v56, %v1750_v19  ;;  %v4875_v54 = vadd.f32 %v4820_v56, %v1776_v38  ;;  %v4882_v19 = vadd.f32 %v4820_v56, %v1747_v3  ;;  %v5918_v38 = vld [vmem:[#allocation89_spill] sm:$0xff]  ;;  %v1723_v24 = vmul.f32 2.0, %v4784_v16 }
 0x4e4   : >> { %v1849_v8 = vsel %vm1830_vm9, %v4885_v13, inf  ;;  %v4896_v3 = vadd.f32 %v4820_v56, %v1764_v48  ;;  %v4899_v14 = vadd.f32 %v4820_v56, %v1752_v40  ;;  %v1766_v53 = vsub.f32 %v5920_v6, %v1734_v37  ;;  %v5922_v37 = vld [vmem:[#allocation91_spill] sm:$0xff] }
 0x4e5   : >> { %v1846_v4 = vsel %vm1830_vm9, %v4867_v29, inf  ;;  %v4913_v9 = vadd.f32 %v4820_v56, %v1753_v23  ;;  %v1754_v40 = vsub.f32 %v5921_v15, %v1722_v0  ;;  %v1724_v16 = vmul.f32 2.0, %v4782_v1  ;;  %v5923_v0 = vld [vmem:[#allocation80_spill] sm:$0xff]  ;;  %v5925_v1 = vld [vmem:[#allocation81_spill] sm:$0xff] }
 0x4e6   : >> { %v1852_v48 = vsel %vm1830_vm9, %v4899_v14, inf  ;;  %v5924_v23 = vld [vmem:[#allocation92_spill] sm:$0xff] }
 0x4e7   : >> { %1835 = vmin.xlane.f32.xlu1 %v1834_v52  ;;  %1844 = vmin.xlane.f32.xlu0 %v1843_v49  ;;  %v1765_v52 = vsub.f32 %v5918_v38, %v1733_v22  ;;  %v1837_v49 = vsel %vm1830_vm9, %v4882_v19, inf  ;;  %v1735_v22 = vmul.f32 2.0, %v4800_v26  ;;  %v1736_v26 = vmul.f32 2.0, %v4798_v25 }
 0x4e8   : >> { %v4927_v21 = vadd.f32 %v4820_v56, %v1754_v40  ;;  %v1755_v25 = vsub.f32 %v5923_v0, %v1723_v24  ;;  %v1756_v40 = vsub.f32 %v5925_v1, %v1724_v16  ;;  %v1725_v24 = vmul.f32 2.0, %v4788_v46  ;;  %v5927_v16 = vld [vmem:[#allocation82_spill] sm:$0xff] }
 0x4e9   : >> { %v1767_v38 = vsub.f32 %v5922_v37, %v1735_v22  ;;  %v1768_v6 = vsub.f32 %v5924_v23, %v1736_v26  ;;  %v1737_v22 = vmul.f32 2.0, %v4804_v28  ;;  %v1738_v28 = vmul.f32 2.0, %v4802_v27 }
 0x4ea   : >> { %v4941_v15 = vadd.f32 %v4820_v56, %v1755_v25  ;;  %v1726_v46 = vmul.f32 2.0, %v4786_v2  ;;  %v1757_v27 = vsub.f32 %v5927_v16, %v1725_v24  ;;  %v1739_v25 = vmul.f32 2.0, %v4808_v32  ;;  %v5929_v2 = vld [vmem:[#allocation83_spill] sm:$0xff] }
 0x4eb   : >> { %1886 = vmin.xlane.f32.xlu1 %v1885_v11  ;;  %1847 = vmin.xlane.f32.xlu0 %v1846_v4  ;;  %v1888_v11 = vsel %vm1830_vm9, %v4896_v3, inf  ;;  %v4910_v4 = vadd.f32 %v4820_v56, %v1765_v52  ;;  %v1855_v52 = vsel %vm1830_vm9, %v4913_v9, inf  ;;  %v1769_v26 = vsub.f32 %v5926_v30, %v1737_v22 }
 0x4ec   : >> { %v1770_v0 = vsub.f32 %v5928_v20, %v1738_v28  ;;  %v1727_v1 = vmul.f32 2.0, %v4792_v17  ;;  %v1740_v32 = vmul.f32 2.0, %v4806_v31  ;;  %v1728_v17 = vmul.f32 2.0, %v4790_v47  ;;  %v5933_v47 = vld [vmem:[#allocation85_spill] sm:$0xff] }
 0x4ed   : >> { %v4966_v22 = vadd.f32 %v4820_v56, %v1769_v26  ;;  %v1741_v16 = vmul.f32 2.0, %v4812_v34 }
 0x4ee   : >> { %v4980_v26 = vadd.f32 %v4820_v56, %v1770_v0 }
 0x4ef   : >> { %1838 = vmin.xlane.f32.xlu1 %v1837_v49  ;;  %1850 = vmin.xlane.f32.xlu0 %v1849_v8  ;;  %v1891_v49 = vsel %vm1830_vm9, %v4910_v4, inf  ;;  %v4924_v8 = vadd.f32 %v4820_v56, %v1766_v53  ;;  %v1858_v53 = vsel %vm1830_vm9, %v4927_v21, inf  ;;  %v1903_v24 = vsel %vm1830_vm9, %v4966_v22, inf }
 0x4f0   : >> { %v1773_v34 = vsub.f32 %v5934_v35, %v1741_v16  ;;  %v1924_v16 = vsel %vm1830_vm9, %v4875_v54, inf }
 0x4f3   : >> { %1889 = vmin.xlane.f32.xlu1 %v1888_v11  ;;  %1853 = vmin.xlane.f32.xlu0 %v1852_v48  ;;  %v1894_v11 = vsel %vm1830_vm9, %v4924_v8, inf  ;;  %v4938_v48 = vadd.f32 %v4820_v56, %v1767_v38  ;;  %v1861_v38 = vsel %vm1830_vm9, %v4941_v15, inf }
 0x4f5   : >> { %v1897_v37 = vsel %vm1830_vm9, %v4938_v48, inf }
 0x4f7   : >> { %1892 = vmin.xlane.f32.xlu1 %v1891_v49  ;;  %1856 = vmin.xlane.f32.xlu0 %v1855_v52  ;;  %v4952_v49 = vadd.f32 %v4820_v56, %v1768_v6  ;;  %v4955_v52 = vadd.f32 %v4820_v56, %v1756_v40  ;;  %v1771_v40 = vsub.f32 %v5930_v61, %v1739_v25 }
 0x4f9   : >> { %v1900_v23 = vsel %vm1830_vm9, %v4952_v49, inf  ;;  %v1864_v6 = vsel %vm1830_vm9, %v4955_v52, inf  ;;  %v4994_v25 = vadd.f32 %v4820_v56, %v1771_v40 }
 0x4fb   : >> { %1895 = vmin.xlane.f32.xlu1 %v1894_v11  ;;  %1859 = vmin.xlane.f32.xlu0 %v1858_v53  ;;  %v4969_v11 = vadd.f32 %v4820_v56, %v1757_v27  ;;  %v1758_v53 = vsub.f32 %v5929_v2, %v1726_v46  ;;  %v1772_v46 = vsub.f32 %v5932_v12, %v1740_v32  ;;  %v1906_v27 = vsel %vm1830_vm9, %v4980_v26, inf }
 0x4fc   : >> { %v1742_v2 = vmul.f32 2.0, %v4810_v33 }
 0x4fd   : >> { %v1867_v28 = vsel %vm1830_vm9, %v4969_v11, inf  ;;  %v5007_v32 = vadd.f32 %v4820_v56, %v1772_v46 }
 0x4ff   : >> { %1898 = vmin.xlane.f32.xlu1 %v1897_v37  ;;  %1862 = vmin.xlane.f32.xlu0 %v1861_v38  ;;  %v4983_v37 = vadd.f32 %v4820_v56, %v1758_v53  ;;  %v5931_v38 = vld [vmem:[#allocation84_spill] sm:$0xff]  ;;  %v1909_v53 = vsel %vm1830_vm9, %v4994_v25, inf  ;;  %v1912_v33 = vsel %vm1830_vm9, %v5007_v32, inf }
 0x500   : >> { %v1759_v31 = vsub.f32 %v5931_v38, %v1727_v1 }
 0x501   : >> { %v1870_v0 = vsel %vm1830_vm9, %v4983_v37, inf }
 0x503   : >> { %1901 = vmin.xlane.f32.xlu1 %v1900_v23  ;;  %1865 = vmin.xlane.f32.xlu0 %v1864_v6  ;;  %v4997_v23 = vadd.f32 %v4820_v56, %v1759_v31  ;;  %v1760_v6 = vsub.f32 %v5933_v47, %v1728_v17  ;;  %v5018_v17 = vadd.f32 %v4820_v56, %v1773_v34 }
 0x505   : >> { %v1873_v1 = vsel %vm1830_vm9, %v4997_v23, inf  ;;  %v5010_v40 = vadd.f32 %v4820_v56, %v1760_v6  ;;  %v1915_v38 = vsel %vm1830_vm9, %v5018_v17, inf }
 0x507   : >> { %1904 = vmin.xlane.f32.xlu1 %v1903_v24  ;;  %1868 = vmin.xlane.f32.xlu0 %v1867_v28  ;;  %v1774_v24 = vsub.f32 %v5935_v51, %v1742_v2  ;;  %v1876_v28 = vsel %vm1830_vm9, %v5010_v40, inf }
 0x509   : >> { %v5023_v31 = vadd.f32 %v4820_v56, %v1774_v24 }
 0x50b   : >> { %1907 = vmin.xlane.f32.xlu1 %v1906_v27  ;;  %1871 = vmin.xlane.f32.xlu0 %v1870_v0  ;;  %v1918_v46 = vsel %vm1830_vm9, %v5023_v31, inf  ;;  %v1921_v27 = vsel %vm1830_vm9, %v4824_v7, inf }
 0x50f   : >> { %1910 = vmin.xlane.f32.xlu1 %v1909_v53  ;;  %1874 = vmin.xlane.f32.xlu0 %v1873_v1 }
 0x513   : >> { %1913 = vmin.xlane.f32.xlu1 %v1912_v33  ;;  %1877 = vmin.xlane.f32.xlu0 %v1876_v28 }
 0x517   : >> { %1916 = vmin.xlane.f32.xlu1 %v1915_v38 }
 0x51b   : >> { %1919 = vmin.xlane.f32.xlu1 %v1918_v46 }
 0x51f   : >> { %1925 = vmin.xlane.f32.xlu1 %v1924_v16 }
 0x523   : >> { %1922 = vmin.xlane.f32.xlu1 %v1921_v27 }
 0x56c   : >> { %v1881_v0 = vpop.xlane.xlu1 %1880  ;;  %v1833_v47 = vpop.xlane.xlu0 %1832 }
 0x56d   : >> { %vm1943_vm10 = vcmp.le.f32.partialorder %v4827_v36, %v1881_v0  ;;  %vm1927_vm11 = vcmp.le.f32.partialorder %v4830_v45, %v1833_v47 }
 0x56e   : >> { %v1975_v56 = vsel %vm1943_vm10, %v5903_v41, 8  ;;  %v1959_v6 = vsel %vm1927_vm11, %v5903_v41, 8 }
 0x56f   : >> { %v5036_v2 = vsel %vm1830_vm9, %v1959_v6, 2147483647  ;;  %v5039_v34 = vsel %vm1830_vm9, %v1975_v56, 2147483647 }
 0x570   : >> { %v1884_v53 = vpop.xlane.xlu1 %1883  ;;  %v1842_v1 = vpop.xlane.xlu0 %1841  ;;  %v2233_v24 = vshra.s32 %v5039_v34, 16  ;;  %v1993_v33 = vshra.s32 %v5036_v2, 16 }
 0x571   : >> { %vm1944_vm12 = vcmp.le.f32.partialorder %v4837_v42, %v1884_v53  ;;  %vm1930_vm14 = vcmp.le.f32.partialorder %v4840_v44, %v1842_v1 }
 0x572   : >> { %v1976_v36 = vsel %vm1944_vm12, %v5903_v41, 8  ;;  %v5045_v45 = vcvt.s32.f32 %v2233_v24  ;;  %v5047_v28 = vcvt.s32.f32 %v1993_v33 }
 0x573   : >> { %v5050_v38 = vsel %vm1830_vm9, %v1976_v36, 2147483647  ;;  %v1962_v36 = vsel %vm1930_vm14, %v5903_v41, 8 }
 0x574   : >> { %2236 = vmin.xlane.f32.xlu1 %v5045_v45  ;;  %v1836_v46 = vpop.xlane.xlu1 %1835  ;;  %1996 = vmin.xlane.f32.xlu0 %v5047_v28  ;;  %v1845_v16 = vpop.xlane.xlu0 %1844  ;;  %v2248_v27 = vshra.s32 %v5050_v38, 16  ;;  %v5081_v1 = vsel %vm1830_vm9, %v1962_v36, 2147483647 }
 0x575   : >> { %vm1928_vm13 = vcmp.le.f32.partialorder %v4850_v39, %v1836_v46  ;;  %vm1931_vm0 = vcmp.le.f32.partialorder %v4853_v18, %v1845_v16  ;;  %v2038_v36 = vshra.s32 %v5081_v1, 16 }
 0x576   : >> { %v1960_v42 = vsel %vm1928_vm13, %v5903_v41, 8  ;;  %v5057_v0 = vcvt.s32.f32 %v2248_v27 }
 0x577   : >> { %v5060_v47 = vsel %vm1830_vm9, %v1960_v42, 2147483647 }
 0x578   : >> { %2251 = vmin.xlane.f32.xlu1 %v5057_v0  ;;  %v1887_v56 = vpop.xlane.xlu1 %1886  ;;  %v1848_v6 = vpop.xlane.xlu0 %1847  ;;  %v2008_v53 = vshra.s32 %v5060_v47, 16 }
 0x579   : >> { %vm1945_vm15 = vcmp.le.f32.partialorder %v4864_v55, %v1887_v56  ;;  %vm1932_vm3 = vcmp.le.f32.partialorder %v4867_v29, %v1848_v6 }
 0x57a   : >> { %v1977_v24 = vsel %vm1945_vm15, %v5903_v41, 8  ;;  %v5067_v39 = vcvt.s32.f32 %v2008_v53  ;;  %v1963_v53 = vsel %vm1931_vm0, %v5903_v41, 8 }
 0x57b   : >> { %v5070_v33 = vsel %vm1830_vm9, %v1977_v24, 2147483647 }
 0x57c   : >> { %v1839_v46 = vpop.xlane.xlu1 %1838  ;;  %2011 = vmin.xlane.f32.xlu0 %v5067_v39  ;;  %v1851_v27 = vpop.xlane.xlu0 %1850  ;;  %v2263_v42 = vshra.s32 %v5070_v33, 16 }
 0x57d   : >> { %vm1929_vm1 = vcmp.le.f32.partialorder %v4882_v19, %v1839_v46  ;;  %v5096_v46 = vsel %vm1830_vm9, %v1963_v53, 2147483647  ;;  %vm1933_vm5 = vcmp.le.f32.partialorder %v4885_v13, %v1851_v27  ;;  %v5109_v53 = vcvt.s32.f32 %v2038_v36 }
 0x57e   : >> { %v1961_v44 = vsel %vm1929_vm1, %v5903_v41, 8  ;;  %v5078_v55 = vcvt.s32.f32 %v2263_v42  ;;  %v1965_v30 = vsel %vm1933_vm5, %v5903_v41, 8 }
 0x57f   : >> { %v5084_v56 = vsel %vm1830_vm9, %v1961_v44, 2147483647  ;;  %v1964_v44 = vsel %vm1932_vm3, %v5903_v41, 8 }
 0x580   : >> { %2266 = vmin.xlane.f32.xlu1 %v5078_v55  ;;  %v1890_v24 = vpop.xlane.xlu1 %1889  ;;  %v1854_v10 = vpop.xlane.xlu0 %1853  ;;  %v2023_v18 = vshra.s32 %v5084_v56, 16 }
 0x581   : >> { %vm1946_vm4 = vcmp.le.f32.partialorder %v4896_v3, %v1890_v24  ;;  %vm1934_vm7 = vcmp.le.f32.partialorder %v4899_v14, %v1854_v10 }
 0x582   : >> { %v1978_v19 = vsel %vm1946_vm4, %v5903_v41, 8  ;;  %v5092_v16 = vcvt.s32.f32 %v2023_v18  ;;  %v2053_v18 = vshra.s32 %v5096_v46, 16  ;;  %v1966_v43 = vsel %vm1934_vm7, %v5903_v41, 8 }
 0x583   : >> { %v5099_v42 = vsel %vm1830_vm9, %v1978_v19, 2147483647  ;;  %v5113_v19 = vsel %vm1830_vm9, %v1964_v44, 2147483647 }
 0x584   : >> { %v1893_v12 = vpop.xlane.xlu1 %1892  ;;  %2026 = vmin.xlane.f32.xlu0 %v5092_v16  ;;  %v1857_v29 = vpop.xlane.xlu0 %1856  ;;  %v2278_v3 = vshra.s32 %v5099_v42, 16  ;;  %v5127_v44 = vcvt.s32.f32 %v2053_v18 }
 0x585   : >> { %vm1947_vm6 = vcmp.le.f32.partialorder %v4910_v4, %v1893_v12  ;;  %vm1935_vm10 = vcmp.le.f32.partialorder %v4913_v9, %v1857_v29 }
 0x586   : >> { %v1979_v6 = vsel %vm1947_vm6, %v5903_v41, 8  ;;  %v5107_v24 = vcvt.s32.f32 %v2278_v3  ;;  %v2068_v3 = vshra.s32 %v5113_v19, 16  ;;  %v1967_v51 = vsel %vm1935_vm10, %v5903_v41, 8 }
 0x587   : >> { %v5116_v20 = vsel %vm1830_vm9, %v1979_v6, 2147483647  ;;  %v5131_v6 = vsel %vm1830_vm9, %v1965_v30, 2147483647 }
 0x588   : >> { %2281 = vmin.xlane.f32.xlu1 %v5107_v24  ;;  %v1896_v13 = vpop.xlane.xlu1 %1895  ;;  %2041 = vmin.xlane.f32.xlu0 %v5109_v53  ;;  %v1860_v12 = vpop.xlane.xlu0 %1859  ;;  %v2293_v4 = vshra.s32 %v5116_v20, 16 }
 0x589   : >> { %vm1948_vm8 = vcmp.le.f32.partialorder %v4924_v8, %v1896_v13  ;;  %v5145_v13 = vcvt.s32.f32 %v2068_v3  ;;  %vm1936_vm12 = vcmp.le.f32.partialorder %v4927_v21, %v1860_v12 }
 0x58a   : >> { %v1980_v27 = vsel %vm1948_vm8, %v5903_v41, 8  ;;  %v5125_v36 = vcvt.s32.f32 %v2293_v4  ;;  %v2083_v4 = vshra.s32 %v5131_v6, 16  ;;  %v1968_v58 = vsel %vm1936_vm12, %v5903_v41, 8 }
 0x58b   : >> { %v5134_v35 = vsel %vm1830_vm9, %v1980_v27, 2147483647  ;;  %v5149_v27 = vsel %vm1830_vm9, %v1966_v43, 2147483647 }
 0x58c   : >> { %2296 = vmin.xlane.f32.xlu1 %v5125_v36  ;;  %v1899_v10 = vpop.xlane.xlu1 %1898  ;;  %2056 = vmin.xlane.f32.xlu0 %v5127_v44  ;;  %v1863_v14 = vpop.xlane.xlu0 %1862  ;;  %v2308_v8 = vshra.s32 %v5134_v35, 16 }
 0x58d   : >> { %vm1949_vm11 = vcmp.le.f32.partialorder %v4938_v48, %v1899_v10  ;;  %v5163_v10 = vcvt.s32.f32 %v2083_v4  ;;  %vm1937_vm14 = vcmp.le.f32.partialorder %v4941_v15, %v1863_v14 }
 0x58e   : >> { %v1981_v30 = vsel %vm1949_vm11, %v5903_v41, 8  ;;  %v5143_v18 = vcvt.s32.f32 %v2308_v8  ;;  %v2098_v8 = vshra.s32 %v5149_v27, 16  ;;  %v1969_v60 = vsel %vm1937_vm14, %v5903_v41, 8 }
 0x58f   : >> { %v5152_v50 = vsel %vm1830_vm9, %v1981_v30, 2147483647  ;;  %v5167_v30 = vsel %vm1830_vm9, %v1967_v51, 2147483647 }
 0x590   : >> { %2311 = vmin.xlane.f32.xlu1 %v5143_v18  ;;  %v1902_v9 = vpop.xlane.xlu1 %1901  ;;  %2071 = vmin.xlane.f32.xlu0 %v5145_v13  ;;  %v1866_v48 = vpop.xlane.xlu0 %1865  ;;  %v2323_v29 = vshra.s32 %v5152_v50, 16 }
 0x591   : >> { %vm1950_vm13 = vcmp.le.f32.partialorder %v4952_v49, %v1902_v9  ;;  %v5181_v9 = vcvt.s32.f32 %v2098_v8  ;;  %vm1938_vm0 = vcmp.le.f32.partialorder %v4955_v52, %v1866_v48 }
 0x592   : >> { %v1982_v43 = vsel %vm1950_vm13, %v5903_v41, 8  ;;  %v5161_v3 = vcvt.s32.f32 %v2323_v29  ;;  %v2113_v29 = vshra.s32 %v5167_v30, 16  ;;  %v1970_v62 = vsel %vm1938_vm0, %v5903_v41, 8 }
 0x593   : >> { %v5170_v57 = vsel %vm1830_vm9, %v1982_v43, 2147483647  ;;  %v5185_v43 = vsel %vm1830_vm9, %v1968_v58, 2147483647 }
 0x594   : >> { %2326 = vmin.xlane.f32.xlu1 %v5161_v3  ;;  %v1905_v21 = vpop.xlane.xlu1 %1904  ;;  %2086 = vmin.xlane.f32.xlu0 %v5163_v10  ;;  %v1869_v49 = vpop.xlane.xlu0 %1868  ;;  %v2338_v12 = vshra.s32 %v5170_v57, 16 }
 0x595   : >> { %vm1951_vm15 = vcmp.le.f32.partialorder %v4966_v22, %v1905_v21  ;;  %v5199_v21 = vcvt.s32.f32 %v2113_v29  ;;  %vm1939_vm3 = vcmp.le.f32.partialorder %v4969_v11, %v1869_v49 }
 0x596   : >> { %v1983_v51 = vsel %vm1951_vm15, %v5903_v41, 8  ;;  %v5179_v4 = vcvt.s32.f32 %v2338_v12  ;;  %v2128_v12 = vshra.s32 %v5185_v43, 16  ;;  %v1971_v63 = vsel %vm1939_vm3, %v5903_v41, 8 }
 0x597   : >> { %v5188_v59 = vsel %vm1830_vm9, %v1983_v51, 2147483647  ;;  %v5203_v51 = vsel %vm1830_vm9, %v1969_v60, 2147483647 }
 0x598   : >> { %2341 = vmin.xlane.f32.xlu1 %v5179_v4  ;;  %v1908_v15 = vpop.xlane.xlu1 %1907  ;;  %2101 = vmin.xlane.f32.xlu0 %v5181_v9  ;;  %v2353_v22 = vshra.s32 %v5188_v59, 16  ;;  %v1872_v58 = vpop.xlane.xlu0 %1871  ;;  %v5217_v29 = vcvt.s32.f32 %v2128_v12 }
 0x599   : >> { %vm1952_vm1 = vcmp.le.f32.partialorder %v4980_v26, %v1908_v15  ;;  %v2143_v15 = vshra.s32 %v5203_v51, 16  ;;  %vm1940_vm5 = vcmp.le.f32.partialorder %v4983_v37, %v1872_v58 }
 0x59a   : >> { %v1984_v14 = vsel %vm1952_vm1, %v5903_v41, 8  ;;  %v5197_v8 = vcvt.s32.f32 %v2353_v22  ;;  %5936 = vst [vmem:[#allocation103_spill] sm:$0xff] %v5217_v29  ;;  %v5221_v22 = vsel %vm1830_vm9, %v1970_v62, 2147483647 }
 0x59b   : >> { %v5206_v61 = vsel %vm1830_vm9, %v1984_v14, 2147483647  ;;  %v5235_v12 = vcvt.s32.f32 %v2143_v15 }
 0x59c   : >> { %2356 = vmin.xlane.f32.xlu1 %v5197_v8  ;;  %v1911_v52 = vpop.xlane.xlu1 %1910  ;;  %2116 = vmin.xlane.f32.xlu0 %v5199_v21  ;;  %v2368_v26 = vshra.s32 %v5206_v61, 16  ;;  %v1875_v5 = vpop.xlane.xlu0 %1874 }
 0x59d   : >> { %vm1953_vm4 = vcmp.le.f32.partialorder %v4994_v25, %v1911_v52  ;;  %5938 = vst [vmem:[#allocation105_spill] sm:$0xff] %v5235_v12  ;;  %v2158_v52 = vshra.s32 %v5221_v22, 16  ;;  %vm1941_vm7 = vcmp.le.f32.partialorder %v4997_v23, %v1875_v5 }
 0x59e   : >> { %v1985_v48 = vsel %vm1953_vm4, %v5903_v41, 8  ;;  %v5215_v60 = vcvt.s32.f32 %v2368_v26  ;;  %v5239_v26 = vsel %vm1830_vm9, %v1971_v63, 2147483647 }
 0x59f   : >> { %v5224_v14 = vsel %vm1830_vm9, %v1985_v48, 2147483647 }
 0x5a0   : >> { %2371 = vmin.xlane.f32.xlu1 %v5215_v60  ;;  %v1914_v11 = vpop.xlane.xlu1 %1913  ;;  %2131 = vmin.xlane.f32.xlu0 %v5217_v29  ;;  %v2383_v25 = vshra.s32 %v5224_v14, 16  ;;  %v1972_v29 = vsel %vm1940_vm5, %v5903_v41, 8  ;;  %v1878_v58 = vpop.xlane.xlu0 %1877 }
 0x5a1   : >> { %vm1954_vm6 = vcmp.le.f32.partialorder %v5007_v32, %v1914_v11  ;;  %v5253_v11 = vcvt.s32.f32 %v2158_v52  ;;  %vm1942_vm10 = vcmp.le.f32.partialorder %v5010_v40, %v1878_v58 }
 0x5a2   : >> { %v1986_v62 = vsel %vm1954_vm6, %v5903_v41, 8  ;;  %v5233_v49 = vcvt.s32.f32 %v2383_v25  ;;  %v2173_v25 = vshra.s32 %v5239_v26, 16 }
 0x5a3   : >> { %v5242_v48 = vsel %vm1830_vm9, %v1986_v62, 2147483647  ;;  %5939 = vst [vmem:[#allocation106_spill] sm:$0xff] %v5253_v11  ;;  %v5257_v62 = vsel %vm1830_vm9, %v1972_v29, 2147483647 }
 0x5a4   : >> { %5937 = vst [vmem:[#allocation104_spill] sm:$0xff] %v5233_v49  ;;  %2386 = vmin.xlane.f32.xlu1 %v5233_v49  ;;  %v1917_v37 = vpop.xlane.xlu1 %1916  ;;  %2146 = vmin.xlane.f32.xlu0 %v5235_v12  ;;  %v2398_v32 = vshra.s32 %v5242_v48, 16  ;;  %v1973_v49 = vsel %vm1941_vm7, %v5903_v41, 8  ;;  %v5271_v52 = vcvt.s32.f32 %v2173_v25 }
 0x5a5   : >> { %vm1955_vm8 = vcmp.le.f32.partialorder %v5018_v17, %v1917_v37  ;;  %v2188_v37 = vshra.s32 %v5257_v62, 16 }
 0x5a6   : >> { %v1987_v63 = vsel %vm1955_vm8, %v5903_v41, 8  ;;  %v5251_v15 = vcvt.s32.f32 %v2398_v32  ;;  %5940 = vst [vmem:[#allocation107_spill] sm:$0xff] %v5271_v52  ;;  %v5275_v32 = vsel %vm1830_vm9, %v1973_v49, 2147483647 }
 0x5a7   : >> { %v5260_v12 = vsel %vm1830_vm9, %v1987_v63, 2147483647  ;;  %v5288_v49 = vcvt.s32.f32 %v2188_v37 }
 0x5a8   : >> { %2401 = vmin.xlane.f32.xlu1 %v5251_v15  ;;  %v1920_v5 = vpop.xlane.xlu1 %1919  ;;  %2161 = vmin.xlane.f32.xlu0 %v5253_v11  ;;  %v2413_v23 = vshra.s32 %v5260_v12, 16  ;;  %v1974_v11 = vsel %vm1942_vm10, %v5903_v41, 8 }
 0x5a9   : >> { %vm1956_vm11 = vcmp.le.f32.partialorder %v5023_v31, %v1920_v5  ;;  %5942 = vst [vmem:[#allocation109_spill] sm:$0xff] %v5288_v49  ;;  %v2203_v5 = vshra.s32 %v5275_v32, 16 }
 0x5aa   : >> { %v1988_v17 = vsel %vm1956_vm11, %v5903_v41, 8  ;;  %v5269_v29 = vcvt.s32.f32 %v2413_v23  ;;  %v5292_v23 = vsel %vm1830_vm9, %v1974_v11, 2147483647 }
 0x5ab   : >> { %v5278_v63 = vsel %vm1830_vm9, %v1988_v17, 2147483647  ;;  %v2218_v11 = vshra.s32 %v5292_v23, 16 }
 0x5ac   : >> { %2416 = vmin.xlane.f32.xlu1 %v5269_v29  ;;  %v1926_v40 = vpop.xlane.xlu1 %1925  ;;  %2176 = vmin.xlane.f32.xlu0 %v5271_v52  ;;  %v2428_v31 = vshra.s32 %v5278_v63, 16 }
 0x5ad   : >> { %vm1958_vm12 = vcmp.le.f32.partialorder %v4875_v54, %v1926_v40 }
 0x5ae   : >> { %v1990_v58 = vsel %vm1958_vm12, %v5903_v41, 8  ;;  %v5286_v25 = vcvt.s32.f32 %v2428_v31  ;;  %v5304_v31 = vcvt.s32.f32 %v2203_v5  ;;  %v2232_v5 = vand.u32 65535, %v5039_v34 }
 0x5af   : >> { %v5295_v17 = vsel %vm1830_vm9, %v1990_v58, 2147483647 }
 0x5b0   : >> { %5941 = vst [vmem:[#allocation108_spill] sm:$0xff] %v5286_v25  ;;  %2431 = vmin.xlane.f32.xlu1 %v5286_v25  ;;  %v1923_v52 = vpop.xlane.xlu1 %1922  ;;  %2191 = vmin.xlane.f32.xlu0 %v5288_v49  ;;  %v2458_v54 = vshra.s32 %v5295_v17, 16  ;;  %5944 = vst [vmem:[#allocation111_spill] sm:$0xff] %v5304_v31 }
 0x5b1   : >> { %vm1957_vm13 = vcmp.le.f32.partialorder %v4824_v7, %v1923_v52  ;;  %v5315_v7 = vcvt.s32.f32 %v2218_v11  ;;  %v1992_v52 = vand.u32 65535, %v5036_v2  ;;  %v2007_v2 = vand.u32 65535, %v5060_v47 }
 0x5b2   : >> { %v1989_v37 = vsel %vm1957_vm13, %v5903_v41, 8  ;;  %v5302_v40 = vcvt.s32.f32 %v2458_v54  ;;  %v2234_v41 = vcvt.s32.f32 %v2232_v5 }
 0x5b3   : >> { %v5308_v58 = vsel %vm1830_vm9, %v1989_v37, 2147483647  ;;  %5945 = vst [vmem:[#allocation112_spill] sm:$0xff] %v5315_v7  ;;  %v2009_v5 = vcvt.s32.f32 %v2007_v2 }
 0x5b4   : >> { %5943 = vst [vmem:[#allocation110_spill] sm:$0xff] %v5302_v40  ;;  %2461 = vmin.xlane.f32.xlu1 %v5302_v40  ;;  %2206 = vmin.xlane.f32.xlu0 %v5304_v31  ;;  %v2443_v49 = vshra.s32 %v5308_v58, 16  ;;  %v1994_v31 = vcvt.s32.f32 %v1992_v52  ;;  %v2247_v40 = vand.u32 65535, %v5050_v38  ;;  %v2262_v38 = vand.u32 65535, %v5070_v33 }
 0x5b5   : >> { %v2037_v33 = vand.u32 65535, %v5081_v1 }
 0x5b6   : >> { %v5313_v25 = vcvt.s32.f32 %v2443_v49 }
 0x5b7   : >> { %v2039_v1 = vcvt.s32.f32 %v2037_v33 }
 0x5b8   : >> { %2446 = vmin.xlane.f32.xlu1 %v5313_v25  ;;  %2221 = vmin.xlane.f32.xlu0 %v5315_v7  ;;  %v2249_v7 = vcvt.s32.f32 %v2247_v40  ;;  %v2264_v40 = vcvt.s32.f32 %v2262_v38 }
 0x601   : >> { %v5321_v54 = vpop.xlane.xlu1 %2236  ;;  %v5323_v37 = vpop.xlane.xlu0 %1996 }
 0x602   : >> { %vm2238_vm9 = vcmp.eq.f32.partialorder %v5045_v45, %v5321_v54  ;;  %vm1998_vm14 = vcmp.eq.f32.partialorder %v5047_v28, %v5323_v37  ;;  %v2022_v28 = vand.u32 65535, %v5084_v56  ;;  %v2052_v56 = vand.u32 65535, %v5096_v46 }
 0x603   : >> { %v2239_v49 = vsel %vm2238_vm9, %v2234_v41, inf  ;;  %v1999_v11 = vsel %vm1998_vm14, %v1994_v31, inf  ;;  %v2277_v31 = vand.u32 65535, %v5099_v42  ;;  %v2067_v46 = vand.u32 65535, %v5113_v19 }
 0x604   : >> { %2240 = vmin.xlane.f32.xlu1 %v2239_v49  ;;  %2000 = vmin.xlane.f32.xlu0 %v1999_v11  ;;  %v2024_v49 = vcvt.s32.f32 %v2022_v28  ;;  %v2292_v11 = vand.u32 65535, %v5116_v20  ;;  %v2307_v20 = vand.u32 65535, %v5134_v35  ;;  %v2054_v28 = vcvt.s32.f32 %v2052_v56 }
 0x605   : >> { %v5331_v34 = vpop.xlane.xlu1 %2251  ;;  %v2082_v19 = vand.u32 65535, %v5131_v6  ;;  %v2322_v35 = vand.u32 65535, %v5152_v50  ;;  %v2097_v6 = vand.u32 65535, %v5149_v27  ;;  %v2337_v50 = vand.u32 65535, %v5170_v57 }
 0x606   : >> { %vm2253_vm15 = vcmp.eq.f32.partialorder %v5057_v0, %v5331_v34  ;;  %v2309_v33 = vcvt.s32.f32 %v2307_v20  ;;  %v2112_v27 = vand.u32 65535, %v5167_v30  ;;  %v2352_v57 = vand.u32 65535, %v5188_v59 }
 0x607   : >> { %v2254_v52 = vsel %vm2253_vm15, %v2249_v7, inf  ;;  %v2324_v56 = vcvt.s32.f32 %v2322_v35  ;;  %v2127_v30 = vand.u32 65535, %v5185_v43  ;;  %v2367_v59 = vand.u32 65535, %v5206_v61 }
 0x608   : >> { %2255 = vmin.xlane.f32.xlu1 %v2254_v52  ;;  %v2279_v52 = vcvt.s32.f32 %v2277_v31  ;;  %v2069_v31 = vcvt.s32.f32 %v2067_v46  ;;  %v2142_v43 = vand.u32 65535, %v5203_v51  ;;  %v2382_v61 = vand.u32 65535, %v5224_v14 }
 0x609   : >> { %v5336_v45 = vpop.xlane.xlu0 %2011  ;;  %v2129_v35 = vcvt.s32.f32 %v2127_v30  ;;  %v2157_v51 = vand.u32 65535, %v5221_v22  ;;  %v2397_v14 = vand.u32 65535, %v5242_v48  ;;  %v2172_v22 = vand.u32 65535, %v5239_v26 }
 0x60a   : >> { %vm2013_vm0 = vcmp.eq.f32.partialorder %v5067_v39, %v5336_v45  ;;  %v2412_v48 = vand.u32 65535, %v5260_v12  ;;  %v2187_v26 = vand.u32 65535, %v5257_v62  ;;  %v2427_v12 = vand.u32 65535, %v5278_v63 }
 0x60b   : >> { %v2014_v41 = vsel %vm2013_vm0, %v2009_v5, inf  ;;  %v2202_v62 = vand.u32 65535, %v5275_v32  ;;  %v2457_v63 = vand.u32 65535, %v5295_v17  ;;  %v2217_v32 = vand.u32 65535, %v5292_v23 }
 0x60c   : >> { %2015 = vmin.xlane.f32.xlu0 %v2014_v41  ;;  %v2294_v41 = vcvt.s32.f32 %v2292_v11  ;;  %v2084_v11 = vcvt.s32.f32 %v2082_v19  ;;  %v2369_v19 = vcvt.s32.f32 %v2367_v59  ;;  %v2414_v59 = vcvt.s32.f32 %v2412_v48  ;;  %v5955_v48 = vld [vmem:[#allocation112_spill] sm:$0xff] }
 0x60d   : >> { %v5341_v47 = vpop.xlane.xlu1 %2266  ;;  %v2442_v17 = vand.u32 65535, %v5308_v58  ;;  %v2219_v58 = vcvt.s32.f32 %v2217_v32 }
 0x60e   : >> { %vm2268_vm1 = vcmp.eq.f32.partialorder %v5078_v55, %v5341_v47 }
 0x60f   : >> { %v2269_v0 = vsel %vm2268_vm1, %v2264_v40, inf }
 0x610   : >> { %2270 = vmin.xlane.f32.xlu1 %v2269_v0 }
 0x611   : >> { %v5347_v7 = vpop.xlane.xlu0 %2026 }
 0x612   : >> { %vm2028_vm3 = vcmp.eq.f32.partialorder %v5092_v16, %v5347_v7 }
 0x613   : >> { %v2029_v39 = vsel %vm2028_vm3, %v2024_v49, inf }
 0x614   : >> { %2030 = vmin.xlane.f32.xlu0 %v2029_v39 }
 0x615   : >> { %v5353_v2 = vpop.xlane.xlu1 %2281  ;;  %v5355_v55 = vpop.xlane.xlu0 %2041 }
 0x616   : >> { %vm2283_vm4 = vcmp.eq.f32.partialorder %v5107_v24, %v5353_v2  ;;  %vm2043_vm5 = vcmp.eq.f32.partialorder %v5109_v53, %v5355_v55 }
 0x617   : >> { %v2284_v42 = vsel %vm2283_vm4, %v2279_v52, inf  ;;  %v2044_v16 = vsel %vm2043_vm5, %v2039_v1, inf }
 0x618   : >> { %2285 = vmin.xlane.f32.xlu1 %v2284_v42  ;;  %2045 = vmin.xlane.f32.xlu0 %v2044_v16  ;;  %v2339_v42 = vcvt.s32.f32 %v2337_v50  ;;  %v2099_v16 = vcvt.s32.f32 %v2097_v6  ;;  %v2144_v6 = vcvt.s32.f32 %v2142_v43  ;;  %v5947_v50 = vld [vmem:[#allocation104_spill] sm:$0xff] }
 0x619   : >> { %v5363_v38 = vpop.xlane.xlu1 %2296  ;;  %v5365_v5 = vpop.xlane.xlu0 %2056 }
 0x61a   : >> { %vm2298_vm6 = vcmp.eq.f32.partialorder %v5125_v36, %v5363_v38  ;;  %vm2058_vm7 = vcmp.eq.f32.partialorder %v5127_v44, %v5365_v5 }
 0x61b   : >> { %v2299_v24 = vsel %vm2298_vm6, %v2294_v41, inf  ;;  %v2059_v53 = vsel %vm2058_vm7, %v2054_v28, inf  ;;  %v2354_v41 = vcvt.s32.f32 %v2352_v57  ;;  %v2114_v28 = vcvt.s32.f32 %v2112_v27 }
 0x61c   : >> { %2300 = vmin.xlane.f32.xlu1 %v2299_v24  ;;  %2060 = vmin.xlane.f32.xlu0 %v2059_v53  ;;  %v2399_v27 = vcvt.s32.f32 %v2397_v14  ;;  %v2159_v57 = vcvt.s32.f32 %v2157_v51 }
 0x61d   : >> { %v5373_v40 = vpop.xlane.xlu1 %2311  ;;  %v5375_v0 = vpop.xlane.xlu0 %2071 }
 0x61e   : >> { %vm2313_vm8 = vcmp.eq.f32.partialorder %v5143_v18, %v5373_v40  ;;  %vm2073_vm10 = vcmp.eq.f32.partialorder %v5145_v13, %v5375_v0 }
 0x61f   : >> { %v2314_v36 = vsel %vm2313_vm8, %v2309_v33, inf  ;;  %v2074_v44 = vsel %vm2073_vm10, %v2069_v31, inf }
 0x620   : >> { %2315 = vmin.xlane.f32.xlu1 %v2314_v36  ;;  %2075 = vmin.xlane.f32.xlu0 %v2074_v44  ;;  %v2384_v44 = vcvt.s32.f32 %v2382_v61  ;;  %v2429_v61 = vcvt.s32.f32 %v2427_v12 }
 0x621   : >> { %v5383_v49 = vpop.xlane.xlu1 %2326  ;;  %v5385_v39 = vpop.xlane.xlu0 %2086 }
 0x622   : >> { %vm2328_vm11 = vcmp.eq.f32.partialorder %v5161_v3, %v5383_v49  ;;  %vm2088_vm12 = vcmp.eq.f32.partialorder %v5163_v10, %v5385_v39 }
 0x623   : >> { %v2329_v18 = vsel %vm2328_vm11, %v2324_v56, inf  ;;  %v2089_v13 = vsel %vm2088_vm12, %v2084_v11, inf }
 0x624   : >> { %2330 = vmin.xlane.f32.xlu1 %v2329_v18  ;;  %2090 = vmin.xlane.f32.xlu0 %v2089_v13 }
 0x625   : >> { %v5393_v52 = vpop.xlane.xlu1 %2341  ;;  %v5395_v1 = vpop.xlane.xlu0 %2101 }
 0x626   : >> { %vm2343_vm13 = vcmp.eq.f32.partialorder %v5179_v4, %v5393_v52  ;;  %vm2103_vm9 = vcmp.eq.f32.partialorder %v5181_v9, %v5395_v1 }
 0x627   : >> { %v2344_v3 = vsel %vm2343_vm13, %v2339_v42, inf  ;;  %v2104_v10 = vsel %vm2103_vm9, %v2099_v16, inf  ;;  %v5949_v42 = vld [vmem:[#allocation106_spill] sm:$0xff] }
 0x628   : >> { %2345 = vmin.xlane.f32.xlu1 %v2344_v3  ;;  %2105 = vmin.xlane.f32.xlu0 %v2104_v10 }
 0x629   : >> { %v5403_v46 = vpop.xlane.xlu1 %2356  ;;  %v5405_v20 = vpop.xlane.xlu0 %2116 }
 0x62a   : >> { %vm2358_vm14 = vcmp.eq.f32.partialorder %v5197_v8, %v5403_v46  ;;  %vm2118_vm15 = vcmp.eq.f32.partialorder %v5199_v21, %v5405_v20  ;;  %v5946_v8 = vld [vmem:[#allocation103_spill] sm:$0xff] }
 0x62b   : >> { %v2359_v4 = vsel %vm2358_vm14, %v2354_v41, inf  ;;  %v2119_v9 = vsel %vm2118_vm15, %v2114_v28, inf  ;;  %v2174_v41 = vcvt.s32.f32 %v2172_v22 }
 0x62c   : >> { %2360 = vmin.xlane.f32.xlu1 %v2359_v4  ;;  %2120 = vmin.xlane.f32.xlu0 %v2119_v9 }
 0x62d   : >> { %v5413_v24 = vpop.xlane.xlu1 %2371  ;;  %v5415_v53 = vpop.xlane.xlu0 %2131 }
 0x62e   : >> { %vm2373_vm0 = vcmp.eq.f32.partialorder %v5215_v60, %v5413_v24  ;;  %vm2133_vm1 = vcmp.eq.f32.partialorder %v5946_v8, %v5415_v53  ;;  %v5948_v60 = vld [vmem:[#allocation105_spill] sm:$0xff] }
 0x62f   : >> { %v2374_v21 = vsel %vm2373_vm0, %v2369_v19, inf  ;;  %v2134_v33 = vsel %vm2133_vm1, %v2129_v35, inf  ;;  %v2189_v19 = vcvt.s32.f32 %v2187_v26  ;;  %v5951_v35 = vld [vmem:[#allocation108_spill] sm:$0xff] }
 0x630   : >> { %2375 = vmin.xlane.f32.xlu1 %v2374_v21  ;;  %2135 = vmin.xlane.f32.xlu0 %v2134_v33  ;;  %v2459_v33 = vcvt.s32.f32 %v2457_v63 }
 0x631   : >> { %v5423_v31 = vpop.xlane.xlu1 %2386  ;;  %v5425_v36 = vpop.xlane.xlu0 %2146 }
 0x632   : >> { %vm2388_vm3 = vcmp.eq.f32.partialorder %v5947_v50, %v5423_v31  ;;  %vm2148_vm4 = vcmp.eq.f32.partialorder %v5948_v60, %v5425_v36  ;;  %v5954_v50 = vld [vmem:[#allocation111_spill] sm:$0xff] }
 0x633   : >> { %v2389_v56 = vsel %vm2388_vm3, %v2384_v44, inf  ;;  %v2149_v11 = vsel %vm2148_vm4, %v2144_v6, inf  ;;  %v2204_v44 = vcvt.s32.f32 %v2202_v62  ;;  %v5953_v6 = vld [vmem:[#allocation110_spill] sm:$0xff] }
 0x634   : >> { %2390 = vmin.xlane.f32.xlu1 %v2389_v56  ;;  %2150 = vmin.xlane.f32.xlu0 %v2149_v11  ;;  %v2444_v11 = vcvt.s32.f32 %v2442_v17 }
 0x635   : >> { %v5433_v18 = vpop.xlane.xlu1 %2401  ;;  %v5435_v13 = vpop.xlane.xlu0 %2161 }
 0x636   : >> { %vm2403_vm5 = vcmp.eq.f32.partialorder %v5251_v15, %v5433_v18  ;;  %vm2163_vm6 = vcmp.eq.f32.partialorder %v5949_v42, %v5435_v13  ;;  %v5950_v15 = vld [vmem:[#allocation107_spill] sm:$0xff]  ;;  %v2243_v42 = vcvt.f32.s32 %v5321_v54 }
 0x637   : >> { %v2404_v16 = vsel %vm2403_vm5, %v2399_v27, inf  ;;  %v2164_v3 = vsel %vm2163_vm6, %v2159_v57, inf }
 0x638   : >> { %2405 = vmin.xlane.f32.xlu1 %v2404_v16  ;;  %2165 = vmin.xlane.f32.xlu0 %v2164_v3  ;;  %v2003_v16 = vcvt.f32.s32 %v5323_v37  ;;  %v2258_v3 = vcvt.f32.s32 %v5331_v34  ;;  %v3831_v37 = vmov 0.0  }
 0x639   : >> { %v5443_v10 = vpop.xlane.xlu1 %2416  ;;  %v5445_v30 = vpop.xlane.xlu0 %2176 }
 0x63a   : >> { %vm2418_vm7 = vcmp.eq.f32.partialorder %v5269_v29, %v5443_v10  ;;  %vm2178_vm8 = vcmp.eq.f32.partialorder %v5950_v15, %v5445_v30  ;;  %v5952_v29 = vld [vmem:[#allocation109_spill] sm:$0xff]  ;;  %v2259_v62 = vshll.u32 %v2258_v3, 16 }
 0x63b   : >> { %v2419_v28 = vsel %vm2418_vm7, %v2414_v59, inf  ;;  %v2179_v4 = vsel %vm2178_vm8, %v2174_v41, inf  ;;  %v2244_v59 = vshll.u32 %v2243_v42, 16  ;;  %v2004_v41 = vshll.u32 %v2003_v16, 16 }
 0x63c   : >> { %2420 = vmin.xlane.f32.xlu1 %v2419_v28  ;;  %2180 = vmin.xlane.f32.xlu0 %v2179_v4  ;;  %v2048_v42 = vcvt.f32.s32 %v5355_v55 }
 0x63d   : >> { %v5453_v9 = vpop.xlane.xlu1 %2431  ;;  %v5455_v43 = vpop.xlane.xlu0 %2191 }
 0x63e   : >> { %vm2433_vm10 = vcmp.eq.f32.partialorder %v5951_v35, %v5453_v9  ;;  %vm2193_vm11 = vcmp.eq.f32.partialorder %v5952_v29, %v5455_v43 }
 0x63f   : >> { %v2434_v8 = vsel %vm2433_vm10, %v2429_v61, inf  ;;  %v2194_v21 = vsel %vm2193_vm11, %v2189_v19, inf  ;;  %v2018_v61 = vcvt.f32.s32 %v5336_v45  ;;  %v5956_v19 = vld [vmem:[#allocation25_spill] sm:$0xff] }
 0x640   : >> { %2435 = vmin.xlane.f32.xlu1 %v2434_v8  ;;  %2195 = vmin.xlane.f32.xlu0 %v2194_v21 }
 0x641   : >> { %v5463_v51 = vpop.xlane.xlu1 %2461  ;;  %v5465_v14 = vpop.xlane.xlu0 %2206  ;;  %v2019_v32 = vshll.u32 %v2018_v61, 16 }
 0x642   : >> { %vm2463_vm12 = vcmp.eq.f32.partialorder %v5953_v6, %v5463_v51  ;;  %vm2208_vm13 = vcmp.eq.f32.partialorder %v5954_v50, %v5465_v14  ;;  %v2033_v50 = vcvt.f32.s32 %v5347_v7 }
 0x643   : >> { %v2464_v60 = vsel %vm2463_vm12, %v2459_v33, inf  ;;  %v2209_v56 = vsel %vm2208_vm13, %v2204_v44, inf  ;;  %v2273_v33 = vcvt.f32.s32 %v5341_v47  ;;  %v2288_v47 = vcvt.f32.s32 %v5353_v2 }
 0x644   : >> { %2465 = vmin.xlane.f32.xlu1 %v2464_v60  ;;  %2210 = vmin.xlane.f32.xlu0 %v2209_v56 }
 0x645   : >> { %v5471_v23 = vpop.xlane.xlu1 %2446  ;;  %v5473_v22 = vpop.xlane.xlu0 %2221  ;;  %v2274_v6 = vshll.u32 %v2273_v33, 16  ;;  %v2289_v3 = vshll.u32 %v2288_v47, 16 }
 0x646   : >> { %vm2448_vm9 = vcmp.eq.f32.partialorder %v5313_v25, %v5471_v23  ;;  %vm2223_vm14 = vcmp.eq.f32.partialorder %v5955_v48, %v5473_v22 }
 0x647   : >> { %v2449_v27 = vsel %vm2448_vm9, %v2444_v11, inf  ;;  %v2224_v57 = vsel %vm2223_vm14, %v2219_v58, inf }
 0x648   : >> { %2450 = vmin.xlane.f32.xlu1 %v2449_v27  ;;  %2225 = vmin.xlane.f32.xlu0 %v2224_v57  ;;  %v2034_v57 = vshll.u32 %v2033_v50, 16 }
 0x691   : >> { %v2241_v26 = vpop.xlane.xlu1 %2240  ;;  %v2001_v12 = vpop.xlane.xlu0 %2000 }
 0x692   : >> { %v2242_v15 = vcvt.f32.s32 %v2241_v26  ;;  %v2002_v28 = vcvt.f32.s32 %v2001_v12  ;;  %v2303_v26 = vcvt.f32.s32 %v5363_v38  ;;  %v2063_v12 = vcvt.f32.s32 %v5365_v5 }
 0x693   : >> { %v2318_v38 = vcvt.f32.s32 %v5373_v40  ;;  %v2078_v5 = vcvt.f32.s32 %v5375_v0  ;;  %v2333_v0 = vcvt.f32.s32 %v5383_v49 }
 0x694   : >> { %v2245_v25 = vadd.s32 %v2244_v59, %v2242_v15  ;;  %v2005_v4 = vadd.s32 %v2004_v41, %v2002_v28  ;;  %v2049_v15 = vshll.u32 %v2048_v42, 16  ;;  %v2304_v61 = vshll.u32 %v2303_v26, 16 }
 0x695   : >> { %v2256_v63 = vpop.xlane.xlu1 %2255  ;;  %v2079_v40 = vshll.u32 %v2078_v5, 16  ;;  %v2334_v42 = vshll.u32 %v2333_v0, 16 }
 0x696   : >> { %vm2487_vm15 = vcmp.eq.s32.totalorder %v5956_v19, %v2245_v25  ;;  %vm2471_vm0 = vcmp.eq.s32.totalorder %v5956_v19, %v2005_v4  ;;  %v2257_v54 = vcvt.f32.s32 %v2256_v63 }
 0x697   : >> { %v3047_v34 = vsel %vm2487_vm15, 1.0, %v3831_v37  ;;  %v3031_v35 = vsel %vm2471_vm0, 1.0, %v3831_v37 }
 0x698   : >> { %v3547_v29 = vpack.i.bf16 %v3031_v35, %v3047_v34  ;;  %v2260_v8 = vadd.s32 %v2259_v62, %v2257_v54  ;;  %v2064_v54 = vshll.u32 %v2063_v12, 16 }
 0x699   : >> { %v2016_v21 = vpop.xlane.xlu0 %2015 }
 0x69a   : >> { %v2017_v17 = vcvt.f32.s32 %v2016_v21  ;;  %3548 = vxpose.xlu1.b32.start [1/16] (narrow) %v3547_v29, 8  ;;  %vm2488_vm1 = vcmp.eq.s32.totalorder %v5956_v19, %v2260_v8 }
 0x69b   : >> { %v3048_v56 = vsel %vm2488_vm1, 1.0, %v3831_v37 }
 0x69c   : >> { %v2020_v45 = vadd.s32 %v2019_v32, %v2017_v17 }
 0x69d   : >> { %v2271_v44 = vpop.xlane.xlu1 %2270 }
 0x69e   : >> { %vm2472_vm3 = vcmp.eq.s32.totalorder %v5956_v19, %v2020_v45  ;;  %v2272_v60 = vcvt.f32.s32 %v2271_v44  ;;  %v2319_v44 = vshll.u32 %v2318_v38, 16 }
 0x69f   : >> { %v3032_v11 = vsel %vm2472_vm3, 1.0, %v3831_v37 }
 0x6a0   : >> { %v3549_v58 = vpack.i.bf16 %v3032_v11, %v3048_v56  ;;  %v2275_v48 = vadd.s32 %v2274_v6, %v2272_v60  ;;  %v2093_v6 = vcvt.f32.s32 %v5385_v39  ;;  %v2348_v39 = vcvt.f32.s32 %v5393_v52 }
 0x6a1   : >> { %v2031_v27 = vpop.xlane.xlu0 %2030 }
 0x6a2   : >> { %v2032_v16 = vcvt.f32.s32 %v2031_v27  ;;  %3550 = vxpose.xlu1.b32.cont [2/16] (narrow) %v3549_v58, 8  ;;  %vm2489_vm4 = vcmp.eq.s32.totalorder %v5956_v19, %v2275_v48  ;;  %v2094_v49 = vshll.u32 %v2093_v6, 16 }
 0x6a3   : >> { %v3049_v25 = vsel %vm2489_vm4, 1.0, %v3831_v37 }
 0x6a4   : >> { %v2035_v7 = vadd.s32 %v2034_v57, %v2032_v16  ;;  %v2108_v16 = vcvt.f32.s32 %v5395_v1  ;;  %v2363_v1 = vcvt.f32.s32 %v5403_v46 }
 0x6a5   : >> { %v2286_v59 = vpop.xlane.xlu1 %2285  ;;  %v2046_v41 = vpop.xlane.xlu0 %2045 }
 0x6a6   : >> { %vm2473_vm5 = vcmp.eq.s32.totalorder %v5956_v19, %v2035_v7  ;;  %v2287_v2 = vcvt.f32.s32 %v2286_v59  ;;  %v2047_v28 = vcvt.f32.s32 %v2046_v41  ;;  %v2109_v52 = vshll.u32 %v2108_v16, 16 }
 0x6a7   : >> { %v3033_v55 = vsel %vm2473_vm5, 1.0, %v3831_v37  ;;  %v2168_v16 = vcvt.f32.s32 %v5435_v13  ;;  %v2423_v13 = vcvt.f32.s32 %v5443_v10 }
 0x6a8   : >> { %v3551_v4 = vpack.i.bf16 %v3033_v55, %v3049_v25  ;;  %v2290_v62 = vadd.s32 %v2289_v3, %v2287_v2  ;;  %v2050_v63 = vadd.s32 %v2049_v15, %v2047_v28  ;;  %v2349_v25 = vshll.u32 %v2348_v39, 16 }
 0x6a9   : >> { %v2301_v34 = vpop.xlane.xlu1 %2300  ;;  %v2061_v35 = vpop.xlane.xlu0 %2060  ;;  %v2123_v55 = vcvt.f32.s32 %v5405_v20  ;;  %v2378_v20 = vcvt.f32.s32 %v5413_v24 }
 0x6aa   : >> { %vm2490_vm6 = vcmp.eq.s32.totalorder %v5956_v19, %v2290_v62  ;;  %vm2474_vm7 = vcmp.eq.s32.totalorder %v5956_v19, %v2050_v63  ;;  %v2302_v29 = vcvt.f32.s32 %v2301_v34  ;;  %v2062_v8 = vcvt.f32.s32 %v2061_v35  ;;  %3552 = vxpose.xlu1.b32.cont [3/16] (narrow) %v3551_v4, 8 }
 0x6ab   : >> { %v3050_v21 = vsel %vm2490_vm6, 1.0, %v3831_v37  ;;  %v3034_v32 = vsel %vm2474_vm7, 1.0, %v3831_v37  ;;  %v2124_v46 = vshll.u32 %v2123_v55, 16 }
 0x6ac   : >> { %v3553_v33 = vpack.i.bf16 %v3034_v32, %v3050_v21  ;;  %v2305_v17 = vadd.s32 %v2304_v61, %v2302_v29  ;;  %v2065_v45 = vadd.s32 %v2064_v54, %v2062_v8  ;;  %v2364_v29 = vshll.u32 %v2363_v1, 16 }
 0x6ad   : >> { %v2316_v50 = vpop.xlane.xlu1 %2315  ;;  %v2076_v60 = vpop.xlane.xlu0 %2075  ;;  %v2138_v8 = vcvt.f32.s32 %v5415_v53  ;;  %v2393_v53 = vcvt.f32.s32 %v5423_v31 }
 0x6ae   : >> { %vm2491_vm8 = vcmp.eq.s32.totalorder %v5956_v19, %v2305_v17  ;;  %vm2475_vm10 = vcmp.eq.s32.totalorder %v5956_v19, %v2065_v45  ;;  %v2317_v56 = vcvt.f32.s32 %v2316_v50  ;;  %v2077_v11 = vcvt.f32.s32 %v2076_v60  ;;  %3554 = vxpose.xlu1.b32.cont [4/16] (narrow) %v3553_v33, 8 }
 0x6af   : >> { %v3051_v58 = vsel %vm2491_vm8, 1.0, %v3831_v37  ;;  %v3035_v48 = vsel %vm2475_vm10, 1.0, %v3831_v37  ;;  %v2379_v50 = vshll.u32 %v2378_v20, 16  ;;  %v2139_v24 = vshll.u32 %v2138_v8, 16 }
 0x6b0   : >> { %v3555_v47 = vpack.i.bf16 %v3035_v48, %v3051_v58  ;;  %v2320_v27 = vadd.s32 %v2319_v44, %v2317_v56  ;;  %v2080_v57 = vadd.s32 %v2079_v40, %v2077_v11  ;;  %v2153_v60 = vcvt.f32.s32 %v5425_v36 }
 0x6b1   : >> { %v2331_v7 = vpop.xlane.xlu1 %2330  ;;  %v2091_v3 = vpop.xlane.xlu0 %2090  ;;  %v2394_v39 = vshll.u32 %v2393_v53, 16  ;;  %v2408_v36 = vcvt.f32.s32 %v5433_v18  ;;  %v2169_v18 = vshll.u32 %v2168_v16, 16 }
 0x6b2   : >> { %vm2492_vm11 = vcmp.eq.s32.totalorder %v5956_v19, %v2320_v27  ;;  %vm2476_vm12 = vcmp.eq.s32.totalorder %v5956_v19, %v2080_v57  ;;  %v2332_v26 = vcvt.f32.s32 %v2331_v7  ;;  %v2092_v12 = vcvt.f32.s32 %v2091_v3  ;;  %3556 = vxpose.xlu1.b32.cont [5/16] (narrow) %v3555_v47, 8 }
 0x6b3   : >> { %v3052_v59 = vsel %vm2492_vm11, 1.0, %v3831_v37  ;;  %v3036_v41 = vsel %vm2476_vm12, 1.0, %v3831_v37  ;;  %v2154_v31 = vshll.u32 %v2153_v60, 16 }
 0x6b4   : >> { %v3557_v15 = vpack.i.bf16 %v3036_v41, %v3052_v59  ;;  %v2335_v2 = vadd.s32 %v2334_v42, %v2332_v26  ;;  %v2095_v28 = vadd.s32 %v2094_v49, %v2092_v12 }
 0x6b5   : >> { %v2346_v4 = vpop.xlane.xlu1 %2345  ;;  %v2106_v62 = vpop.xlane.xlu0 %2105 }
 0x6b6   : >> { %vm2493_vm13 = vcmp.eq.s32.totalorder %v5956_v19, %v2335_v2  ;;  %vm2477_vm9 = vcmp.eq.s32.totalorder %v5956_v19, %v2095_v28  ;;  %v2347_v63 = vcvt.f32.s32 %v2346_v4  ;;  %v2107_v61 = vcvt.f32.s32 %v2106_v62  ;;  %3558 = vxpose.xlu1.b32.cont [6/16] (narrow) %v3557_v15, 8 }
 0x6b7   : >> { %v3053_v54 = vsel %vm2493_vm13, 1.0, %v3831_v37  ;;  %v3037_v38 = vsel %vm2477_vm9, 1.0, %v3831_v37 }
 0x6b8   : >> { %v3559_v5 = vpack.i.bf16 %v3037_v38, %v3053_v54  ;;  %v2350_v34 = vadd.s32 %v2349_v25, %v2347_v63  ;;  %v2110_v35 = vadd.s32 %v2109_v52, %v2107_v61  ;;  %v2409_v25 = vshll.u32 %v2408_v36, 16 }
 0x6b9   : >> { %v2361_v21 = vpop.xlane.xlu1 %2360  ;;  %v2121_v32 = vpop.xlane.xlu0 %2120  ;;  %v2183_v52 = vcvt.f32.s32 %v5445_v30  ;;  %v2438_v30 = vcvt.f32.s32 %v5453_v9 }
 0x6ba   : >> { %vm2494_vm14 = vcmp.eq.s32.totalorder %v5956_v19, %v2350_v34  ;;  %vm2478_vm15 = vcmp.eq.s32.totalorder %v5956_v19, %v2110_v35  ;;  %v2362_v33 = vcvt.f32.s32 %v2361_v21  ;;  %v2122_v17 = vcvt.f32.s32 %v2121_v32  ;;  %3560 = vxpose.xlu1.b32.cont [7/16] (narrow) %v3559_v5, 8 }
 0x6bb   : >> { %v3054_v45 = vsel %vm2494_vm14, 1.0, %v3831_v37  ;;  %v3038_v44 = vsel %vm2478_vm15, 1.0, %v3831_v37  ;;  %v2424_v34 = vshll.u32 %v2423_v13, 16  ;;  %v2184_v10 = vshll.u32 %v2183_v52, 16 }
 0x6bc   : >> { %v3561_v40 = vpack.i.bf16 %v3038_v44, %v3054_v45  ;;  %v2365_v0 = vadd.s32 %v2364_v29, %v2362_v33  ;;  %v2125_v6 = vadd.s32 %v2124_v46, %v2122_v17  ;;  %v2198_v35 = vcvt.f32.s32 %v5455_v43 }
 0x6bd   : >> { %v2376_v56 = vpop.xlane.xlu1 %2375  ;;  %v2136_v11 = vpop.xlane.xlu0 %2135  ;;  %v2439_v44 = vshll.u32 %v2438_v30, 16  ;;  %v2213_v43 = vcvt.f32.s32 %v5465_v14  ;;  %v2453_v14 = vcvt.f32.s32 %v5471_v23 }
 0x6be   : >> { %vm2495_vm0 = vcmp.eq.s32.totalorder %v5956_v19, %v2365_v0  ;;  %vm2479_vm1 = vcmp.eq.s32.totalorder %v5956_v19, %v2125_v6  ;;  %v2377_v58 = vcvt.f32.s32 %v2376_v56  ;;  %v2137_v48 = vcvt.f32.s32 %v2136_v11  ;;  %3562 = vxpose.xlu1.b32.cont [8/16] (narrow) %v3561_v40, 8 }
 0x6bf   : >> { %v3055_v47 = vsel %vm2495_vm0, 1.0, %v3831_v37  ;;  %v3039_v27 = vsel %vm2479_vm1, 1.0, %v3831_v37  ;;  %v2199_v9 = vshll.u32 %v2198_v35, 16 }
 0x6c0   : >> { %v3563_v57 = vpack.i.bf16 %v3039_v27, %v3055_v47  ;;  %v2380_v42 = vadd.s32 %v2379_v50, %v2377_v58  ;;  %v2140_v49 = vadd.s32 %v2139_v24, %v2137_v48  ;;  %v2468_v58 = vcvt.f32.s32 %v5463_v51 }
 0x6c1   : >> { %v2391_v7 = vpop.xlane.xlu1 %2390  ;;  %v2151_v3 = vpop.xlane.xlu0 %2150  ;;  %v2214_v48 = vshll.u32 %v2213_v43, 16 }
 0x6c2   : >> { %vm2496_vm3 = vcmp.eq.s32.totalorder %v5956_v19, %v2380_v42  ;;  %vm2480_vm4 = vcmp.eq.s32.totalorder %v5956_v19, %v2140_v49  ;;  %v2392_v26 = vcvt.f32.s32 %v2391_v7  ;;  %v2152_v12 = vcvt.f32.s32 %v2151_v3  ;;  %3564 = vxpose.xlu1.b32.cont [9/16] (narrow) %v3563_v57, 8 }
 0x6c3   : >> { %v3056_v59 = vsel %vm2496_vm3, 1.0, %v3831_v37  ;;  %v3040_v41 = vsel %vm2480_vm4, 1.0, %v3831_v37  ;;  %v2228_v57 = vcvt.f32.s32 %v5473_v22  ;;  %v2469_v16 = vshll.u32 %v2468_v58, 16 }
 0x6c4   : >> { %v3565_v15 = vpack.i.bf16 %v3040_v41, %v3056_v59  ;;  %v2395_v2 = vadd.s32 %v2394_v39, %v2392_v26  ;;  %v2155_v28 = vadd.s32 %v2154_v31, %v2152_v12  ;;  %v2454_v3 = vshll.u32 %v2453_v14, 16 }
 0x6c5   : >> { %v2406_v1 = vpop.xlane.xlu1 %2405  ;;  %v2166_v55 = vpop.xlane.xlu0 %2165  ;;  %v2229_v26 = vshll.u32 %v2228_v57, 16 }
 0x6c6   : >> { %vm2497_vm5 = vcmp.eq.s32.totalorder %v5956_v19, %v2395_v2  ;;  %vm2481_vm6 = vcmp.eq.s32.totalorder %v5956_v19, %v2155_v28  ;;  %v2407_v4 = vcvt.f32.s32 %v2406_v1  ;;  %v2167_v62 = vcvt.f32.s32 %v2166_v55  ;;  %3566 = vxpose.xlu1.b32.cont [10/16] (narrow) %v3565_v15, 8 }
 0x6c7   : >> { %v3057_v63 = vsel %vm2497_vm5, 1.0, %v3831_v37  ;;  %v3041_v61 = vsel %vm2481_vm6, 1.0, %v3831_v37 }
 0x6c8   : >> { %v3567_v54 = vpack.i.bf16 %v3041_v61, %v3057_v63  ;;  %v2410_v38 = vadd.s32 %v2409_v25, %v2407_v4  ;;  %v2170_v5 = vadd.s32 %v2169_v18, %v2167_v62  ;;  %v3832_v62 = vmov 32  }
 0x6c9   : >> { %v2421_v29 = vpop.xlane.xlu1 %2420  ;;  %v2181_v46 = vpop.xlane.xlu0 %2180  ;;  %3584 = vset.pattern.permute.xlu0 %v3832_v62 }
 0x6ca   : >> { %vm2498_vm7 = vcmp.eq.s32.totalorder %v5956_v19, %v2410_v38  ;;  %vm2482_vm8 = vcmp.eq.s32.totalorder %v5956_v19, %v2170_v5  ;;  %v2422_v20 = vcvt.f32.s32 %v2421_v29  ;;  %v2182_v8 = vcvt.f32.s32 %v2181_v46  ;;  %3568 = vxpose.xlu1.b32.cont [11/16] (narrow) %v3567_v54, 8  ;;  %v5958_v29 = vld [vmem:[#allocation102_spill] sm:$0xff] }
 0x6cb   : >> { %v3058_v21 = vsel %vm2498_vm7, 1.0, %v3831_v37  ;;  %v3042_v32 = vsel %vm2482_vm8, 1.0, %v3831_v37  ;;  %v5957_v5 = vmov 0  }
 0x6cc   : >> { %v3569_v33 = vpack.i.bf16 %v3042_v32, %v3058_v21  ;;  %v2425_v17 = vadd.s32 %v2424_v34, %v2422_v20  ;;  %v2185_v45 = vadd.s32 %v2184_v10, %v2182_v8 }
 0x6cd   : >> { %v2436_v40 = vpop.xlane.xlu1 %2435  ;;  %v2196_v0 = vpop.xlane.xlu0 %2195 }
 0x6ce   : >> { %vm2499_vm10 = vcmp.eq.s32.totalorder %v5956_v19, %v2425_v17  ;;  %vm2483_vm11 = vcmp.eq.s32.totalorder %v5956_v19, %v2185_v45  ;;  %v2437_v6 = vcvt.f32.s32 %v2436_v40  ;;  %v2197_v50 = vcvt.f32.s32 %v2196_v0  ;;  %3570 = vxpose.xlu1.b32.cont [12/16] (narrow) %v3569_v33, 8 }
 0x6cf   : >> { %v3059_v24 = vsel %vm2499_vm10, 1.0, %v3831_v37  ;;  %v3043_v53 = vsel %vm2483_vm11, 1.0, %v3831_v37 }
 0x6d0   : >> { %v3571_v60 = vpack.i.bf16 %v3043_v53, %v3059_v24  ;;  %v2440_v56 = vadd.s32 %v2439_v44, %v2437_v6  ;;  %v2200_v11 = vadd.s32 %v2199_v9, %v2197_v50 }
 0x6d1   : >> { %v2466_v47 = vpop.xlane.xlu1 %2465  ;;  %v2211_v27 = vpop.xlane.xlu0 %2210 }
 0x6d2   : >> { %vm2500_vm12 = vcmp.eq.s32.totalorder %v5956_v19, %v2440_v56  ;;  %vm2484_vm13 = vcmp.eq.s32.totalorder %v5956_v19, %v2200_v11  ;;  %v2212_v42 = vcvt.f32.s32 %v2211_v27  ;;  %3572 = vxpose.xlu1.b32.cont [13/16] (narrow) %v3571_v60, 8  ;;  %v2467_v36 = vcvt.f32.s32 %v2466_v47 }
 0x6d3   : >> { %v3060_v49 = vsel %vm2500_vm12, 1.0, %v3831_v37  ;;  %v3044_v39 = vsel %vm2484_vm13, 1.0, %v3831_v37 }
 0x6d4   : >> { %v3573_v31 = vpack.i.bf16 %v3044_v39, %v3060_v49  ;;  %v2215_v51 = vadd.s32 %v2214_v48, %v2212_v42  ;;  %v2470_v59 = vadd.s32 %v2469_v16, %v2467_v36 }
 0x6d5   : >> { %v2451_v7 = vpop.xlane.xlu1 %2450  ;;  %v2226_v23 = vpop.xlane.xlu0 %2225 }
 0x6d6   : >> { %v2452_v12 = vcvt.f32.s32 %v2451_v7  ;;  %v2227_v22 = vcvt.f32.s32 %v2226_v23  ;;  %3574 = vxpose.xlu1.b32.cont [14/16] (narrow) %v3573_v31, 8  ;;  %vm2485_vm9 = vcmp.eq.s32.totalorder %v5956_v19, %v2215_v51  ;;  %vm2502_vm0 = vcmp.eq.s32.totalorder %v5956_v19, %v2470_v59 }
 0x6d7   : >> { %v3045_v2 = vsel %vm2485_vm9, 1.0, %v3831_v37  ;;  %v3062_v13 = vsel %vm2502_vm0, 1.0, %v3831_v37 }
 0x6d8   : >> { %v2455_v41 = vadd.s32 %v2454_v3, %v2452_v12  ;;  %v2230_v15 = vadd.s32 %v2229_v26, %v2227_v22 }
 0x6da   : >> { %vm2501_vm14 = vcmp.eq.s32.totalorder %v5956_v19, %v2455_v41  ;;  %vm2486_vm15 = vcmp.eq.s32.totalorder %v5956_v19, %v2230_v15 }
 0x6db   : >> { %v3061_v28 = vsel %vm2501_vm14, 1.0, %v3831_v37  ;;  %v3046_v18 = vsel %vm2486_vm15, 1.0, %v3831_v37 }
 0x6dc   : >> { %v3575_v25 = vpack.i.bf16 %v3045_v2, %v3061_v28  ;;  %v3577_v52 = vpack.i.bf16 %v3046_v18, %v3062_v13 }
 0x6de   : >> { %3576 = vxpose.xlu1.b32.cont [15/16] (narrow) %v3575_v25, 8 }
 0x6e2   : >> { %3578 = vxpose.xlu1.b32.end [16/16] (narrow) %v3577_v52, 8 }
 0x726   : >> { %v3579_v1 = vpop.trf.xlu1 }
 0x727   : >> { %v3583_v55 = vunpack.i.h.bf16 %v3579_v1  ;;  %v3580_v4 = vunpack.i.l.bf16 %v3579_v1 }
 0x729   : >> { %2695 = vmatprep.mubr.f32.mxu1 %v3580_v4 }
 0x72a   : >> { %2696 = vmatmul.mubr.f32.vlgmr.msra.gmra.mrb[0].mxu1 %v3583_v55 }
 0x7fd   : >> { %v3203_v63 = vpop.f32.mrb[0].mxu1 }
 0x7fe   : >> { %v3204_v61 = vpop.f32.mrb[1].mxu1 }
 0x7ff   : >> { %v3205_v54 = vadd.f32 %v3204_v61, %v3203_v63 }
 0x801   : >> { %v2701_v38 = vmax.f32 %v3205_v54, 1.0  ;;  %vm2709_vm1 = vcmp.gt.f32.partialorder %v3205_v54, 0.0 }
 0x802   : >> { %v2710_v34 = vsel %vm2709_vm1, 1, %v5957_v5 }
 0x803   : >> { %2704 = vperm.xlu0 %3584, %v2701_v38  }
 0x807   : >> { %2712 = vperm.xlu0 %3584, %v2710_v34  }
 0x882   : >> { %v2705_v10 = vpop.permute.xlu0 %2704 }
 0x883   : >> { %3585 = vrcp.f32 %v2705_v10 }
 0x886   : >> { %v2713_v37 = vpop.permute.xlu0 %2712 }
 0x887   : >> { %vm2714_vm3 = vcmp.eq.s32.totalorder %v2713_v37, 1 }
 0x88b   : > { %1376 = sbr.rel (!%p1374_p4) target bundleno = 963 (0x3c3), region = 134 }
 0x88d   : >> { %v3586_v30 = vpop.eup %3585 }
 0x88e   : >> { %v2708_v35 = vmul.f32 %v3586_v30, %v3205_v54 }
 0x890   : >> { %v2715_v46 = vsel %vm2714_vm3, %v2708_v35, %v5958_v29  }
 0x891   : >> { %v5959_v5 = vmov %v2715_v46  ;;  %2716 = vst.msk [vmem:[%s4245_s12] sm:$0xff] (%p1374_p4), %vm587_vm2, %v2715_v46 }
 0x892 PF: > { %s3065_s17 = sshll.u32 %s3801_s25, 5  ;;  %s2736_s27 = sshll.u32 %s4241_s7, 4  ;;  %s2737_s27 = int_to_ptr.vmem [resolvable:$true] %s2736_s27 }
 0x893   : > { %s5588_s26 = scalar_lea.hbm %s5675_s4, %s3065_s17  ;;  %s2718_s16 = scalar_lea.sflag [#allocation5], %s4080_s13 }
 0x894   : > { %s3647_s30 = scalar_lea.vmem %s2737_s27, 32  ;;  %p5960_p10 = scmp.ne.s32.totalorder %s5762_s6, 0 }
 0x895   : > { %p3648_p7 = scmp.ne.s32.totalorder %s2737_s27, %s3647_s30  ;;  %s3833_s0 = smov [#allocation8]  }
 0x896   : > { %s3651_s29 = sshll.u32 %s3833_s0, 4  ;;  %s3652_s29 = int_to_ptr.vmem [resolvable:$false] %s3651_s29 }
 0x897   : > { %p3649_p1 = pnand %p3648_p7, %p5960_p10  ;;  %s3653_s21 = scalar_lea.vmem %s3652_s29, 64 }
 0x898   : > { %p3654_p9 = scmp.lt.s32.totalorder %s2737_s27, %s3652_s29  ;;  %p3655_p11 = scmp.lt.s32.totalorder %s3653_s21, %s3647_s30 }
 0x899   : > { %p3650_p3 = pneg %p3649_p1 }
 0x89a   : > { %p3656_p12 = por %p3655_p11, %p3654_p9 }
 0x89c   : > { %p3657_p13 = pnand %p3656_p12, %p3650_p3 }
 0x89e   : > { %3660 = shalt.err (!%p3657_p13)
}
 0x89f   : > { %s3661_s7 = scalar_lea.hbm %s5588_s26, 32  ;;  %s3665_s17 = scalar_lea.hbm %s5675_s4, 64 }
 0x8a0   : > { %p3662_p6 = scmp.ne.s32.totalorder %s5588_s26, %s3661_s7  ;;  %p3666_p2 = scmp.lt.u32.totalorder %s5588_s26, %s5675_s4 }
 0x8a1   : > { %p3667_p0 = scmp.lt.u32.totalorder %s3665_s17, %s3661_s7  ;;  %p3669_p7 = scmp.lt.u32.totalorder %s3661_s7, %s5588_s26 }
 0x8a2   : > { %p3663_p8 = pnand %p3662_p6, %p5960_p10 }
 0x8a3   : > { %p3668_p4 = por %p3667_p0, %p3666_p2 }
 0x8a4   : > { %p3664_p5 = pneg %p3663_p8 }
 0x8a5   : > { %p3670_p1 = por %p3669_p7, %p3668_p4 }
 0x8a7   : > { %p3671_p3 = pnand %p3670_p1, %p3664_p5 }
 0x8a9   : > { %3674 = shalt.err (!%p3671_p3)
}
 0x8aa   : > { %3376 = dma.vmem_to_hbm [thread:$0]  (%p5960_p10), %s2737_s27, 32, %s5588_s26, %s2718_s16  }
 0x8ab   : > { %s3066_s30 = sshll.u32 %s3801_s25, 7  ;;  %s2749_s0 = sshll.u32 %s4245_s12, 4  ;;  %s2750_s0 = int_to_ptr.vmem [resolvable:$true] %s2749_s0 }
 0x8ac   : > { %s5614_s10 = scalar_lea.hbm %s5676_s5, %s3066_s30  ;;  %s2723_s7 = scalar_lea.sflag [#allocation10], %s4080_s13 }
 0x8ad   : > { %s3675_s24 = scalar_lea.vmem %s2750_s0, 128  ;;  %s3834_s17 = smov [#allocation9]  }
 0x8ae   : > { %p3676_p9 = scmp.ne.s32.totalorder %s2750_s0, %s3675_s24  ;;  %s3679_s8 = sshll.u32 %s3834_s17, 4  ;;  %s3680_s8 = int_to_ptr.vmem [resolvable:$false] %s3679_s8 }
 0x8af   : > { %s3681_s9 = scalar_lea.vmem %s3680_s8, 256  ;;  %p3682_p13 = scmp.lt.s32.totalorder %s2750_s0, %s3680_s8 }
 0x8b0   : > { %p3677_p11 = pnand %p3676_p9, %p5960_p10  ;;  %p3683_p6 = scmp.lt.s32.totalorder %s3681_s9, %s3675_s24 }
 0x8b2   : > { %p3678_p12 = pneg %p3677_p11  ;;  %p3684_p8 = por %p3683_p6, %p3682_p13 }
 0x8b4   : > { %p3685_p5 = pnand %p3684_p8, %p3678_p12 }
 0x8b6   : > { %3688 = shalt.err (!%p3685_p5)
}
 0x8b7   : > { %s3689_s25 = scalar_lea.hbm %s5614_s10, 128  ;;  %s3693_s26 = scalar_lea.hbm %s5676_s5, 256 }
 0x8b8   : > { %p3690_p2 = scmp.ne.s32.totalorder %s5614_s10, %s3689_s25  ;;  %p3694_p7 = scmp.lt.u32.totalorder %s5614_s10, %s5676_s5 }
 0x8b9   : > { %p3695_p1 = scmp.lt.u32.totalorder %s3693_s26, %s3689_s25  ;;  %p3697_p9 = scmp.lt.u32.totalorder %s3689_s25, %s5614_s10 }
 0x8ba   : > { %p3691_p0 = pnand %p3690_p2, %p5960_p10 }
 0x8bb   : > { %p3696_p3 = por %p3695_p1, %p3694_p7 }
 0x8bc   : > { %p3692_p4 = pneg %p3691_p0 }
 0x8bd   : > { %p3698_p11 = por %p3697_p9, %p3696_p3 }
 0x8bf   : > { %p3699_p12 = pnand %p3698_p11, %p3692_p4 }
 0x8c1   : > { %3702 = shalt.err (!%p3699_p12)
}
 0x8c2   : > { %3377 = dma.vmem_to_hbm [thread:$0]  (%p5960_p10), %s2750_s0, 128, %s5614_s10, %s2723_s7  }
 0x8c3 PF: > { %p3395_p13 = scmp.ge.s32.totalorder %s3813_s28, 2  ;;  %s2761_s30 = sand.u32 1, %s3773_s18  }
 0x8c4   : > { %p5961_p6 = scmp.ne.s32.totalorder %s5763_s11, 0  ;;  %s2762_s29 = scalar_lea.sflag [#allocation5], %s2761_s30 }
 0x8c6   : > { %p3388_p8 = pnand %p3395_p13, %p5961_p6 }
 0x8c8   : > { %3764 = dma.done.wait (!%p3388_p8), %s2762_s29, 32  }
 0x8c9   : > { %3766 = vsyncadd (!%p3388_p8), %s2762_s29, 4294967264  ;;  %s2771_s21 = scalar_lea.sflag [#allocation10], %s2761_s30 }
 0x8ca   : > { %3768 = dma.done.wait (!%p3388_p8), %s2771_s21, 128  }
 0x8cb   : > { %3770 = vsyncadd (!%p3388_p8), %s2771_s21, 4294967168  ;;  %s28_s28 = sadd.s32 1, %s3813_s28   ;;  %s5962_s24 = sld [smem:[#allocation15_spill]] }
 0x8cc   : > { %p25_p5 = scmp.ge.s32.totalorder %s28_s28, 6   ;;  %s5963_s25 = sld [smem:[#allocation16_spill]] }
 0x8cd   : > { %s5964_s26 = sld [smem:[#allocation17_spill]]  ;;  %s5965_s27 = sld [smem:[#allocation18_spill]] }
 0x8ce   : > { %s5966_s18 = smov %s3777_s19  ;;  %s5967_s19 = smov %s3781_s20 }
 0x8cf   : > { %s5968_s20 = smov %s4014_s15  ;;  %s5969_s21 = smov %s3789_s22 }
 0x8d0   : > { %s5970_s22 = smov %s3793_s23  ;;  %s5971_s23 = smov %s4004_s14 }
 0x8d1   :  { %27 = sbr.rel (!%p25_p5) target bundleno = 15 (0xf), region = 145 }
 0x8d8   :  { %2776 = vsyncpa [#allocation4], 1 }
 0x8d9   :  { %2778 = vsyncpa [#allocation4 + $0x1], 1 }
 0x8da   :  { %2779 = vsyncpa [#allocation7], 1 }
 0x8db   :  { %2781 = vsyncpa [#allocation7 + $0x1], 1 }
 0x8dc   :  { %2782 = vsyncpa [#allocation5], 1 }
 0x8dd   :  { %2784 = vsyncpa [#allocation5 + $0x1], 1 }
 0x8de   :  { %2785 = vsyncpa [#allocation10], 1 }
 0x8df   :  { %2787 = vsyncpa [#allocation10 + $0x1], 1 }

</bundles_post_ra>
